<compile_context>
chip_gen: v7x
topology: tpu7x:2x2x1
jax: 0.10.0
libtpu: 0.0.40
codegen_flags: <defaults>
</compile_context>

<pallas_src>
import jax
import jax.numpy as jnp
from jax.experimental import pallas as pl
from jax.experimental.pallas import tpu as pltpu


def _shift_h(a, dy):
    """b[h, w, :] = a[h+dy, w, :], zero-filled out of range. a: (H, W, P)."""
    if dy == 0:
        return a
    z = jnp.zeros((1,) + a.shape[1:], a.dtype)
    if dy > 0:
        return jnp.concatenate([a[1:], z], axis=0)
    return jnp.concatenate([z, a[:-1]], axis=0)


def _shift_w(a, dx):
    """b[h, w, :] = a[h, w+dx, :], zero-filled out of range. a: (H, W, P)."""
    if dx == 0:
        return a
    z = jnp.zeros((a.shape[0], 1, a.shape[2]), a.dtype)
    if dx > 0:
        return jnp.concatenate([a[:, 1:, :], z], axis=1)
    return jnp.concatenate([z, a[:, :-1, :]], axis=1)


def _bottleneck_kernel(x_ref, w1_ref, s1_ref, b1_ref,
                       w2_ref, s2_ref, b2_ref,
                       w3_ref, s3_ref, b3_ref, out_ref):
    # x_ref:  (1, H, W, Cin)   one batch element, NHWC, f32
    # w1_ref: (Cin, P)         bf16
    # w2_ref: (9*P, P)         bf16, taps flattened in (ky, kx, cin) order
    # w3_ref: (P, Cout)        bf16   (Cout == Cin, no-downsample path)
    # s*/b*:  (1, C)           folded BN scale/bias, f32
    _, H, W, Cin = x_ref.shape
    P = w1_ref.shape[1]
    Cout = w3_ref.shape[1]
    HW = H * W

    x2d = x_ref[0].reshape(HW, Cin)                         # (HW, Cin) f32

    # ---- conv1 (1x1) + bn1 + relu -------------------------------------
    out1 = jnp.dot(x2d.astype(jnp.bfloat16), w1_ref[...],
                   preferred_element_type=jnp.float32)      # (HW, P) f32
    out1 = jnp.maximum(out1 * s1_ref[...] + b1_ref[...], 0.0)
    out1_3d = out1.reshape(H, W, P)

    # ---- conv2 (3x3, stride 1, pad 1) as ONE K=9P matmul --------------
    taps = []
    for dy in (-1, 0, 1):
        a_dy = _shift_h(out1_3d, dy)                        # outer-dim shift: cheap
        for dx in (-1, 0, 1):
            taps.append(_shift_w(a_dy, dx).reshape(HW, P))  # sublane shift
    im2col = jnp.concatenate(taps, axis=1).astype(jnp.bfloat16)   # (HW, 9P)
    out2 = jnp.dot(im2col, w2_ref[...],
                   preferred_element_type=jnp.float32)      # (HW, P) f32
    out2 = jnp.maximum(out2 * s2_ref[...] + b2_ref[...], 0.0)

    # ---- conv3 (1x1) + bn3 + residual + relu --------------------------
    out3 = jnp.dot(out2.astype(jnp.bfloat16), w3_ref[...],
                   preferred_element_type=jnp.float32)      # (HW, Cout) f32
    out3 = out3 * s3_ref[...] + b3_ref[...]
    out = jnp.maximum(out3 + x2d, 0.0)                      # identity shortcut
    out_ref[0] = out.reshape(H, W, Cout)


def bottleneck_forward_nhwc(x_nhwc, params):
    """Fused Bottleneck on NHWC activations. x_nhwc: (N, H, W, Cin) float32."""
    N, H, W, Cin = x_nhwc.shape
    P = params["w1"].shape[1]
    Cout = params["w3"].shape[1]
    assert Cout == Cin, "no-downsample path requires inplanes == 4*planes"

    fixed = lambda shape: pl.BlockSpec(shape, lambda n: (0,) * len(shape))

    return pl.pallas_call(
        _bottleneck_kernel,
        out_shape=jax.ShapeDtypeStruct((N, H, W, Cout), jnp.float32),
        grid_spec=pltpu.PrefetchScalarGridSpec(
            num_scalar_prefetch=0,
            grid=(N,),
            in_specs=[
                pl.BlockSpec((1, H, W, Cin), lambda n: (n, 0, 0, 0)),   # x
                fixed((Cin, P)),                                        # w1
                fixed((1, P)), fixed((1, P)),                           # s1, b1
                fixed((9 * P, P)),                                      # w2 (flattened)
                fixed((1, P)), fixed((1, P)),                           # s2, b2
                fixed((P, Cout)),                                       # w3
                fixed((1, Cout)), fixed((1, Cout)),                     # s3, b3
            ],
            out_specs=pl.BlockSpec((1, H, W, Cout), lambda n: (n, 0, 0, 0)),
        ),
        compiler_params=pltpu.CompilerParams(
            dimension_semantics=("parallel",)),
    )(x_nhwc, params["w1"], params["s1"], params["b1"],
      params["w2"], params["s2"], params["b2"],
      params["w3"], params["s3"], params["b3"])


def bottleneck_forward(x_nchw, params):
    """PyTorch-interface wrapper (NCHW in / NCHW out).

    NOTE: in a real network keep activations NHWC across blocks and call
    bottleneck_forward_nhwc directly; the two transposes here cost a full HBM
    round-trip each and exist only to match the standalone PyTorch interface.
    """
    x = jnp.transpose(x_nchw, (0, 2, 3, 1))          # NCHW -> NHWC
    out = bottleneck_forward_nhwc(x, params)
    return jnp.transpose(out, (0, 3, 1, 2))          # NHWC -> NCHW


# ----------------------------------------------------------------------
# Parameter construction (deterministic, synthetic) + pure-JAX reference
# ----------------------------------------------------------------------
def _fold_bn(gamma, beta, mean, var, eps=1e-5):
    scale = gamma / jnp.sqrt(var + eps)
    bias = beta - mean * scale
    return scale, bias


def make_params(key, inplanes, planes):
    ks = jax.random.split(key, 16)
    expansion = 4
    width = planes                           # groups=1, base_width=64

    # PyTorch conv weight layouts -> kernel-friendly layouts.
    w1_t = 0.1 * jax.random.normal(ks[0], (width, inplanes, 1, 1))          # (P, Cin, 1, 1)
    w2_t = 0.1 * jax.random.normal(ks[1], (width, width, 3, 3))             # (P, P, 3, 3)
    w3_t = 0.1 * jax.random.normal(ks[2], (expansion * planes, width, 1, 1))

    def bn(kg, kb, km, kv, c):
        gamma = 1.0 + 0.1 * jax.random.normal(kg, (c,))
        beta = 0.1 * jax.random.normal(kb, (c,))
        mean = 0.1 * jax.random.normal(km, (c,))
        var = jax.random.uniform(kv, (c,), minval=0.5, maxval=1.5)
        return _fold_bn(gamma, beta, mean, var)

    s1, b1 = bn(ks[3], ks[4], ks[5], ks[6], width)
    s2, b2 = bn(ks[7], ks[8], ks[9], ks[10], width)
    s3, b3 = bn(ks[11], ks[12], ks[13], ks[14], expansion * planes)

    # Matmul weights are bf16 (MXU inputs); BN scale/bias stay f32 (VPU math).
    w2_flat = jnp.transpose(w2_t, (2, 3, 1, 0)).reshape(9 * width, width)   # (ky,kx,Cin)->rows
    params = {
        "w1": jnp.transpose(w1_t[:, :, 0, 0], (1, 0)).astype(jnp.bfloat16),  # (Cin, P)
        "w2": w2_flat.astype(jnp.bfloat16),                                  # (9P, P)
        "w3": jnp.transpose(w3_t[:, :, 0, 0], (1, 0)).astype(jnp.bfloat16),  # (P, Cout)
        "s1": s1.reshape(1, -1).astype(jnp.float32),
        "b1": b1.reshape(1, -1).astype(jnp.float32),
        "s2": s2.reshape(1, -1).astype(jnp.float32),
        "b2": b2.reshape(1, -1).astype(jnp.float32),
        "s3": s3.reshape(1, -1).astype(jnp.float32),
        "b3": b3.reshape(1, -1).astype(jnp.float32),
    }
    return params


def reference_forward(x_nchw, p):
    """Pure-JAX (non-Pallas) reference with identical inference-mode numerics
    (bf16 matmul inputs, f32 accumulation, f32 BN/ReLU/residual)."""
    f32 = jnp.float32
    x = jnp.transpose(x_nchw, (0, 2, 3, 1)).astype(f32)
    N, H, W, Cin = x.shape
    P = p["w1"].shape[1]

    out1 = jnp.einsum("nhwc,cp->nhwp", x.astype(jnp.bfloat16), p["w1"],
                      preferred_element_type=f32)
    out1 = jnp.maximum(out1 * p["s1"] + p["b1"], 0.0)

    xp = jnp.pad(out1, ((0, 0), (1, 1), (1, 1), (0, 0)))
    w2 = p["w2"].reshape(3, 3, P, P)
    out2 = jnp.zeros(out1.shape, f32)
    for ky in range(3):
        for kx in range(3):
            out2 = out2 + jnp.einsum(
                "nhwc,cp->nhwp",
                xp[:, ky:ky + H, kx:kx + W, :].astype(jnp.bfloat16),
                w2[ky, kx], preferred_element_type=f32)
    out2 = jnp.maximum(out2 * p["s2"] + p["b2"], 0.0)

    out3 = jnp.einsum("nhwc,cp->nhwp", out2.astype(jnp.bfloat16), p["w3"],
                      preferred_element_type=f32)
    out3 = out3 * p["s3"] + p["b3"]
    out = jnp.maximum(out3 + x, 0.0)
    return jnp.transpose(out, (0, 3, 1, 2))


if __name__ == "__main__":
    key = jax.random.PRNGKey(0)
    kx, kp = jax.random.split(key)

    # Lane-friendly small test: Cout = Cin = 128 (dense output lanes), P = 32,
    # M = H*W = 256 per grid step, grid of 2 steps (feeds both v7x TensorCores).
    planes = 32
    inplanes = 4 * planes      # = 128, identity shortcut (downsample=None)
    N, H, W = 2, 16, 16

    x = jax.random.normal(kx, (N, inplanes, H, W), dtype=jnp.float32)
    params = make_params(kp, inplanes, planes)

    out = jax.block_until_ready(bottleneck_forward(x, params))

    ref = reference_forward(x, params)
    assert out.shape == (N, 4 * planes, H, W)
    assert jnp.allclose(out, ref, atol=2e-2, rtol=2e-2), "mismatch vs reference"

    print("KERNEL_OK")
</pallas_src>

<mosaic_0001>
module attributes {stable_mosaic.version = 11 : i64} {
  func.func @_bottleneck_kernel(%arg0: i32, %arg1: memref<1x16x16x128xf32, #tpu.memory_space<vmem>>, %arg2: memref<128x32xbf16, #tpu.memory_space<vmem>>, %arg3: memref<1x32xf32, #tpu.memory_space<vmem>>, %arg4: memref<1x32xf32, #tpu.memory_space<vmem>>, %arg5: memref<288x32xbf16, #tpu.memory_space<vmem>>, %arg6: memref<1x32xf32, #tpu.memory_space<vmem>>, %arg7: memref<1x32xf32, #tpu.memory_space<vmem>>, %arg8: memref<32x128xbf16, #tpu.memory_space<vmem>>, %arg9: memref<1x128xf32, #tpu.memory_space<vmem>>, %arg10: memref<1x128xf32, #tpu.memory_space<vmem>>, %arg11: memref<1x16x16x128xf32, #tpu.memory_space<vmem>>) attributes {dimension_semantics = [#tpu.dimension_semantics<parallel>], iteration_bounds = array<i64: 2>, scalar_prefetch = 0 : i64, scratch_operands = 0 : i64, tpu.core_type = #tpu.core_type<tc>, window_params = [{transform_indices = @transform_0, window_bounds = array<i64: 1, 16, 16, 128>}, {pipeline_mode = #tpu.pipeline_mode<synchronous>, transform_indices = @transform_1, window_bounds = array<i64: 128, 32>}, {pipeline_mode = #tpu.pipeline_mode<synchronous>, transform_indices = @transform_2, window_bounds = array<i64: 1, 32>}, {pipeline_mode = #tpu.pipeline_mode<synchronous>, transform_indices = @transform_3, window_bounds = array<i64: 1, 32>}, {pipeline_mode = #tpu.pipeline_mode<synchronous>, transform_indices = @transform_4, window_bounds = array<i64: 288, 32>}, {pipeline_mode = #tpu.pipeline_mode<synchronous>, transform_indices = @transform_5, window_bounds = array<i64: 1, 32>}, {pipeline_mode = #tpu.pipeline_mode<synchronous>, transform_indices = @transform_6, window_bounds = array<i64: 1, 32>}, {pipeline_mode = #tpu.pipeline_mode<synchronous>, transform_indices = @transform_7, window_bounds = array<i64: 32, 128>}, {pipeline_mode = #tpu.pipeline_mode<synchronous>, transform_indices = @transform_8, window_bounds = array<i64: 1, 128>}, {pipeline_mode = #tpu.pipeline_mode<synchronous>, transform_indices = @transform_9, window_bounds = array<i64: 1, 128>}, {transform_indices = @transform_10, window_bounds = array<i64: 1, 16, 16, 128>}]} {
    %c0 = arith.constant 0 : index
    %c0_0 = arith.constant 0 : index
    %c0_1 = arith.constant 0 : index
    %c0_2 = arith.constant 0 : index
    %0 = vector.load %arg1[%c0, %c0_0, %c0_1, %c0_2] : memref<1x16x16x128xf32, #tpu.memory_space<vmem>>, vector<1x16x16x128xf32>
    %1 = vector.shape_cast %0 : vector<1x16x16x128xf32> to vector<16x16x128xf32>
    %2 = vector.shape_cast %1 : vector<16x16x128xf32> to vector<256x128xf32>
    %3 = arith.truncf %2 : vector<256x128xf32> to vector<256x128xbf16>
    %c0_3 = arith.constant 0 : index
    %c0_4 = arith.constant 0 : index
    %4 = vector.load %arg2[%c0_3, %c0_4] : memref<128x32xbf16, #tpu.memory_space<vmem>>, vector<128x32xbf16>
    %cst = arith.constant dense<0.000000e+00> : vector<256x32xf32>
    %5 = tpu.matmul %3, %4, %cst {dimension_numbers = #tpu.dot_dimension_numbers<[1], [0], [0], [1], [0, 0, 1, 1], [], []>} : vector<256x128xbf16>, vector<128x32xbf16>, vector<256x32xf32> -> vector<256x32xf32>
    %c0_5 = arith.constant 0 : index
    %c0_6 = arith.constant 0 : index
    %6 = vector.load %arg3[%c0_5, %c0_6] : memref<1x32xf32, #tpu.memory_space<vmem>>, vector<1x32xf32>
    %7 = vector.broadcast %6 : vector<1x32xf32> to vector<256x32xf32>
    %8 = arith.mulf %5, %7 : vector<256x32xf32>
    %c0_7 = arith.constant 0 : index
    %c0_8 = arith.constant 0 : index
    %9 = vector.load %arg4[%c0_7, %c0_8] : memref<1x32xf32, #tpu.memory_space<vmem>>, vector<1x32xf32>
    %10 = vector.broadcast %9 : vector<1x32xf32> to vector<256x32xf32>
    %11 = arith.addf %8, %10 : vector<256x32xf32>
    %cst_9 = arith.constant 0.000000e+00 : f32
    %12 = vector.broadcast %cst_9 : f32 to vector<256x32xf32>
    %13 = arith.maximumf %11, %12 : vector<256x32xf32>
    %14 = vector.shape_cast %13 : vector<256x32xf32> to vector<16x16x32xf32>
    %cst_10 = arith.constant 0.000000e+00 : f32
    %15 = vector.broadcast %cst_10 : f32 to vector<1x16x32xf32>
    %16 = vector.extract_strided_slice %14 {offsets = [0, 0, 0], sizes = [15, 16, 32], strides = [1, 1, 1]} : vector<16x16x32xf32> to vector<15x16x32xf32>
    %17 = tpu.concatenate %15, %16 in 0 : vector<1x16x32xf32>, vector<15x16x32xf32> -> vector<16x16x32xf32>
    %cst_11 = arith.constant 0.000000e+00 : f32
    %18 = vector.broadcast %cst_11 : f32 to vector<16x1x32xf32>
    %19 = vector.extract_strided_slice %17 {offsets = [0, 0, 0], sizes = [16, 15, 32], strides = [1, 1, 1]} : vector<16x16x32xf32> to vector<16x15x32xf32>
    %20 = tpu.concatenate %18, %19 in 1 : vector<16x1x32xf32>, vector<16x15x32xf32> -> vector<16x16x32xf32>
    %21 = vector.shape_cast %20 : vector<16x16x32xf32> to vector<256x32xf32>
    %22 = vector.shape_cast %17 : vector<16x16x32xf32> to vector<256x32xf32>
    %cst_12 = arith.constant 0.000000e+00 : f32
    %23 = vector.broadcast %cst_12 : f32 to vector<16x1x32xf32>
    %24 = vector.extract_strided_slice %17 {offsets = [0, 1, 0], sizes = [16, 15, 32], strides = [1, 1, 1]} : vector<16x16x32xf32> to vector<16x15x32xf32>
    %25 = tpu.concatenate %24, %23 in 1 : vector<16x15x32xf32>, vector<16x1x32xf32> -> vector<16x16x32xf32>
    %26 = vector.shape_cast %25 : vector<16x16x32xf32> to vector<256x32xf32>
    %cst_13 = arith.constant 0.000000e+00 : f32
    %27 = vector.broadcast %cst_13 : f32 to vector<16x1x32xf32>
    %28 = vector.extract_strided_slice %14 {offsets = [0, 0, 0], sizes = [16, 15, 32], strides = [1, 1, 1]} : vector<16x16x32xf32> to vector<16x15x32xf32>
    %29 = tpu.concatenate %27, %28 in 1 : vector<16x1x32xf32>, vector<16x15x32xf32> -> vector<16x16x32xf32>
    %30 = vector.shape_cast %29 : vector<16x16x32xf32> to vector<256x32xf32>
    %31 = vector.shape_cast %14 : vector<16x16x32xf32> to vector<256x32xf32>
    %cst_14 = arith.constant 0.000000e+00 : f32
    %32 = vector.broadcast %cst_14 : f32 to vector<16x1x32xf32>
    %33 = vector.extract_strided_slice %14 {offsets = [0, 1, 0], sizes = [16, 15, 32], strides = [1, 1, 1]} : vector<16x16x32xf32> to vector<16x15x32xf32>
    %34 = tpu.concatenate %33, %32 in 1 : vector<16x15x32xf32>, vector<16x1x32xf32> -> vector<16x16x32xf32>
    %35 = vector.shape_cast %34 : vector<16x16x32xf32> to vector<256x32xf32>
    %cst_15 = arith.constant 0.000000e+00 : f32
    %36 = vector.broadcast %cst_15 : f32 to vector<1x16x32xf32>
    %37 = vector.extract_strided_slice %14 {offsets = [1, 0, 0], sizes = [15, 16, 32], strides = [1, 1, 1]} : vector<16x16x32xf32> to vector<15x16x32xf32>
    %38 = tpu.concatenate %37, %36 in 0 : vector<15x16x32xf32>, vector<1x16x32xf32> -> vector<16x16x32xf32>
    %cst_16 = arith.constant 0.000000e+00 : f32
    %39 = vector.broadcast %cst_16 : f32 to vector<16x1x32xf32>
    %40 = vector.extract_strided_slice %38 {offsets = [0, 0, 0], sizes = [16, 15, 32], strides = [1, 1, 1]} : vector<16x16x32xf32> to vector<16x15x32xf32>
    %41 = tpu.concatenate %39, %40 in 1 : vector<16x1x32xf32>, vector<16x15x32xf32> -> vector<16x16x32xf32>
    %42 = vector.shape_cast %41 : vector<16x16x32xf32> to vector<256x32xf32>
    %43 = vector.shape_cast %38 : vector<16x16x32xf32> to vector<256x32xf32>
    %cst_17 = arith.constant 0.000000e+00 : f32
    %44 = vector.broadcast %cst_17 : f32 to vector<16x1x32xf32>
    %45 = vector.extract_strided_slice %38 {offsets = [0, 1, 0], sizes = [16, 15, 32], strides = [1, 1, 1]} : vector<16x16x32xf32> to vector<16x15x32xf32>
    %46 = tpu.concatenate %45, %44 in 1 : vector<16x15x32xf32>, vector<16x1x32xf32> -> vector<16x16x32xf32>
    %47 = vector.shape_cast %46 : vector<16x16x32xf32> to vector<256x32xf32>
    %48 = tpu.concatenate %21, %22, %26, %30, %31, %35, %42, %43, %47 in 1 : vector<256x32xf32>, vector<256x32xf32>, vector<256x32xf32>, vector<256x32xf32>, vector<256x32xf32>, vector<256x32xf32>, vector<256x32xf32>, vector<256x32xf32>, vector<256x32xf32> -> vector<256x288xf32>
    %49 = arith.truncf %48 : vector<256x288xf32> to vector<256x288xbf16>
    %c0_18 = arith.constant 0 : index
    %c0_19 = arith.constant 0 : index
    %50 = vector.load %arg5[%c0_18, %c0_19] : memref<288x32xbf16, #tpu.memory_space<vmem>>, vector<288x32xbf16>
    %cst_20 = arith.constant dense<0.000000e+00> : vector<256x32xf32>
    %51 = tpu.matmul %49, %50, %cst_20 {dimension_numbers = #tpu.dot_dimension_numbers<[1], [0], [0], [1], [0, 0, 1, 1], [], []>} : vector<256x288xbf16>, vector<288x32xbf16>, vector<256x32xf32> -> vector<256x32xf32>
    %c0_21 = arith.constant 0 : index
    %c0_22 = arith.constant 0 : index
    %52 = vector.load %arg6[%c0_21, %c0_22] : memref<1x32xf32, #tpu.memory_space<vmem>>, vector<1x32xf32>
    %53 = vector.broadcast %52 : vector<1x32xf32> to vector<256x32xf32>
    %54 = arith.mulf %51, %53 : vector<256x32xf32>
    %c0_23 = arith.constant 0 : index
    %c0_24 = arith.constant 0 : index
    %55 = vector.load %arg7[%c0_23, %c0_24] : memref<1x32xf32, #tpu.memory_space<vmem>>, vector<1x32xf32>
    %56 = vector.broadcast %55 : vector<1x32xf32> to vector<256x32xf32>
    %57 = arith.addf %54, %56 : vector<256x32xf32>
    %cst_25 = arith.constant 0.000000e+00 : f32
    %58 = vector.broadcast %cst_25 : f32 to vector<256x32xf32>
    %59 = arith.maximumf %57, %58 : vector<256x32xf32>
    %60 = arith.truncf %59 : vector<256x32xf32> to vector<256x32xbf16>
    %c0_26 = arith.constant 0 : index
    %c0_27 = arith.constant 0 : index
    %61 = vector.load %arg8[%c0_26, %c0_27] : memref<32x128xbf16, #tpu.memory_space<vmem>>, vector<32x128xbf16>
    %cst_28 = arith.constant dense<0.000000e+00> : vector<256x128xf32>
    %62 = tpu.matmul %60, %61, %cst_28 {dimension_numbers = #tpu.dot_dimension_numbers<[1], [0], [0], [1], [0, 0, 1, 1], [], []>} : vector<256x32xbf16>, vector<32x128xbf16>, vector<256x128xf32> -> vector<256x128xf32>
    %c0_29 = arith.constant 0 : index
    %c0_30 = arith.constant 0 : index
    %63 = vector.load %arg9[%c0_29, %c0_30] : memref<1x128xf32, #tpu.memory_space<vmem>>, vector<1x128xf32>
    %64 = vector.broadcast %63 : vector<1x128xf32> to vector<256x128xf32>
    %65 = arith.mulf %62, %64 : vector<256x128xf32>
    %c0_31 = arith.constant 0 : index
    %c0_32 = arith.constant 0 : index
    %66 = vector.load %arg10[%c0_31, %c0_32] : memref<1x128xf32, #tpu.memory_space<vmem>>, vector<1x128xf32>
    %67 = vector.broadcast %66 : vector<1x128xf32> to vector<256x128xf32>
    %68 = arith.addf %65, %67 : vector<256x128xf32>
    %69 = arith.addf %68, %2 : vector<256x128xf32>
    %cst_33 = arith.constant 0.000000e+00 : f32
    %70 = vector.broadcast %cst_33 : f32 to vector<256x128xf32>
    %71 = arith.maximumf %69, %70 : vector<256x128xf32>
    %72 = vector.shape_cast %71 : vector<256x128xf32> to vector<16x16x128xf32>
    %c0_34 = arith.constant 0 : index
    %c0_35 = arith.constant 0 : index
    %c0_36 = arith.constant 0 : index
    %c0_37 = arith.constant 0 : index
    %73 = vector.load %arg11[%c0_34, %c0_35, %c0_36, %c0_37] : memref<1x16x16x128xf32, #tpu.memory_space<vmem>>, vector<1x16x16x128xf32>
    %74 = vector.shape_cast %73 : vector<1x16x16x128xf32> to vector<16x16x128xf32>
    %75 = vector.shape_cast %72 : vector<16x16x128xf32> to vector<1x16x16x128xf32>
    tpu.vector_store %arg11[%c0_34, %c0_35, %c0_36, %c0_37], %75 {strides = array<i32>} : memref<1x16x16x128xf32, #tpu.memory_space<vmem>>, vector<1x16x16x128xf32>,
    return
  }
  func.func @transform_0(%arg0: i32) -> (i32, i32, i32, i32) {
    %c0_i32 = arith.constant 0 : i32
    %c0_i32_0 = arith.constant 0 : i32
    %c0_i32_1 = arith.constant 0 : i32
    %c0_i32_2 = arith.constant 0 : i32
    return %arg0, %c0_i32, %c0_i32_0, %c0_i32_1 : i32, i32, i32, i32
  }
  func.func @transform_1(%arg0: i32) -> (i32, i32) {
    %c0_i32 = arith.constant 0 : i32
    %c0_i32_0 = arith.constant 0 : i32
    %c0_i32_1 = arith.constant 0 : i32
    return %c0_i32, %c0_i32_0 : i32, i32
  }
  func.func @transform_2(%arg0: i32) -> (i32, i32) {
    %c0_i32 = arith.constant 0 : i32
    %c0_i32_0 = arith.constant 0 : i32
    %c0_i32_1 = arith.constant 0 : i32
    return %c0_i32, %c0_i32_0 : i32, i32
  }
  func.func @transform_3(%arg0: i32) -> (i32, i32) {
    %c0_i32 = arith.constant 0 : i32
    %c0_i32_0 = arith.constant 0 : i32
    %c0_i32_1 = arith.constant 0 : i32
    return %c0_i32, %c0_i32_0 : i32, i32
  }
  func.func @transform_4(%arg0: i32) -> (i32, i32) {
    %c0_i32 = arith.constant 0 : i32
    %c0_i32_0 = arith.constant 0 : i32
    %c0_i32_1 = arith.constant 0 : i32
    return %c0_i32, %c0_i32_0 : i32, i32
  }
  func.func @transform_5(%arg0: i32) -> (i32, i32) {
    %c0_i32 = arith.constant 0 : i32
    %c0_i32_0 = arith.constant 0 : i32
    %c0_i32_1 = arith.constant 0 : i32
    return %c0_i32, %c0_i32_0 : i32, i32
  }
  func.func @transform_6(%arg0: i32) -> (i32, i32) {
    %c0_i32 = arith.constant 0 : i32
    %c0_i32_0 = arith.constant 0 : i32
    %c0_i32_1 = arith.constant 0 : i32
    return %c0_i32, %c0_i32_0 : i32, i32
  }
  func.func @transform_7(%arg0: i32) -> (i32, i32) {
    %c0_i32 = arith.constant 0 : i32
    %c0_i32_0 = arith.constant 0 : i32
    %c0_i32_1 = arith.constant 0 : i32
    return %c0_i32, %c0_i32_0 : i32, i32
  }
  func.func @transform_8(%arg0: i32) -> (i32, i32) {
    %c0_i32 = arith.constant 0 : i32
    %c0_i32_0 = arith.constant 0 : i32
    %c0_i32_1 = arith.constant 0 : i32
    return %c0_i32, %c0_i32_0 : i32, i32
  }
  func.func @transform_9(%arg0: i32) -> (i32, i32) {
    %c0_i32 = arith.constant 0 : i32
    %c0_i32_0 = arith.constant 0 : i32
    %c0_i32_1 = arith.constant 0 : i32
    return %c0_i32, %c0_i32_0 : i32, i32
  }
  func.func @transform_10(%arg0: i32) -> (i32, i32, i32, i32) {
    %c0_i32 = arith.constant 0 : i32
    %c0_i32_0 = arith.constant 0 : i32
    %c0_i32_1 = arith.constant 0 : i32
    %c0_i32_2 = arith.constant 0 : i32
    return %arg0, %c0_i32, %c0_i32_0, %c0_i32_1 : i32, i32, i32, i32
  }
}

</mosaic_0001>

<bundles_post_ra>
// kernel: tpu_custom_call.1
= control target key start
LH: loop header
LB: loop body
LE: loop exit
PB: predicated region body
PF: predicated region fallthrough
CT: control target
= control target key end

     0   :  { %15 = vsyncpa [#allocation3], 0  ;;  %s6002_s0 = inlined_call_operand.hbm [shape: f32[2,16,16,128], index: 0, kind: input, shape index: {}]   ;;  %s6003_s1 = inlined_call_operand.vmem [shape: bf16[128,32], index: 1, kind: input, shape index: {}]   ;;  %s6004_s2 = inlined_call_operand.vmem [shape: f32[1,32], index: 2, kind: input, shape index: {}]   ;;  %s6005_s3 = inlined_call_operand.vmem [shape: f32[1,32], index: 3, kind: input, shape index: {}]   ;;  %s6006_s4 = inlined_call_operand.vmem [shape: bf16[288,32], index: 4, kind: input, shape index: {}]   ;;  %s6007_s5 = inlined_call_operand.vmem [shape: f32[1,32], index: 5, kind: input, shape index: {}]   ;;  %s6008_s6 = inlined_call_operand.vmem [shape: f32[1,32], index: 6, kind: input, shape index: {}]   ;;  %s6009_s7 = inlined_call_operand.vmem [shape: bf16[32,128], index: 7, kind: input, shape index: {}]   ;;  %s6010_s8 = inlined_call_operand.vmem [shape: f32[1,128], index: 8, kind: input, shape index: {}]   ;;  %s6011_s9 = inlined_call_operand.vmem [shape: f32[1,128], index: 9, kind: input, shape index: {}]   ;;  %s6012_s10 = inlined_call_operand.hbm [shape: f32[2,16,16,128], index: 10, kind: output, shape index: {}]  }
   0x1   :  { %17 = vsyncpa [#allocation3 + $0x1], 0 }
   0x2   :  { %18 = vsyncpa [#allocation4], 0 }
   0x3   :  { %20 = vsyncpa [#allocation4 + $0x1], 0  ;;  %s4107_s13 = smov 0   ;;  %s4109_s14 = smov 0  }
   0x4   :  { %s4111_s15 = smov 0   ;;  %s4113_s16 = smov 0  }
   0x5 LB: > { %s4128_s17 = sadd.s32 4294967295, %s4040_s16   ;;  %s2970_s18 = sadd.s32 4294967294, %s4040_s16   ;;  %s4040_s16 = sphi %s4113_s16, %s6189_s16   ;;  %s4036_s15 = sphi %s4111_s15, %s6188_s15   ;;  %s4032_s14 = sphi %s4109_s14, %s6187_s14   ;;  %s4028_s13 = sphi %s4107_s13, %s6186_s13  }
   0x6   : > { %s4132_s19 = sadd.s32 1, %s4040_s16   ;;  %s33_s20 = sadd.s32 1, %s4036_s15 }
   0x7   : > { %s30_s21 = ssub.s32 %s4040_s16, %s4132_s19  ;;  %p40_p0 = scmp.ne.s32.totalorder %s4036_s15, %s4032_s14 }
   0x8   : > { %p31_p1 = scmp.eq.s32.totalorder %s30_s21, 0  ;;  %p41_p2 = scmp.eq.s32.totalorder %s4040_s16, 0 }
   0x9   : > { %p46_p3 = scmp.ne.s32.totalorder %s4032_s14, %s4028_s13  ;;  %p47_p4 = scmp.eq.s32.totalorder %s4128_s17, 0 }
   0xa   : > { %s4144_s22 = scalar_select %p31_p1, %s4036_s15, %s33_s20  }
   0xb   : > { %p4146_p5 = por %p41_p2, %p40_p0  ;;  %p4150_p6 = por %p47_p4, %p46_p3 }
   0xc   : > { %6066 = sst [smem:[#allocation8_spill]] %s4144_s22  ;;  %p259_p7 = scmp.eq.s32.totalorder %s4128_s17, 1 }
   0xd   : > { %p265_p8 = scmp.eq.s32.totalorder %s2970_s18, 1  ;;  %p3372_p10 = scmp.lt.s32.totalorder %s4040_s16, 2 }
   0xe   : > { %p4157_p11 = por %p259_p7, %p40_p0  ;;  %s312_s27 = sand.u32 1, %s4036_s15  }
   0xf   : > { %p4161_p12 = por %p265_p8, %p46_p3  ;;  %s3050_s28 = sshll.u32 %s4040_s16, 12 }
  0x10   : > { %s6069_s25 = scalar_select %p4157_p11, 1, 0 }
  0x11   : > { %s6070_s26 = scalar_select %p4161_p12, 1, 0 }
  0x12   : > { %s2973_s29 = sshll.u32 %s312_s27, 8  ;;  %s4170_s12 = scalar_lea.hbm %s6002_s0, %s3050_s28 }
  0x13   : > { %s316_s18 = scalar_lea.vmem [#allocation2], %s2973_s29  ;;  %p4174_p13 = pnand %p3372_p10, %p4146_p5 }
  0x14   : > { %s323_s20 = sshll.u32 %s316_s18, 4  ;;  %s4180_s22 = scalar_lea.sflag [#allocation3], %s312_s27  ;;  %s4178_s20 = int_to_ptr.vmem [resolvable:$true] %s323_s20 }
  0x15   : > { %s3944_s30 = scalar_lea.hbm %s4170_s12, 4096  ;;  %p3946_p1 = pneg %p4174_p13 }
  0x16   : > { %p3945_p0 = scmp.ne.s32.totalorder %s4170_s12, %s3944_s30  ;;  %s3949_s29 = scalar_lea.hbm %s6002_s0, 8192 }
  0x17   : > { %p3950_p4 = scmp.lt.u32.totalorder %s4170_s12, %s6002_s0  ;;  %p3951_p5 = scmp.lt.u32.totalorder %s3949_s29, %s3944_s30 }
  0x18   : > { %p3947_p2 = pnand %p3946_p1, %p3945_p0  ;;  %p3953_p8 = scmp.lt.u32.totalorder %s3944_s30, %s4170_s12 }
  0x19   : > { %p3952_p7 = por %p3951_p5, %p3950_p4 }
  0x1a   : > { %p3948_p3 = pneg %p3947_p2 }
  0x1b   : > { %p3954_p10 = por %p3953_p8, %p3952_p7 }
  0x1d   : > { %p3955_p9 = pnand %p3954_p10, %p3948_p3 }
  0x1f   : > { %3958 = shalt.err (!%p3955_p9)
}
  0x20   : > { %s3959_s27 = scalar_lea.vmem %s4178_s20, 4096  ;;  %s4042_s28 = smov [#allocation2]  }
  0x21   : > { %p3960_p0 = scmp.ne.s32.totalorder %s4178_s20, %s3959_s27  ;;  %s3964_s23 = sshll.u32 %s4042_s28, 4  ;;  %s3965_s23 = int_to_ptr.vmem [resolvable:$false] %s3964_s23 }
  0x22   : > { %s3966_s11 = scalar_lea.vmem %s3965_s23, 8192  ;;  %p3967_p11 = scmp.lt.s32.totalorder %s4178_s20, %s3965_s23 }
  0x23   : > { %p3962_p2 = pnand %p3960_p0, %p3946_p1  ;;  %p3968_p4 = scmp.lt.s32.totalorder %s3966_s11, %s3959_s27 }
  0x25   : > { %p3963_p12 = pneg %p3962_p2  ;;  %p3969_p5 = por %p3968_p4, %p3967_p11 }
  0x27   : > { %p3970_p7 = pnand %p3969_p5, %p3963_p12 }
  0x29   : > { %3973 = shalt.err (!%p3970_p7)
}
  0x2a   : > { %s4043_s30 = smov 128   ;;  %s4044_s29 = smov 8  }
  0x2b   : > { %3367 = dma.hbm_to_vmem [thread:$0]  (!%p4174_p13), %s4170_s12, 4096, %s4178_s20, %s4180_s22, %s4043_s30, %s4043_s30, %s4044_s29  }
  0x2c   : > { %p2976_p9 = scmp.ge.s32.totalorder %s4040_s16, 1  ;;  %p331_p1 = scmp.lt.s32.totalorder %s4040_s16, 3 }
  0x2e   : > { %p332_p3 = pnand %p2976_p9, %p331_p1 }
  0x30   : > { %335 = sbr.rel (%p332_p3) target bundleno = 1089 (0x441), region = 60 }
  0x37   : > { %s4211_s18 = sand.u32 1, %s4032_s14  }
  0x38   : > { %s2977_s27 = sshll.u32 %s4211_s18, 8  ;;  %s338_s28 = scalar_lea.sflag [#allocation3], %s4211_s18 }
  0x39   : > { %s4217_s23 = scalar_lea.vmem [#allocation2], %s2977_s27 }
  0x3a   : > { %4019 = dma.done.wait (%p4150_p6), %s338_s28, 4096  }
  0x3b   : > { %4021 = vsyncadd (%p4150_p6), %s338_s28, 4294963200  ;;  %v3884_v0 = vld [vmem:[%s6003_s1] sm:$0xff]   ;;  %v3885_v1 = vld [vmem:[%s6003_s1 + $0x8] sm:$0xff]   ;;  %v6014_v56 = vmov 0.0   ;;  %vm889_vm0 = vcmask 1046528   ;;  %s4046_s29 = smov 64  }
  0x3c   : > { %3224 = vmatprep.subr.bf16.mxu0 %v3884_v0  ;;  %3344 = vmatprep.subr.bf16.mxu1 %v3884_v0  ;;  %v3886_v2 = vld [vmem:[%s6003_s1 + $0x10] sm:$0xff]   ;;  %v3887_v3 = vld [vmem:[%s6003_s1 + $0x18] sm:$0xff]   ;;  %v379_v4 = vld [vmem:[%s4217_s23] sm:$0xff]  ;;  %v4280_v57 = vrot.slane %v6014_v56, 1  ;;  %vm793_vm1 = vcmask 1040384   ;;  %vm1601_vm2 = vcmask 261120  }
  0x3d   : > { %3225 = vmatpush3.bf16.msra.mxu0 %v3884_v0  ;;  %3352 = vmatpush3.bf16.msra.mxu1 %v3884_v0  ;;  %v380_v5 = vld [vmem:[%s4217_s23 + $0x8] sm:$0xff]  ;;  %v395_v6 = vld [vmem:[%s4217_s23 + $0x80] sm:$0xff]  ;;  %v3890_v12 = vld [vmem:[%s6003_s1 + $0x30] sm:$0xff]   ;;  %s4047_s21 = smov 96   ;;  %s4048_s30 = smov 32   ;;  %vm1634_vm3 = vcmask 523264  }
  0x3e   : > { %3226 = vmatprep.subr.bf16.mxu0 %v3885_v1  ;;  %3345 = vmatprep.subr.bf16.mxu1 %v3885_v1  ;;  %v411_v7 = vpack.c.bf16 %v380_v5, %v379_v4  ;;  %v396_v8 = vld [vmem:[%s4217_s23 + $0x88] sm:$0xff]  ;;  %v3888_v10 = vld [vmem:[%s6003_s1 + $0x20] sm:$0xff]   ;;  %v3891_v13 = vld [vmem:[%s6003_s1 + $0x38] sm:$0xff]   ;;  %v4284_v58 = vsel %vm889_vm0, %v4280_v57, 0.0  ;;  %vm1667_vm4 = vcmask 785408   ;;  %s5833_s28 = scalar_lea.vmem [#allocation5], %s2977_s27 }
  0x3f   : > { %v419_v9 = vpack.c.bf16 %v396_v8, %v395_v6  ;;  %v3889_v11 = vld [vmem:[%s6003_s1 + $0x28] sm:$0xff]   ;;  %v381_v14 = vld [vmem:[%s4217_s23 + $0x10] sm:$0xff]  ;;  %v382_v15 = vld [vmem:[%s4217_s23 + $0x18] sm:$0xff]  ;;  %v3414_v59 = vpack.i.bf16 %v4284_v58, %v4280_v57  ;;  %s3051_s27 = sshll.u32 %s4128_s17, 12  ;;  %s2897_s22 = sshll.u32 %s5833_s28, 4  ;;  %s5955_s22 = int_to_ptr.vmem [resolvable:$true] %s2897_s22 }
  0x40   : > { %3240 = vmatprep.mubr.bf16.mxu0 %v411_v7  ;;  %v397_v16 = vld [vmem:[%s4217_s23 + $0x90] sm:$0xff]  ;;  %v398_v17 = vld [vmem:[%s4217_s23 + $0x98] sm:$0xff]  ;;  %v383_v18 = vld [vmem:[%s4217_s23 + $0x20] sm:$0xff]  ;;  %v412_v22 = vpack.c.bf16 %v382_v15, %v381_v14  ;;  %s5953_s24 = scalar_lea.hbm %s6012_s10, %s3051_s27  ;;  %s2884_s17 = scalar_lea.sflag [#allocation4], %s4211_s18 }
  0x41   : > { %3227 = vmatpush3.bf16.msra.mxu0 %v3885_v1  ;;  %3353 = vmatpush3.bf16.msra.mxu1 %v3885_v1  ;;  %v384_v19 = vld [vmem:[%s4217_s23 + $0x28] sm:$0xff]  ;;  %v399_v20 = vld [vmem:[%s4217_s23 + $0xa0] sm:$0xff]  ;;  %v420_v23 = vpack.c.bf16 %v398_v17, %v397_v16  ;;  %v385_v26 = vld [vmem:[%s4217_s23 + $0x30] sm:$0xff]  ;;  %s3974_s11 = scalar_lea.vmem %s5955_s22, 4096  ;;  %p6182_p11 = scmp.ne.s32.totalorder %s6069_s25, 0 }
  0x42   : > { %3228 = vmatprep.subr.bf16.mxu0 %v3886_v2  ;;  %3346 = vmatprep.subr.bf16.mxu1 %v3886_v2  ;;  %v400_v21 = vld [vmem:[%s4217_s23 + $0xa8] sm:$0xff]  ;;  %v413_v24 = vpack.c.bf16 %v384_v19, %v383_v18  ;;  %v386_v27 = vld [vmem:[%s4217_s23 + $0x38] sm:$0xff]  ;;  %v401_v28 = vld [vmem:[%s4217_s23 + $0xb0] sm:$0xff]  ;;  %p3975_p6 = scmp.ne.s32.totalorder %s5955_s22, %s3974_s11 }
  0x43   : > { %3256 = vmatprep.mubr.bf16.mxu1 %v419_v9  ;;  %v421_v25 = vpack.c.bf16 %v400_v21, %v399_v20  ;;  %v402_v29 = vld [vmem:[%s4217_s23 + $0xb8] sm:$0xff]  ;;  %v387_v30 = vld [vmem:[%s4217_s23 + $0x40] sm:$0xff]  ;;  %v388_v31 = vld [vmem:[%s4217_s23 + $0x48] sm:$0xff]  ;;  %v414_v34 = vpack.c.bf16 %v386_v27, %v385_v26  ;;  %3415 = vrot.lane.b32.xlu1 %v3414_v59, %s4046_s29 }
  0x44   : > { %v403_v32 = vld [vmem:[%s4217_s23 + $0xc0] sm:$0xff]  ;;  %v404_v33 = vld [vmem:[%s4217_s23 + $0xc8] sm:$0xff]  ;;  %v422_v35 = vpack.c.bf16 %v402_v29, %v401_v28  ;;  %v415_v36 = vpack.c.bf16 %v388_v31, %v387_v30  ;;  %v389_v38 = vld [vmem:[%s4217_s23 + $0x50] sm:$0xff]  ;;  %p3976_p12 = pnand %p3975_p6, %p6182_p11 }
  0x45   : > { %3229 = vmatpush3.bf16.msra.mxu0 %v3886_v2  ;;  %3354 = vmatpush3.bf16.msra.mxu1 %v3886_v2  ;;  %v423_v37 = vpack.c.bf16 %v404_v33, %v403_v32  ;;  %v390_v39 = vld [vmem:[%s4217_s23 + $0x58] sm:$0xff]  ;;  %v391_v40 = vld [vmem:[%s4217_s23 + $0x60] sm:$0xff]  ;;  %v405_v41 = vld [vmem:[%s4217_s23 + $0xd0] sm:$0xff] }
  0x46   : > { %3230 = vmatprep.subr.bf16.mxu0 %v3887_v3  ;;  %3347 = vmatprep.subr.bf16.mxu1 %v3887_v3  ;;  %v406_v42 = vld [vmem:[%s4217_s23 + $0xd8] sm:$0xff]  ;;  %v392_v43 = vld [vmem:[%s4217_s23 + $0x68] sm:$0xff]  ;;  %v407_v44 = vld [vmem:[%s4217_s23 + $0xe0] sm:$0xff]  ;;  %v416_v46 = vpack.c.bf16 %v390_v39, %v389_v38  ;;  %p3977_p13 = pneg %p3976_p12 }
  0x47   : > { %v408_v45 = vld [vmem:[%s4217_s23 + $0xe8] sm:$0xff]  ;;  %v424_v47 = vpack.c.bf16 %v406_v42, %v405_v41  ;;  %v417_v48 = vpack.c.bf16 %v392_v43, %v391_v40  ;;  %v393_v50 = vld [vmem:[%s4217_s23 + $0x70] sm:$0xff]  ;;  %v394_v51 = vld [vmem:[%s4217_s23 + $0x78] sm:$0xff] }
  0x48   : > { %v425_v49 = vpack.c.bf16 %v408_v45, %v407_v44  ;;  %v409_v52 = vld [vmem:[%s4217_s23 + $0xf0] sm:$0xff]  ;;  %v410_v53 = vld [vmem:[%s4217_s23 + $0xf8] sm:$0xff]  ;;  %v418_v54 = vpack.c.bf16 %v394_v51, %v393_v50  ;;  %v3892_v61 = vld [vmem:[%s6006_s4 + $0x80] sm:$0xff]  }
  0x49   : > { %3231 = vmatpush3.bf16.msra.mxu0 %v3887_v3  ;;  %3355 = vmatpush3.bf16.msra.mxu1 %v3887_v3  ;;  %v426_v55 = vpack.c.bf16 %v410_v53, %v409_v52  ;;  %v3893_v62 = vld [vmem:[%s6006_s4 + $0x88] sm:$0xff]   ;;  %v4300_v63 = vld [vmem:[%s6004_s2] ss:$0 sm:$0xff]  ;;  %v3908_v60 = vld [vmem:[%s6006_s4 + $0x78] sm:$0xff]  }
  0x4a   : > { %3232 = vmatprep.subr.bf16.mxu0 %v3888_v10  ;;  %3348 = vmatprep.subr.bf16.mxu1 %v3888_v10  ;;  %v4305_v1 = vld [vmem:[%s6005_s3] ss:$0 sm:$0xff]  ;;  %v3896_v42 = vld [vmem:[%s6006_s4 + $0x48] sm:$0xff]  }
  0x4b   : > { %v3894_v21 = vld [vmem:[%s6006_s4 + $0x40] sm:$0xff]  }
  0x4c   : > { %v3895_v30 = vld [vmem:[%s6006_s4] sm:$0xff]  }
  0x4d   : > { %3233 = vmatpush3.bf16.msra.mxu0 %v3888_v10  ;;  %3356 = vmatpush3.bf16.msra.mxu1 %v3888_v10 }
  0x4e   : > { %3234 = vmatprep.subr.bf16.mxu0 %v3889_v11  ;;  %3349 = vmatprep.subr.bf16.mxu1 %v3889_v11 }
  0x51   : > { %3235 = vmatpush3.bf16.msra.mxu0 %v3889_v11  ;;  %3357 = vmatpush3.bf16.msra.mxu1 %v3889_v11 }
  0x52   : > { %3236 = vmatprep.subr.bf16.mxu0 %v3890_v12  ;;  %3350 = vmatprep.subr.bf16.mxu1 %v3890_v12 }
  0x55   : > { %3237 = vmatpush3.bf16.msra.mxu0 %v3890_v12  ;;  %3358 = vmatpush3.bf16.msra.mxu1 %v3890_v12 }
  0x56   : > { %3238 = vmatprep.subr.bf16.mxu0 %v3891_v13  ;;  %3351 = vmatprep.subr.bf16.mxu1 %v3891_v13 }
  0x59   : > { %3239 = vmatpush3.bf16.msra.mxu0 %v3891_v13  ;;  %3359 = vmatpush3.bf16.msra.mxu1 %v3891_v13 }
  0x5a   : > { %3272 = vmatprep.subr.bf16.mxu0 %v3892_v61  ;;  %3076 = vmatprep.subr.bf16.mxu1 %v3894_v21 }
  0x5c   : > { %3241 = vmatmul.mubr.bf16.vlgmr.msra.gmra.mrb[0].mxu0 %v412_v22  ;;  %3257 = vmatmul.mubr.bf16.vlgmr.msra.gmra.mrb[0].mxu1 %v420_v23 }
  0x5d   : > { %3244 = vmatprep.mubr.bf16.mxu0 %v413_v24  ;;  %3260 = vmatprep.mubr.bf16.mxu1 %v421_v25 }
  0x5e   : > { %3273 = vmatpush3.bf16.msra.mxu0 %v3892_v61  ;;  %3077 = vmatpush3.bf16.msra.mxu1 %v3895_v30 }
  0x5f   : > { %3274 = vmatprep.subr.bf16.mxu0 %v3893_v62  ;;  %3078 = vmatprep.subr.bf16.mxu1 %v3896_v42 }
  0x62   : > { %3275 = vmatpush3.bf16.msra.mxu0 %v3893_v62 }
  0x64   : > { %3245 = vmatmul.mubr.bf16.gmra.mrb[4].mxu0 %v414_v34  ;;  %3261 = vmatmul.mubr.bf16.gmra.mrb[4].mxu1 %v422_v35 }
  0x65   : > { %3248 = vmatprep.mubr.bf16.mxu0 %v415_v36  ;;  %3264 = vmatprep.mubr.bf16.mxu1 %v423_v37 }
  0x6c   : > { %3249 = vmatmul.mubr.bf16.gmra.mrb[8].mxu0 %v416_v46  ;;  %3265 = vmatmul.mubr.bf16.gmra.mrb[8].mxu1 %v424_v47  ;;  %v3897_v47 = vld [vmem:[%s6006_s4 + $0x8] sm:$0xff]  }
  0x6d   : > { %3252 = vmatprep.mubr.bf16.mxu0 %v417_v48  ;;  %3268 = vmatprep.mubr.bf16.mxu1 %v425_v49 }
  0x6e   : > { %3079 = vmatpush3.bf16.msra.mxu1 %v3897_v47  ;;  %v3901_v47 = vld [vmem:[%s6006_s4 + $0x18] sm:$0xff]  }
  0x74   : > { %3253 = vmatmul.mubr.bf16.gmra.mrb[12].mxu0 %v418_v54  ;;  %3269 = vmatmul.mubr.bf16.gmra.mrb[12].mxu1 %v426_v55 }
 0x12f   : > { %v3242_v0 = vpop.f32.mrb[0].mxu0  ;;  %v3258_v2 = vpop.f32.mrb[0].mxu1 }
 0x130   : > { %v661_v3 = vmul.f32 %v3242_v0, %v4300_v63  ;;  %v525_v4 = vpop.f32.mrb[1].mxu0  ;;  %v589_v5 = vpop.f32.mrb[1].mxu1  ;;  %v677_v9 = vmul.f32 %v3258_v2, %v4300_v63 }
 0x131   : > { %v3243_v6 = vpop.f32.mrb[2].mxu0  ;;  %v3259_v7 = vpop.f32.mrb[2].mxu1  ;;  %v659_v13 = vmul.f32 %v4300_v63, %v525_v4  ;;  %v675_v14 = vmul.f32 %v4300_v63, %v589_v5 }
 0x132   : > { %v700_v8 = vadd.f32 %v4305_v1, %v661_v3  ;;  %v662_v10 = vmul.f32 %v3243_v6, %v4300_v63  ;;  %v528_v11 = vpop.f32.mrb[3].mxu0  ;;  %v592_v12 = vpop.f32.mrb[3].mxu1  ;;  %v678_v16 = vmul.f32 %v3259_v7, %v4300_v63  ;;  %v716_v19 = vadd.f32 %v4305_v1, %v677_v9 }
 0x133   : > { %v660_v17 = vmul.f32 %v4300_v63, %v528_v11  ;;  %v698_v22 = vadd.f32 %v4305_v1, %v659_v13  ;;  %v676_v23 = vmul.f32 %v4300_v63, %v592_v12  ;;  %v714_v26 = vadd.f32 %v4305_v1, %v675_v14 }
 0x134   : > { %v701_v15 = vadd.f32 %v4305_v1, %v662_v10  ;;  %v4316_v18 = vmax.f32 %v700_v8, 0.0  ;;  %v717_v31 = vadd.f32 %v4305_v1, %v678_v16  ;;  %v4341_v36 = vmax.f32 %v716_v19, 0.0  ;;  %v3898_v8 = vld [vmem:[%s6006_s4 + $0x50] sm:$0xff]  }
 0x135   : > { %v699_v32 = vadd.f32 %v4305_v1, %v660_v17  ;;  %v4352_v43 = vmax.f32 %v698_v22, 0.0  ;;  %v715_v44 = vadd.f32 %v4305_v1, %v676_v23  ;;  %v4360_v48 = vmax.f32 %v714_v26, 0.0  ;;  %3080 = vmatprep.subr.bf16.mxu1 %v3898_v8 }
 0x136   : > { %v4319_v20 = vmax.f32 %v701_v15, 0.0  ;;  %6073 = vst [vmem:[#allocation10_spill] sm:$0xff] %v4341_v36  ;;  %v895_v49 = vrot.slane %v4316_v18, 1  ;;  %v799_v50 = vrot.slane %v4316_v18, 7  ;;  %v4365_v52 = vmax.f32 %v717_v31, 0.0  ;;  %v3899_v15 = vld [vmem:[%s6006_s4 + $0x10] sm:$0xff]  }
 0x137   : > { %v3246_v24 = vpop.f32.mrb[4].mxu0  ;;  %v4326_v25 = vpop.f32.mrb[4].mxu1  ;;  %6074 = vst [vmem:[#allocation11_spill] sm:$0xff] %v4352_v43  ;;  %6075 = vst [vmem:[#allocation12_spill] sm:$0xff] %v4360_v48  ;;  %v4367_v53 = vmax.f32 %v699_v32, 0.0  ;;  %v4380_v2 = vmax.f32 %v715_v44, 0.0  ;;  %3081 = vmatpush3.bf16.msra.mxu1 %v3899_v15 }
 0x138   : > { %6072 = vst [vmem:[#allocation9_spill] sm:$0xff] %v4319_v20  ;;  %v541_v27 = vpop.f32.mrb[5].mxu0  ;;  %v4329_v28 = vpop.f32.mrb[5].mxu1  ;;  %v3419_v29 = vpack.i.bf16 %v4319_v20, %v4316_v18  ;;  %v665_v37 = vmul.f32 %v3246_v24, %v4300_v63  ;;  %v896_v41 = vrot.slane %v4319_v20, 1  ;;  %v800_v51 = vrot.slane %v4319_v20, 7  ;;  %6076 = vst [vmem:[#allocation13_spill] sm:$0xff] %v4365_v52 }
 0x139   : > { %v663_v33 = vmul.f32 %v4300_v63, %v541_v27  ;;  %v3247_v34 = vpop.f32.mrb[6].mxu0  ;;  %v4339_v35 = vpop.f32.mrb[6].mxu1  ;;  %6077 = vst [vmem:[#allocation14_spill] sm:$0xff] %v4367_v53  ;;  %6078 = vst [vmem:[#allocation15_spill] sm:$0xff] %v4380_v2  ;;  %v4396_v10 = vsel %vm793_vm1, 0.0, %v799_v50  ;;  %v3424_v11 = vpack.i.bf16 %v4365_v52, %v4341_v36  ;;  %v796_v22 = vrot.slane %v4352_v43, 7 }
 0x13a   : > { %v666_v38 = vmul.f32 %v3247_v34, %v4300_v63  ;;  %v4345_v39 = vpop.f32.mrb[7].mxu1  ;;  %3420 = vrot.lane.b32.xlu0 %v3419_v29, %s4047_s21  ;;  %v544_v40 = vpop.f32.mrb[7].mxu0  ;;  %v704_v59 = vadd.f32 %v4305_v1, %v665_v37  ;;  %v4375_v62 = vsel %vm889_vm0, %v895_v49, %v896_v41  ;;  %v4378_v0 = vsel %vm889_vm0, %v896_v41, 0.0  ;;  %6080 = vst [vmem:[#allocation17_spill] sm:$0xff] %v4396_v10 }
 0x13b   : > { %v702_v45 = vadd.f32 %v4305_v1, %v663_v33  ;;  %v664_v46 = vmul.f32 %v4300_v63, %v544_v40  ;;  %v1798_v5 = vpack.c.bf16 %v4378_v0, %v4375_v62  ;;  %v4393_v9 = vsel %vm793_vm1, %v799_v50, %v800_v51 }
 0x13c   : > { %v705_v61 = vadd.f32 %v4305_v1, %v666_v38  ;;  %6079 = vst [vmem:[#allocation16_spill] sm:$0xff] %v4393_v9  ;;  %v3439_v17 = vpack.i.bf16 %v4393_v9, %v4396_v10  ;;  %v4414_v24 = vmax.f32 %v704_v59, 0.0  ;;  %v3429_v38 = vpack.i.bf16 %v4380_v2, %v4360_v48 }
 0x13d   : > { %v4369_v54 = vmax.f32 %v702_v45, 0.0  ;;  %v703_v55 = vadd.f32 %v4305_v1, %v664_v46  ;;  %3276 = vmatprep.mubr.msk.bf16.mxu0 %vm1601_vm2, %v1798_v5  ;;  %v797_v41 = vrot.slane %v4367_v53, 7  ;;  %v892_v45 = vrot.slane %v4352_v43, 1  ;;  %v3900_v46 = vld [vmem:[%s6006_s4 + $0x58] sm:$0xff]  }
 0x13e   : > { %v4416_v26 = vmax.f32 %v705_v61, 0.0  ;;  %3425 = vrot.lane.b32.xlu0 %v3424_v11, %s4047_s21  ;;  %3440 = vrot.lane.b32.xlu1 %v3439_v17, %s4046_s29  ;;  %v4453_v51 = vsel %vm793_vm1, 0.0, %v796_v22  ;;  %v893_v5 = vrot.slane %v4367_v53, 1  ;;  %v3454_v11 = vpack.i.bf16 %v4378_v0, %v4375_v62 }
 0x13f   : > { %v898_v3 = vrot.slane %v4369_v54, 1  ;;  %v4383_v4 = vmax.f32 %v703_v55, 0.0  ;;  %v3250_v6 = vpop.f32.mrb[8].mxu0  ;;  %v4387_v7 = vpop.f32.mrb[8].mxu1  ;;  %6083 = vst [vmem:[#allocation20_spill] sm:$0xff] %v4453_v51  ;;  %v901_v55 = vrot.slane %v4414_v24, 1  ;;  %3082 = vmatprep.subr.bf16.mxu1 %v3900_v46 }
 0x140   : > { %v669_v12 = vmul.f32 %v3250_v6, %v4300_v63  ;;  %v557_v13 = vpop.f32.mrb[9].mxu0  ;;  %v4401_v14 = vpop.f32.mrb[9].mxu1  ;;  %6081 = vst [vmem:[#allocation18_spill] sm:$0xff] %v4416_v26  ;;  %v902_v6 = vrot.slane %v4416_v26, 1  ;;  %v823_v15 = vrot.slane %v4341_v36, 7  ;;  %3083 = vmatpush3.bf16.msra.mxu1 %v3901_v47 }
 0x141   : > { %v899_v16 = vrot.slane %v4383_v4, 1  ;;  %v667_v19 = vmul.f32 %v4300_v63, %v557_v13  ;;  %v3251_v21 = vpop.f32.mrb[10].mxu0  ;;  %v4412_v23 = vpop.f32.mrb[10].mxu1 }
 0x142   : > { %v708_v27 = vadd.f32 %v4305_v1, %v669_v12  ;;  %v670_v29 = vmul.f32 %v3251_v21, %v4300_v63  ;;  %v560_v30 = vpop.f32.mrb[11].mxu0  ;;  %v4421_v31 = vpop.f32.mrb[11].mxu1  ;;  %3430 = vrot.lane.b32.xlu0 %v3429_v38, %s4047_s21  ;;  %3450 = vrot.lane.b32.xlu1 %v3439_v17, %s4047_s21  ;;  %v3434_v12 = vpack.i.bf16 %v4375_v62, %v6014_v56  ;;  %v3903_v21 = vld [vmem:[%s6006_s4 + $0x20] sm:$0xff]  }
 0x143   : > { %v4424_v32 = vsel %vm889_vm0, %v899_v16, 0.0  ;;  %v706_v33 = vadd.f32 %v4305_v1, %v667_v19  ;;  %v668_v34 = vmul.f32 %v4300_v63, %v560_v30  ;;  %v4430_v37 = vsel %vm889_vm0, %v898_v3, %v899_v16  ;;  %v3902_v19 = vld [vmem:[%s6006_s4 + $0x60] sm:$0xff]  }
 0x144   : > { %v1801_v40 = vpack.c.bf16 %v4424_v32, %v4430_v37  ;;  %v4437_v42 = vmax.f32 %v708_v27, 0.0  ;;  %v709_v50 = vadd.f32 %v4305_v1, %v670_v29  ;;  %v4460_v3 = vsel %vm793_vm1, %v796_v22, %v797_v41  ;;  %3084 = vmatprep.subr.bf16.mxu1 %v3902_v19 }
 0x145   : > { %v707_v44 = vadd.f32 %v4305_v1, %v668_v34  ;;  %v4447_v49 = vmax.f32 %v706_v33, 0.0  ;;  %6084 = vst [vmem:[#allocation21_spill] sm:$0xff] %v4460_v3  ;;  %v824_v16 = vrot.slane %v4365_v52, 7  ;;  %v3444_v62 = vpack.i.bf16 %v4352_v43, %v4378_v0  ;;  %3085 = vmatpush3.bf16.msra.mxu1 %v3903_v21 }
 0x146   : > { %6082 = vst [vmem:[#allocation19_spill] sm:$0xff] %v4437_v42  ;;  %3277 = vmatmul.mubr.msk.bf16.vlgmr.msra.gmra.mrb[16].mxu0 %vm1601_vm2, %v1801_v40  ;;  %v4484_v29 = vsel %vm889_vm0, %v901_v55, %v902_v6  ;;  %v4487_v30 = vsel %vm889_vm0, %v902_v6, 0.0  ;;  %v4491_v34 = vmax.f32 %v709_v50, 0.0  ;;  %3435 = vrot.lane.b32.xlu0 %v3434_v12, %s4048_s30  ;;  %v3474_v40 = vpack.i.bf16 %v4460_v3, %v4453_v51 }
 0x147   : > { %v4457_v59 = vmax.f32 %v707_v44, 0.0  ;;  %v3254_v61 = vpop.f32.mrb[12].mxu0  ;;  %v4464_v8 = vpop.f32.mrb[12].mxu1  ;;  %v1804_v0 = vpack.c.bf16 %v4487_v30, %v4484_v29  ;;  %3455 = vrot.lane.b32.xlu1 %v3454_v11, %s4046_s29  ;;  %v894_v50 = vsel %vm889_vm0, %v892_v45, %v893_v5  ;;  %v904_v55 = vrot.slane %v4447_v49, 1  ;;  %v3905_v45 = vld [vmem:[%s6006_s4 + $0x28] sm:$0xff]  }
 0x148   : > { %v573_v13 = vpop.f32.mrb[13].mxu0  ;;  %v4472_v17 = vpop.f32.mrb[13].mxu1  ;;  %6085 = vst [vmem:[#allocation22_spill] sm:$0xff] %v4491_v34  ;;  %v673_v38 = vmul.f32 %v3254_v61, %v4300_v63  ;;  %v3904_v61 = vld [vmem:[%s6006_s4 + $0x68] sm:$0xff]   ;;  %v954_v12 = vsel %vm889_vm0, %v893_v5, 0.0  ;;  %v4513_v11 = vsel %vm793_vm1, %v823_v15, %v824_v16  ;;  %v820_v5 = vrot.slane %v4360_v48, 7 }
 0x149   : > { %v671_v22 = vmul.f32 %v4300_v63, %v573_v13  ;;  %v3255_v27 = vpop.f32.mrb[14].mxu0  ;;  %v4489_v33 = vpop.f32.mrb[14].mxu1  ;;  %3280 = vmatprep.mubr.msk.bf16.mxu0 %vm1601_vm2, %v1804_v0  ;;  %6086 = vst [vmem:[#allocation23_spill] sm:$0xff] %v4513_v11  ;;  %v905_v13 = vrot.slane %v4457_v59, 1  ;;  %3086 = vmatprep.subr.bf16.mxu1 %v3904_v61  ;;  %v6016_v0 = vrot.slane %v4365_v52, 1  ;;  %v3479_v61 = vpack.i.bf16 %v954_v12, %v894_v50 }
 0x14a   : > { %v576_v41 = vpop.f32.mrb[15].mxu0  ;;  %v4499_v44 = vpop.f32.mrb[15].mxu1  ;;  %v674_v6 = vmul.f32 %v3255_v27, %v4300_v63  ;;  %v4523_v27 = vsel %vm793_vm1, 0.0, %v823_v15  ;;  %3445 = vrot.lane.b32.xlu0 %v3444_v62, %s4048_s30  ;;  %v712_v15 = vadd.f32 %v4305_v1, %v673_v38  ;;  %v907_v56 = vrot.slane %v4437_v42, 1  ;;  %3087 = vmatpush3.bf16.msra.mxu1 %v3905_v45  ;;  %v3907_v38 = vld [vmem:[%s6006_s4 + $0x30] sm:$0xff]  }
 0x14b   : > { %v710_v46 = vadd.f32 %v4305_v1, %v671_v22  ;;  %v672_v47 = vmul.f32 %v4300_v63, %v576_v41  ;;  %6088 = vst [vmem:[#allocation25_spill] sm:$0xff] %v4523_v27  ;;  %v4528_v16 = vsel %vm889_vm0, %v904_v55, %v905_v13  ;;  %v4531_v21 = vsel %vm889_vm0, %v905_v13, 0.0  ;;  %3475 = vrot.lane.b32.xlu1 %v3474_v40, %s4047_s21 }
 0x14c   : > { %v821_v41 = vrot.slane %v4380_v2, 7  ;;  %v1807_v62 = vpack.c.bf16 %v4531_v21, %v4528_v16  ;;  %v679_v55 = vmul.f32 %v4300_v63, %v4329_v28  ;;  %v4547_v13 = vpack.i.bf16 %v4513_v11, %v4523_v27 }
 0x14d   : > { %v4519_v19 = vmax.f32 %v710_v46, 0.0  ;;  %v711_v22 = vadd.f32 %v4305_v1, %v672_v47  ;;  %v681_v46 = vmul.f32 %v4326_v25, %v4300_v63  ;;  %v3906_v25 = vld [vmem:[%s6006_s4 + $0x70] sm:$0xff]   ;;  %v713_v40 = vadd.f32 %v4305_v1, %v674_v6 }
 0x14e   : > { %3281 = vmatmul.mubr.msk.bf16.gmra.mrb[20].mxu0 %vm1601_vm2, %v1807_v62  ;;  %v4561_v28 = vsel %vm889_vm0, %v6016_v0, 0.0  ;;  %v908_v50 = vrot.slane %v4491_v34, 1  ;;  %v682_v45 = vmul.f32 %v4339_v35, %v4300_v63  ;;  %3460 = vrot.lane.b32.xlu0 %v4547_v13, %s4046_s29  ;;  %v4573_v6 = vsel %vm793_vm1, 0.0, %v820_v5 }
 0x14f   : > { %6087 = vst [vmem:[#allocation24_spill] sm:$0xff] %v4519_v19  ;;  %v4539_v47 = vmax.f32 %v711_v22, 0.0  ;;  %v910_v12 = vrot.slane %v4519_v19, 1  ;;  %v4570_v22 = vsel %vm793_vm1, %v820_v5, %v821_v41  ;;  %6091 = vst [vmem:[#allocation28_spill] sm:$0xff] %v4573_v6  ;;  %3088 = vmatprep.subr.bf16.mxu1 %v3906_v25  ;;  %v680_v0 = vmul.f32 %v4300_v63, %v4345_v39 }
 0x150   : > { %6090 = vst [vmem:[#allocation27_spill] sm:$0xff] %v4570_v22  ;;  %v4581_v35 = vmax.f32 %v712_v15, 0.0  ;;  %3480 = vrot.lane.b32.xlu1 %v3479_v61, %s4046_s29  ;;  %v4585_v41 = vsel %vm889_vm0, %v907_v56, %v908_v50  ;;  %v4588_v5 = vsel %vm889_vm0, %v908_v50, 0.0  ;;  %v3464_v25 = vpack.i.bf16 %v4360_v48, %v4561_v28  ;;  %3089 = vmatpush3.bf16.msra.mxu1 %v3907_v38  ;;  %v3909_v56 = vld [vmem:[%s6006_s4 + $0x38] sm:$0xff]  }
 0x151   : > { %6089 = vst [vmem:[#allocation26_spill] sm:$0xff] %v4539_v47  ;;  %v911_v62 = vrot.slane %v4539_v47, 1  ;;  %v1810_v27 = vpack.c.bf16 %v4588_v5, %v4585_v41  ;;  %v4603_v15 = vmax.f32 %v713_v40, 0.0  ;;  %v3489_v50 = vpack.i.bf16 %v4570_v22, %v4573_v6  ;;  %3090 = vmatprep.subr.bf16.mxu1 %v3908_v60 }
 0x152   : > { %3465 = vrot.lane.b32.xlu0 %v3464_v25, %s4048_s30  ;;  %v806_v38 = vrot.slane %v4416_v26, 7  ;;  %v720_v40 = vadd.f32 %v4305_v1, %v681_v46  ;;  %v718_v10 = vadd.f32 %v4305_v1, %v679_v55  ;;  %v721_v22 = vadd.f32 %v4305_v1, %v682_v45 }
 0x153   : > { %v4595_v11 = vsel %vm889_vm0, %v910_v12, %v911_v62  ;;  %v4598_v39 = vsel %vm889_vm0, %v911_v62, 0.0  ;;  %6092 = vst [vmem:[#allocation29_spill] sm:$0xff] %v4603_v15  ;;  %3284 = vmatprep.mubr.msk.bf16.mxu0 %vm1601_vm2, %v1810_v27  ;;  %v805_v12 = vrot.slane %v4414_v24, 7  ;;  %v913_v62 = vrot.slane %v4581_v35, 1 }
 0x154   : > { %v1813_v9 = vpack.c.bf16 %v4598_v39, %v4595_v11  ;;  %3490 = vrot.lane.b32.xlu1 %v3489_v50, %s4047_s21  ;;  %v914_v60 = vrot.slane %v4603_v15, 1  ;;  %v719_v25 = vadd.f32 %v4305_v1, %v680_v0  ;;  %v3504_v27 = vpack.i.bf16 %v4484_v29, %v4319_v20  ;;  %3091 = vmatpush3.bf16.msra.mxu1 %v3909_v56 }
 0x155   : > { %v916_v6 = vrot.slane %v4360_v48, 1  ;;  %v917_v45 = vrot.slane %v4380_v2, 1  ;;  %v919_v51 = vrot.slane %v4341_v36, 1  ;;  %v4634_v0 = vsel %vm793_vm1, %v805_v12, %v806_v38 }
 0x156   : > { %3285 = vmatmul.mubr.msk.bf16.gmra.mrb[24].mxu0 %vm1601_vm2, %v1813_v9  ;;  %v4625_v46 = vsel %vm889_vm0, %v913_v62, %v914_v60  ;;  %v4628_v55 = vsel %vm889_vm0, %v914_v60, 0.0  ;;  %3470 = vrot.lane.b32.xlu0 %v3479_v61, %s4048_s30  ;;  %6093 = vst [vmem:[#allocation30_spill] sm:$0xff] %v4634_v0  ;;  %v4637_v48 = vsel %vm793_vm1, 0.0, %v805_v12  ;;  %v4641_v56 = vmax.f32 %v718_v10, 0.0 }
 0x157   : > { %6094 = vst [vmem:[#allocation31_spill] sm:$0xff] %v4637_v48  ;;  %v1816_v9 = vpack.c.bf16 %v4628_v55, %v4625_v46  ;;  %v4644_v62 = vmax.f32 %v719_v25, 0.0  ;;  %v4648_v60 = vsel %vm889_vm0, %v916_v6, %v917_v45  ;;  %v4651_v61 = vsel %vm889_vm0, %v917_v45, 0.0 }
 0x158   : > { %6095 = vst [vmem:[#allocation32_spill] sm:$0xff] %v4641_v56  ;;  %3505 = vrot.lane.b32.xlu1 %v3504_v27, %s4048_s30  ;;  %v4653_v38 = vmax.f32 %v720_v40, 0.0  ;;  %v4655_v12 = vmax.f32 %v721_v22, 0.0  ;;  %v3519_v10 = vpack.i.bf16 %v4634_v0, %v4637_v48  ;;  %v6099_v20 = vrot.slane %v4365_v52, 1 }
 0x159   : > { %6096 = vst [vmem:[#allocation33_spill] sm:$0xff] %v4644_v62  ;;  %3288 = vmatprep.mubr.msk.bf16.mxu0 %vm1601_vm2, %v1816_v9  ;;  %v1819_v6 = vpack.c.bf16 %v4651_v61, %v4648_v60  ;;  %v3494_v40 = vpack.i.bf16 %v4416_v26, %v4414_v24  ;;  %v922_v27 = vrot.slane %v4641_v56, 1  ;;  %v923_v45 = vrot.slane %v4644_v62, 1 }
 0x15a   : > { %6097 = vst [vmem:[#allocation34_spill] sm:$0xff] %v4653_v38  ;;  %6098 = vst [vmem:[#allocation35_spill] sm:$0xff] %v4655_v12  ;;  %v4662_v25 = vsel %vm889_vm0, %v919_v51, %v6099_v20  ;;  %3485 = vrot.lane.b32.xlu0 %v3489_v50, %s4046_s29  ;;  %v3524_v20 = vpack.i.bf16 %v4487_v30, %v4484_v29  ;;  %v925_v51 = vrot.slane %v4653_v38, 1  ;;  %v926_v50 = vrot.slane %v4655_v12, 1 }
 0x15b   : > { %v1822_v22 = vpack.c.bf16 %v4561_v28, %v4662_v25  ;;  %v802_v9 = vrot.slane %v4369_v54, 7  ;;  %v803_v0 = vrot.slane %v4383_v4, 7  ;;  %v3499_v48 = vpack.i.bf16 %v4383_v4, %v4369_v54 }
 0x15c   : > { %3520 = vrot.lane.b32.xlu1 %v3519_v10, %s4047_s21  ;;  %v4687_v29 = vsel %vm889_vm0, %v922_v27, %v923_v45  ;;  %v4697_v3 = vsel %vm889_vm0, %v925_v51, %v926_v50  ;;  %v683_v43 = vmul.f32 %v4300_v63, %v4401_v14  ;;  %v684_v51 = vmul.f32 %v4300_v63, %v4421_v31 }
 0x15d   : > { %v4706_v27 = vsel %vm793_vm1, %v802_v9, %v803_v0  ;;  %v686_v31 = vmul.f32 %v4412_v23, %v4300_v63 }
 0x15e   : > { %3289 = vmatmul.mubr.msk.bf16.gmra.mrb[28].mxu0 %vm1601_vm2, %v1819_v6  ;;  %3495 = vrot.lane.b32.xlu0 %v3494_v40, %s4047_s21  ;;  %v4690_v6 = vsel %vm889_vm0, %v923_v45, 0.0  ;;  %v3529_v40 = vpack.i.bf16 %v4430_v37, %v4367_v53  ;;  %v4709_v45 = vsel %vm793_vm1, 0.0, %v802_v9  ;;  %v722_v9 = vadd.f32 %v4305_v1, %v683_v43 }
 0x15f   : > { %3292 = vmatprep.mubr.msk.bf16.mxu0 %vm1601_vm2, %v1822_v22  ;;  %v1825_v22 = vpack.c.bf16 %v4690_v6, %v4687_v29  ;;  %v3544_v14 = vpack.i.bf16 %v4706_v27, %v4709_v45  ;;  %v3549_v43 = vpack.i.bf16 %v4424_v32, %v4430_v37  ;;  %v690_v37 = vmul.f32 %v4489_v33, %v4300_v63 }
 0x160   : > { %3525 = vrot.lane.b32.xlu1 %v3524_v20, %s4046_s29  ;;  %v4700_v20 = vsel %vm889_vm0, %v926_v50, 0.0  ;;  %v4739_v23 = vmax.f32 %v722_v9, 0.0  ;;  %v811_v9 = vrot.slane %v4437_v42, 7 }
 0x161   : > { %v1828_v53 = vpack.c.bf16 %v4700_v20, %v4697_v3 }
 0x162   : > { %3500 = vrot.lane.b32.xlu0 %v3499_v48, %s4047_s21  ;;  %v685_v48 = vmul.f32 %v4387_v7, %v4300_v63  ;;  %v3514_v7 = vpack.i.bf16 %v4369_v54, %v4487_v30  ;;  %6100 = vst [vmem:[#allocation36_spill] sm:$0xff] %v4739_v23 }
 0x164   : > { %3530 = vrot.lane.b32.xlu1 %v3529_v40, %s4048_s30  ;;  %v723_v40 = vadd.f32 %v4305_v1, %v684_v51  ;;  %v724_v0 = vadd.f32 %v4305_v1, %v685_v48  ;;  %v687_v51 = vmul.f32 %v4300_v63, %v4472_v17  ;;  %v688_v48 = vmul.f32 %v4300_v63, %v4499_v44 }
 0x165   : > { %v928_v44 = vrot.slane %v4739_v23, 1 }
 0x166   : > { %3293 = vmatmul.mubr.msk.bf16.gmra.mrb[32].mxu0 %vm1601_vm2, %v1825_v22  ;;  %3510 = vrot.lane.b32.xlu0 %v3519_v10, %s4046_s29  ;;  %v689_v22 = vmul.f32 %v4464_v8, %v4300_v63  ;;  %v725_v10 = vadd.f32 %v4305_v1, %v686_v31  ;;  %v4746_v30 = vmax.f32 %v723_v40, 0.0  ;;  %v3554_v8 = vpack.i.bf16 %v4687_v29, %v4380_v2 }
 0x167   : > { %3296 = vmatprep.mubr.msk.bf16.mxu0 %vm1601_vm2, %v1828_v53  ;;  %v726_v31 = vadd.f32 %v4305_v1, %v687_v51  ;;  %v812_v40 = vrot.slane %v4491_v34, 7  ;;  %v4764_v33 = vmax.f32 %v724_v0, 0.0  ;;  %v3539_v51 = vpack.i.bf16 %v4316_v18, %v4424_v32 }
 0x168   : > { %3545 = vrot.lane.b32.xlu1 %v3544_v14, %s4047_s21  ;;  %v728_v53 = vadd.f32 %v4305_v1, %v689_v22  ;;  %6101 = vst [vmem:[#allocation37_spill] sm:$0xff] %v4746_v30  ;;  %v727_v22 = vadd.f32 %v4305_v1, %v688_v48  ;;  %v4767_v63 = vmax.f32 %v725_v10, 0.0  ;;  %v4780_v0 = vsel %vm793_vm1, 0.0, %v811_v9 }
 0x169   : > { %v4777_v48 = vsel %vm793_vm1, %v811_v9, %v812_v40  ;;  %6104 = vst [vmem:[#allocation40_spill] sm:$0xff] %v4780_v0  ;;  %v931_v32 = vrot.slane %v4764_v33, 1 }
 0x16a   : > { %3515 = vrot.lane.b32.xlu0 %v3514_v7, %s4048_s30  ;;  %v729_v7 = vadd.f32 %v4305_v1, %v690_v37  ;;  %6102 = vst [vmem:[#allocation38_spill] sm:$0xff] %v4767_v63  ;;  %v929_v37 = vrot.slane %v4746_v30, 1  ;;  %v3569_v1 = vpack.i.bf16 %v4585_v41, %v4416_v26  ;;  %6103 = vst [vmem:[#allocation39_spill] sm:$0xff] %v4777_v48  ;;  %v932_v40 = vrot.slane %v4767_v63, 1 }
 0x16b   : > { %v3584_v9 = vpack.i.bf16 %v4777_v48, %v4780_v0  ;;  %v4804_v17 = vmax.f32 %v727_v22, 0.0  ;;  %v3564_v22 = vpack.i.bf16 %v4457_v59, %v4447_v49  ;;  %v3594_v26 = vpack.i.bf16 %v4528_v16, %v4383_v4 }
 0x16c   : > { %3550 = vrot.lane.b32.xlu1 %v3549_v43, %s4046_s29  ;;  %v4787_v10 = vsel %vm889_vm0, %v929_v37, 0.0  ;;  %v4802_v43 = vmax.f32 %v726_v31, 0.0  ;;  %v4811_v50 = vsel %vm889_vm0, %v932_v40, 0.0  ;;  %v4814_v48 = vmax.f32 %v729_v7, 0.0 }
 0x16d   : > { %v3589_v7 = vpack.i.bf16 %v4588_v5, %v4585_v41  ;;  %v808_v31 = vrot.slane %v4447_v49, 7 }
 0x16e   : > { %3535 = vrot.lane.b32.xlu0 %v3544_v14, %s4046_s29  ;;  %v4784_v14 = vsel %vm889_vm0, %v928_v44, %v929_v37  ;;  %v4798_v44 = vmax.f32 %v728_v53, 0.0  ;;  %v809_v37 = vrot.slane %v4457_v59, 7  ;;  %v977_v0 = vrot.slane %v4814_v48, 1 }
 0x170   : > { %3555 = vrot.lane.b32.xlu1 %v3554_v8, %s4048_s30  ;;  %v1831_v8 = vpack.c.bf16 %v4787_v10, %v4784_v14 }
 0x172   : > { %3540 = vrot.lane.b32.xlu0 %v3539_v51, %s4048_s30  ;;  %v3559_v51 = vpack.i.bf16 %v4491_v34, %v4437_v42  ;;  %3297 = vmatmul.mubr.msk.bf16.gmra.mrb[36].mxu0 %vm1601_vm2, %v1831_v8 }
 0x174   : > { %3570 = vrot.lane.b32.xlu1 %v3569_v1, %s4048_s30  ;;  %v4808_v1 = vsel %vm889_vm0, %v931_v32, %v932_v40  ;;  %v976_v32 = vrot.slane %v4798_v44, 1  ;;  %v934_v40 = vrot.slane %v4802_v43, 1 }
 0x175   : > { %v1834_v53 = vpack.c.bf16 %v4811_v50, %v4808_v1 }
 0x176   : > { %3560 = vrot.lane.b32.xlu0 %v3559_v51, %s4047_s21  ;;  %v935_v51 = vrot.slane %v4804_v17, 1  ;;  %v4845_v2 = vsel %vm889_vm0, %v976_v32, %v977_v0  ;;  %v3579_v32 = vpack.i.bf16 %v4447_v49, %v4588_v5  ;;  %v3604_v5 = vpack.i.bf16 %v4414_v24, %v4531_v21 }
 0x177   : > { %3300 = vmatprep.mubr.msk.bf16.mxu0 %vm1601_vm2, %v1834_v53 }
 0x178   : > { %3585 = vrot.lane.b32.xlu1 %v3584_v9, %s4047_s21  ;;  %v4837_v53 = vsel %vm889_vm0, %v934_v40, %v935_v51  ;;  %v4840_v8 = vsel %vm889_vm0, %v935_v51, 0.0  ;;  %v4856_v40 = vsel %vm793_vm1, %v808_v31, %v809_v37  ;;  %v4859_v51 = vsel %vm793_vm1, 0.0, %v808_v31 }
 0x179   : > { %v1837_v41 = vpack.c.bf16 %v4840_v8, %v4837_v53  ;;  %6105 = vst [vmem:[#allocation41_spill] sm:$0xff] %v4856_v40  ;;  %6106 = vst [vmem:[#allocation42_spill] sm:$0xff] %v4859_v51  ;;  %v3609_v37 = vpack.i.bf16 %v4856_v40, %v4859_v51  ;;  %v3614_v31 = vpack.i.bf16 %v4531_v21, %v4528_v16 }
 0x17a   : > { %3565 = vrot.lane.b32.xlu0 %v3564_v22, %s4047_s21  ;;  %v4848_v22 = vsel %vm889_vm0, %v977_v0, 0.0  ;;  %v3619_v16 = vpack.i.bf16 %v4581_v35, %v4651_v61  ;;  %v3624_v21 = vpack.i.bf16 %v4603_v15, %v4581_v35 }
 0x17b   : > { %3301 = vmatmul.mubr.msk.bf16.gmra.mrb[40].mxu0 %vm1601_vm2, %v1837_v41  ;;  %v3629_v41 = vpack.i.bf16 %v4662_v25, %v4603_v15 }
 0x17c   : > { %3590 = vrot.lane.b32.xlu1 %v3589_v7, %s4046_s29  ;;  %v1840_v7 = vpack.c.bf16 %v4848_v22, %v4845_v2 }
 0x17e   : > { %3575 = vrot.lane.b32.xlu0 %v3584_v9, %s4046_s29  ;;  %3304 = vmatprep.mubr.msk.bf16.mxu0 %vm1601_vm2, %v1840_v7  ;;  %v818_v7 = vrot.slane %v4603_v15, 7 }
 0x180   : > { %3595 = vrot.lane.b32.xlu1 %v3594_v26, %s4048_s30  ;;  %v6107_v26 = vpack.c.bf16 %v4284_v58, %v4280_v57  ;;  %v3639_v57 = vpack.i.bf16 %v4648_v60, %v4539_v47  ;;  %v817_v58 = vrot.slane %v4581_v35, 7 }
 0x182   : > { %3580 = vrot.lane.b32.xlu0 %v3579_v32, %s4048_s30  ;;  %v3644_v32 = vpack.i.bf16 %v4625_v46, %v4491_v34 }
 0x183   : > { %3305 = vmatmul.mubr.msk.bf16.gmra.mrb[44].mxu0 %vm1601_vm2, %v6107_v26  ;;  %v3634_v26 = vpack.i.bf16 %v4539_v47, %v4519_v19 }
 0x184   : > { %3610 = vrot.lane.b32.xlu1 %v3609_v37, %s4047_s21 }
 0x186   : > { %3600 = vrot.lane.b32.xlu0 %v3609_v37, %s4046_s29  ;;  %v4902_v37 = vsel %vm793_vm1, %v817_v58, %v818_v7  ;;  %v3654_v7 = vpack.i.bf16 %v4519_v19, %v4628_v55 }
 0x187   : > { %6108 = vst [vmem:[#allocation43_spill] sm:$0xff] %v4902_v37 }
 0x188   : > { %3615 = vrot.lane.b32.xlu1 %v3614_v31, %s4046_s29  ;;  %v4905_v31 = vsel %vm793_vm1, 0.0, %v817_v58  ;;  %v3669_v58 = vpack.i.bf16 %v4595_v11, %v4457_v59 }
 0x189   : > { %6109 = vst [vmem:[#allocation44_spill] sm:$0xff] %v4905_v31 }
 0x18a   : > { %3605 = vrot.lane.b32.xlu0 %v3604_v5, %s4048_s30  ;;  %v3659_v5 = vpack.i.bf16 %v4902_v37, %v4905_v31 }
 0x18c   : > { %3630 = vrot.lane.b32.xlu1 %v3629_v41, %s4048_s30  ;;  %v814_v41 = vrot.slane %v4519_v19, 7 }
 0x18e   : > { %3620 = vrot.lane.b32.xlu0 %v3619_v16, %s4048_s30  ;;  %v815_v16 = vrot.slane %v4539_v47, 7 }
 0x190   : > { %3640 = vrot.lane.b32.xlu1 %v3639_v57, %s4048_s30  ;;  %v6110_v57 = vpack.i.bf16 %v4628_v55, %v4625_v46 }
 0x192   : > { %3625 = vrot.lane.b32.xlu0 %v3624_v21, %s4047_s21  ;;  %v4926_v21 = vsel %vm793_vm1, %v814_v41, %v815_v16 }
 0x193   : > { %6111 = vst [vmem:[#allocation45_spill] sm:$0xff] %v4926_v21 }
 0x194   : > { %3645 = vrot.lane.b32.xlu1 %v3644_v32, %s4048_s30  ;;  %v4929_v32 = vsel %vm793_vm1, 0.0, %v814_v41  ;;  %v6115_v41 = vpack.i.bf16 %v4651_v61, %v4648_v60  ;;  %v4961_v60 = vpop.permute.xlu1 %3415  ;;  %v3694_v61 = vpack.i.bf16 %v4644_v62, %v4641_v56 }
 0x195   : > { %6112 = vst [vmem:[#allocation46_spill] sm:$0xff] %v4929_v32  ;;  %v3674_v46 = vpack.i.bf16 %v4926_v21, %v4929_v32  ;;  %v3418_v32 = vunpack.i.h.bf16 %v4961_v60 }
 0x196   : > { %3635 = vrot.lane.b32.xlu0 %v3634_v26, %s4047_s21  ;;  %v826_v26 = vrot.slane %v4641_v56, 7 }
 0x198   : > { %3660 = vrot.lane.b32.xlu1 %v3659_v5, %s4047_s21  ;;  %v4941_v55 = vsel %vm793_vm1, 0.0, %v826_v26 }
 0x199   : > { %6114 = vst [vmem:[#allocation48_spill] sm:$0xff] %v4941_v55 }
 0x19a   : > { %3650 = vrot.lane.b32.xlu0 %v3659_v5, %s4046_s29  ;;  %v827_v5 = vrot.slane %v4644_v62, 7 }
 0x19c   : > { %3665 = vrot.lane.b32.xlu1 %v6110_v57, %s4046_s29  ;;  %v4938_v57 = vsel %vm793_vm1, %v826_v26, %v827_v5  ;;  %v829_v5 = vrot.slane %v4653_v38, 7 }
 0x19d   : > { %6113 = vst [vmem:[#allocation47_spill] sm:$0xff] %v4938_v57  ;;  %v3679_v16 = vpack.i.bf16 %v4938_v57, %v4941_v55 }
 0x19e   : > { %3655 = vrot.lane.b32.xlu0 %v3654_v7, %s4048_s30  ;;  %v3709_v7 = vpack.i.bf16 %v4697_v3, %v4365_v52  ;;  %v4979_v0 = vsel %vm793_vm1, 0.0, %v829_v5 }
 0x19f   : > { %6117 = vst [vmem:[#allocation50_spill] sm:$0xff] %v4979_v0 }
 0x1a0   : > { %3670 = vrot.lane.b32.xlu1 %v3669_v58, %s4048_s30  ;;  %v3689_v58 = vpack.i.bf16 %v4437_v42, %v4598_v39 }
 0x1a2   : > { %3675 = vrot.lane.b32.xlu0 %v3674_v46, %s4046_s29 }
 0x1a4   : > { %3685 = vrot.lane.b32.xlu1 %v6115_v41, %s4046_s29 }
 0x1a6   : > { %3680 = vrot.lane.b32.xlu0 %v3679_v16, %s4046_s29 }
 0x1a8   : > { %3700 = vrot.lane.b32.xlu1 %v4547_v13, %s4047_s21  ;;  %v830_v13 = vrot.slane %v4655_v12, 7 }
 0x1aa   : > { %3690 = vrot.lane.b32.xlu0 %v3689_v58, %s4048_s30  ;;  %v3704_v58 = vpack.i.bf16 %v4341_v36, %v4690_v6 }
 0x1ac   : > { %v4958_v26 = vpop.permute.xlu0 %3420  ;;  %3710 = vrot.lane.b32.xlu1 %v3709_v7, %s4048_s30  ;;  %v4976_v7 = vsel %vm793_vm1, %v829_v5, %v830_v13  ;;  %v6119_v5 = vpack.i.bf16 %v4561_v28, %v4662_v25  ;;  %v3744_v28 = vpack.i.bf16 %v4641_v56, %v4700_v20 }
 0x1ad   : > { %6116 = vst [vmem:[#allocation49_spill] sm:$0xff] %v4976_v7  ;;  %v3714_v55 = vpack.i.bf16 %v4976_v7, %v4979_v0 }
 0x1ae   : > { %3695 = vrot.lane.b32.xlu0 %v3694_v61, %s4047_s21  ;;  %v6118_v61 = vpack.i.bf16 %v4598_v39, %v4595_v11  ;;  %v3734_v11 = vpack.i.bf16 %v4655_v12, %v4653_v38 }
 0x1b0   : > { %3720 = vrot.lane.b32.xlu1 %v3674_v46, %s4047_s21  ;;  %v4969_v41 = vpop.permute.xlu0 %3425  ;;  %v4973_v9 = vpop.permute.xlu1 %3440 }
 0x1b1   : > { %v3442_v51 = vunpack.i.l.bf16 %v4973_v9 }
 0x1b2   : > { %3705 = vrot.lane.b32.xlu0 %v3704_v58, %s4048_s30  ;;  %v832_v58 = vrot.slane %v4739_v23, 7 }
 0x1b4   : > { %3725 = vrot.lane.b32.xlu1 %v6118_v61, %s4046_s29  ;;  %v4986_v46 = vpop.permute.xlu0 %3430  ;;  %v4990_v57 = vpop.permute.xlu1 %3450  ;;  %v833_v61 = vrot.slane %v4746_v30, 7  ;;  %v5017_v36 = vsel %vm793_vm1, 0.0, %v832_v58 }
 0x1b5   : > { %6121 = vst [vmem:[#allocation52_spill] sm:$0xff] %v5017_v36 }
 0x1b6   : > { %3715 = vrot.lane.b32.xlu0 %v3714_v55, %s4046_s29  ;;  %v5014_v7 = vsel %vm793_vm1, %v832_v58, %v833_v61 }
 0x1b7   : > { %6120 = vst [vmem:[#allocation51_spill] sm:$0xff] %v5014_v7  ;;  %v3754_v56 = vpack.i.bf16 %v5014_v7, %v5017_v36  ;;  %v3764_v36 = vpack.i.bf16 %v4746_v30, %v4739_v23 }
 0x1b8   : > { %3730 = vrot.lane.b32.xlu1 %v6119_v5, %s4046_s29  ;;  %v4997_v13 = vpop.permute.xlu0 %3435  ;;  %v3749_v5 = vpack.i.bf16 %v4784_v14, %v4644_v62  ;;  %v836_v62 = vrot.slane %v4767_v63, 7 }
 0x1b9   : > { %v5001_v39 = vpop.permute.xlu1 %3455  ;;  %v3437_v61 = vunpack.i.l.bf16 %v4997_v13 }
 0x1ba   : > { %3735 = vrot.lane.b32.xlu0 %v3734_v11, %s4047_s21  ;;  %v6122_v11 = vmov 0.0  }
 0x1bb   : > { %v5021_v52 = vrot.slane %v6122_v11, 7 }
 0x1bc   : > { %3740 = vrot.lane.b32.xlu1 %v3679_v16, %s4047_s21  ;;  %v5007_v0 = vpop.permute.xlu0 %3445 }
 0x1bd   : > { %v3476_v25 = vpop.permute.xlu1 %3475  ;;  %v5034_v58 = vsel %vm793_vm1, 0.0, %v5021_v52 }
 0x1be   : > { %3745 = vrot.lane.b32.xlu0 %v3744_v28, %s4048_s30  ;;  %v6123_v28 = vpack.i.bf16 %v4690_v6, %v4687_v29  ;;  %v1602_v21 = vsel %vm1601_vm2, %v5034_v58, %v3437_v61  ;;  %v1603_v29 = vsel %vm1601_vm2, %v5021_v52, %v3437_v61  ;;  %v3417_v6 = vunpack.i.l.bf16 %v4961_v60 }
 0x1bf   : > { %v3478_v47 = vunpack.i.h.bf16 %v3476_v25  ;;  %v3477_v19 = vunpack.i.l.bf16 %v3476_v25  ;;  %v3779_v61 = vpack.i.bf16 %v4808_v1, %v4655_v12  ;;  %v1636_v34 = vsel %vm1634_vm3, %v1603_v29, %v3418_v32  ;;  %v6128_v29 = vld [vmem:[#allocation11_spill] sm:$0xff] }
 0x1c0   : > { %3750 = vrot.lane.b32.xlu1 %v3749_v5, %s4048_s30  ;;  %v5024_v16 = vpop.permute.xlu0 %3460  ;;  %v835_v5 = vrot.slane %v4764_v33, 7  ;;  %v1635_v60 = vsel %vm1634_vm3, %v1602_v21, %v3417_v6  ;;  %v3423_v12 = vunpack.i.h.bf16 %v4958_v26  ;;  %v6127_v21 = vld [vmem:[#allocation14_spill] sm:$0xff] }
 0x1c2   : > { %v5028_v31 = vpop.permute.xlu1 %3480  ;;  %3755 = vrot.lane.b32.xlu0 %v3754_v56, %s4046_s29 }
 0x1c4   : > { %3760 = vrot.lane.b32.xlu1 %v6123_v28, %s4046_s29  ;;  %v5042_v7 = vpop.permute.xlu0 %3465  ;;  %v5057_v28 = vsel %vm793_vm1, %v835_v5, %v836_v62 }
 0x1c5   : > { %6125 = vst [vmem:[#allocation54_spill] sm:$0xff] %v5057_v28 }
 0x1c6   : > { %v5046_v37 = vpop.permute.xlu1 %3490  ;;  %3765 = vrot.lane.b32.xlu0 %v3764_v36, %s4047_s21  ;;  %v3774_v36 = vpack.i.bf16 %v4653_v38, %v4787_v10  ;;  %v3422_v38 = vunpack.i.l.bf16 %v4958_v26 }
 0x1c7   : > { %6124 = vst [vmem:[#allocation53_spill] sm:$0xff] %v5046_v37  ;;  %v5060_v37 = vsel %vm793_vm1, 0.0, %v835_v5  ;;  %v3443_v5 = vunpack.i.h.bf16 %v4973_v9  ;;  %v1668_v9 = vsel %vm1667_vm4, %v1635_v60, %v3477_v19  ;;  %v3814_v60 = vpack.i.bf16 %v4804_v17, %v4802_v43 }
 0x1c8   : > { %3770 = vrot.lane.b32.xlu1 %v3714_v55, %s4047_s21  ;;  %6126 = vst [vmem:[#allocation55_spill] sm:$0xff] %v5060_v37  ;;  %v3471_v40 = vpop.permute.xlu0 %3470  ;;  %v3784_v25 = vpack.i.bf16 %v5057_v28, %v5060_v37 }
 0x1c9   : > { %v3473_v62 = vunpack.i.h.bf16 %v3471_v40  ;;  %v3472_v15 = vunpack.i.l.bf16 %v3471_v40  ;;  %v1669_v40 = vsel %vm1667_vm4, %v1636_v34, %v3478_v47  ;;  %v6129_v34 = vpack.i.bf16 %v4700_v20, %v4697_v3 }
 0x1ca   : > { %v5068_v55 = vpop.permute.xlu1 %3505  ;;  %3775 = vrot.lane.b32.xlu0 %v3774_v36, %s4048_s30  ;;  %v3794_v47 = vpack.i.bf16 %v4767_v63, %v4764_v33  ;;  %v971_v3 = vrot.slane %v4798_v44, 7  ;;  %v972_v20 = vrot.slane %v4814_v48, 7 }
 0x1cb   : > { %v1701_v32 = vsel %vm1601_vm2, %v6127_v21, %v3473_v62  ;;  %v1700_v6 = vsel %vm1601_vm2, %v6128_v29, %v3472_v15  ;;  %v839_v29 = vrot.slane %v4804_v17, 7 }
 0x1cc   : > { %3780 = vrot.lane.b32.xlu1 %v3779_v61, %s4048_s30  ;;  %v5084_v36 = vpop.permute.xlu0 %3485  ;;  %v1732_v28 = vsel %vm1634_vm3, %v1700_v6, %v3442_v51  ;;  %v1733_v37 = vsel %vm1634_vm3, %v1701_v32, %v3443_v5  ;;  %v1796_v61 = vpack.c.bf16 %v1669_v40, %v1668_v9  ;;  %v5119_v5 = vsel %vm793_vm1, %v971_v3, %v972_v20 }
 0x1cd   : > { %v1764_v26 = vsel %vm1667_vm4, %v1732_v28, %v3422_v38  ;;  %v1765_v62 = vsel %vm1667_vm4, %v1733_v37, %v3423_v12  ;;  %v3804_v12 = vpack.i.bf16 %v4739_v23, %v4811_v50  ;;  %v6130_v28 = vpack.i.bf16 %v4787_v10, %v4784_v14 }
 0x1ce   : > { %v5088_v42 = vpop.permute.xlu1 %3520  ;;  %3785 = vrot.lane.b32.xlu0 %v3784_v25, %s4046_s29  ;;  %v1797_v15 = vpack.c.bf16 %v1765_v62, %v1764_v26  ;;  %v5122_v21 = vsel %vm793_vm1, 0.0, %v971_v3  ;;  %v838_v32 = vrot.slane %v4802_v43, 7  ;;  %v3438_v10 = vunpack.i.h.bf16 %v4997_v13 }
 0x1cf   : > { %v3829_v14 = vpack.i.bf16 %v5119_v5, %v5122_v21  ;;  %v3448_v9 = vunpack.i.h.bf16 %v5007_v0  ;;  %v3824_v13 = vpack.i.bf16 %v4845_v2, %v4767_v63  ;;  %v3483_v3 = vunpack.i.h.bf16 %v5028_v31 }
 0x1d0   : > { %3790 = vrot.lane.b32.xlu1 %v6129_v34, %s4046_s29  ;;  %2068 = vmatprep.mubr.bf16.mxu1 %v1797_v15  ;;  %v5097_v19 = vpop.permute.xlu0 %3495  ;;  %v5137_v62 = vsel %vm793_vm1, %v838_v32, %v839_v29  ;;  %v5140_v15 = vsel %vm793_vm1, 0.0, %v838_v32  ;;  %v6133_v34 = vld [vmem:[#allocation21_spill] sm:$0xff]  ;;  %v3453_v20 = vunpack.i.h.bf16 %v4990_v57  ;;  %v3452_v32 = vunpack.i.l.bf16 %v4990_v57 }
 0x1d1   : > { %2069 = vmatmul.mubr.bf16.vlgmr.msra.gmra.mrb[16].mxu1 %v1796_v61  ;;  %6131 = vst [vmem:[#allocation14_spill] sm:$0xff] %v5137_v62  ;;  %6132 = vst [vmem:[#allocation11_spill] sm:$0xff] %v5140_v15  ;;  %v3482_v61 = vunpack.i.l.bf16 %v5028_v31  ;;  %v1702_v2 = vsel %vm1601_vm2, %v4316_v18, %v3438_v10 }
 0x1d2   : > { %v5101_v51 = vpop.permute.xlu1 %3525  ;;  %3795 = vrot.lane.b32.xlu0 %v3794_v47, %s4047_s21 }
 0x1d4   : > { %3800 = vrot.lane.b32.xlu1 %v3754_v56, %s4047_s21  ;;  %v3501_v38 = vpop.permute.xlu0 %3500 }
 0x1d5   : > { %v3503_v57 = vunpack.i.h.bf16 %v3501_v38  ;;  %v3502_v23 = vunpack.i.l.bf16 %v3501_v38 }
 0x1d6   : > { %v3531_v37 = vpop.permute.xlu1 %3530  ;;  %3805 = vrot.lane.b32.xlu0 %v3804_v12, %s4048_s30  ;;  %v3447_v12 = vunpack.i.l.bf16 %v5007_v0  ;;  %v6134_v0 = vld [vmem:[#allocation20_spill] sm:$0xff] }
 0x1d7   : > { %v3532_v6 = vunpack.i.l.bf16 %v3531_v37  ;;  %v1604_v31 = vsel %vm1601_vm2, %v6134_v0, %v3448_v9  ;;  %v3457_v0 = vunpack.i.l.bf16 %v5001_v39 }
 0x1d8   : > { %3810 = vrot.lane.b32.xlu1 %v6130_v28, %s4046_s29  ;;  %v5116_v56 = vpop.permute.xlu0 %3510  ;;  %v3834_v28 = vpack.i.bf16 %v4837_v53, %v4746_v30 }
 0x1d9   : > { %v3512_v18 = vunpack.i.l.bf16 %v5116_v56 }
 0x1da   : > { %v5126_v40 = vpop.permute.xlu1 %3545  ;;  %3815 = vrot.lane.b32.xlu0 %v3814_v60, %s4047_s21  ;;  %v5158_v60 = vpack.i.bf16 %v5137_v62, %v5140_v15  ;;  %v6135_v15 = vld [vmem:[#allocation9_spill] sm:$0xff] }
 0x1db   : > { %v1703_v62 = vsel %vm1601_vm2, %v6135_v15, %v3447_v12  ;;  %v3507_v15 = vunpack.i.l.bf16 %v5068_v55 }
 0x1dc   : > { %3820 = vrot.lane.b32.xlu1 %v3784_v25, %s4047_s21  ;;  %v5134_v26 = vpop.permute.xlu0 %3515  ;;  %v1605_v25 = vsel %vm1601_vm2, %v6133_v34, %v3532_v6  ;;  %v3533_v34 = vunpack.i.h.bf16 %v3531_v37  ;;  %v3849_v37 = vpack.i.bf16 %v4814_v48, %v4798_v44 }
 0x1dd   : > { %v1638_v6 = vsel %vm1634_vm3, %v1605_v25, %v3483_v3 }
 0x1de   : > { %v5145_v47 = vpop.permute.xlu1 %3550  ;;  %3830 = vrot.lane.b32.xlu0 %v3829_v14, %s4046_s29  ;;  %v1637_v14 = vsel %vm1634_vm3, %v1604_v31, %v3482_v61  ;;  %v1671_v61 = vsel %vm1667_vm4, %v1638_v6, %v3453_v20  ;;  %v3513_v20 = vunpack.i.h.bf16 %v5116_v56  ;;  %v6136_v6 = vld [vmem:[#allocation17_spill] sm:$0xff]  ;;  %v6138_v56 = vld [vmem:[#allocation16_spill] sm:$0xff] }
 0x1df   : > { %v1670_v3 = vsel %vm1667_vm4, %v1637_v14, %v3452_v32  ;;  %v3497_v32 = vunpack.i.l.bf16 %v5097_v19 }
 0x1e0   : > { %3825 = vrot.lane.b32.xlu1 %v3824_v13, %s4048_s30  ;;  %v3536_v29 = vpop.permute.xlu0 %3535 }
 0x1e1   : > { %v3538_v63 = vunpack.i.h.bf16 %v3536_v29  ;;  %v3537_v30 = vunpack.i.l.bf16 %v3536_v29  ;;  %v3498_v29 = vunpack.i.h.bf16 %v5097_v19  ;;  %v3854_v19 = vpack.i.bf16 %v4764_v33, %v4840_v8 }
 0x1e2   : > { %v5167_v13 = vpop.permute.xlu1 %3555  ;;  %3845 = vrot.lane.b32.xlu0 %v5158_v60, %s4046_s29 }
 0x1e3   : > { %v1735_v10 = vsel %vm1634_vm3, %v1703_v62, %v3538_v63  ;;  %v1734_v9 = vsel %vm1634_vm3, %v1702_v2, %v3537_v30  ;;  %v1704_v63 = vsel %vm1601_vm2, %v4369_v54, %v3533_v34  ;;  %v6137_v34 = vpack.i.bf16 %v4811_v50, %v4808_v1 }
 0x1e4   : > { %3835 = vrot.lane.b32.xlu1 %v3834_v28, %s4048_s30  ;;  %v3541_v25 = vpop.permute.xlu0 %3540  ;;  %v1766_v38 = vsel %vm1667_vm4, %v1734_v9, %v3502_v23  ;;  %v1767_v12 = vsel %vm1667_vm4, %v1735_v10, %v3503_v57  ;;  %v1736_v31 = vsel %vm1634_vm3, %v1704_v63, %v3512_v18  ;;  %v1799_v23 = vpack.c.bf16 %v1671_v61, %v1670_v3 }
 0x1e5   : > { %v3543_v62 = vunpack.i.h.bf16 %v3541_v25  ;;  %v3542_v28 = vunpack.i.l.bf16 %v3541_v25  ;;  %v1800_v2 = vpack.c.bf16 %v1767_v12, %v1766_v38  ;;  %v1607_v57 = vsel %vm1601_vm2, %v6138_v56, %v3507_v15 }
 0x1e6   : > { %v5186_v30 = vpop.permute.xlu1 %3570  ;;  %3850 = vrot.lane.b32.xlu0 %v3849_v37, %s4047_s21  ;;  %v3547_v37 = vunpack.i.l.bf16 %v5126_v40  ;;  %v1768_v1 = vsel %vm1667_vm4, %v1736_v31, %v3497_v32  ;;  %v3458_v15 = vunpack.i.h.bf16 %v5001_v39  ;;  %v6139_v31 = vpack.i.bf16 %v4840_v8, %v4837_v53 }
 0x1e7   : > { %v1606_v54 = vsel %vm1601_vm2, %v6136_v6, %v3543_v62  ;;  %v1705_v14 = vsel %vm1601_vm2, %v4383_v4, %v3542_v28  ;;  %2076 = vmatprep.mubr.bf16.mxu1 %v1800_v2  ;;  %v3548_v4 = vunpack.i.h.bf16 %v5126_v40  ;;  %v3859_v40 = vpack.i.bf16 %v4802_v43, %v4848_v22 }
 0x1e8   : > { %3840 = vrot.lane.b32.xlu1 %v6137_v34, %s4046_s29  ;;  %2077 = vmatmul.mubr.bf16.gmra.mrb[20].mxu1 %v1799_v23  ;;  %v5204_v18 = vpop.permute.xlu0 %3560  ;;  %v1737_v10 = vsel %vm1634_vm3, %v1705_v14, %v3513_v20  ;;  %v1639_v9 = vsel %vm1634_vm3, %v1606_v54, %v3457_v0  ;;  %v1640_v3 = vsel %vm1634_vm3, %v1607_v57, %v3458_v15  ;;  %v3518_v22 = vunpack.i.h.bf16 %v5134_v26  ;;  %v6140_v14 = vld [vmem:[#allocation18_spill] sm:$0xff] }
 0x1e9   : > { %v1769_v61 = vsel %vm1667_vm4, %v1737_v10, %v3498_v29  ;;  %v1672_v38 = vsel %vm1667_vm4, %v1639_v9, %v3547_v37  ;;  %v1673_v62 = vsel %vm1667_vm4, %v1640_v3, %v3548_v4  ;;  %v3864_v28 = vpack.i.bf16 %v5021_v52, %v5034_v58 }
 0x1ea   : > { %v5212_v50 = vpop.permute.xlu1 %3585  ;;  %3855 = vrot.lane.b32.xlu0 %v3854_v19, %s4048_s30  ;;  %v1803_v25 = vpack.c.bf16 %v1769_v61, %v1768_v1  ;;  %v1802_v39 = vpack.c.bf16 %v1673_v62, %v1672_v38  ;;  %v3508_v23 = vunpack.i.h.bf16 %v5068_v55  ;;  %v3879_v52 = vpack.i.bf16 %v5122_v21, %v6122_v11 }
 0x1eb   : > { %v3517_v58 = vunpack.i.l.bf16 %v5134_v26  ;;  %v3553_v6 = vunpack.i.h.bf16 %v5145_v47  ;;  %v1608_v8 = vsel %vm1601_vm2, %v4709_v45, %v3518_v22  ;;  %v3523_v55 = vunpack.i.h.bf16 %v5088_v42  ;;  %v6141_v22 = vld [vmem:[#allocation31_spill] sm:$0xff] }
 0x1ec   : > { %1057 = vrot.lane.b32.xlu1 %v4804_v17, %s4048_s30  ;;  %2084 = vmatprep.mubr.bf16.mxu1 %v1803_v25  ;;  %v3566_v12 = vpop.permute.xlu0 %3565  ;;  %v1706_v11 = vsel %vm1601_vm2, %v4414_v24, %v3508_v23  ;;  %v3522_v54 = vunpack.i.l.bf16 %v5088_v42  ;;  %v3572_v37 = vunpack.i.l.bf16 %v5186_v30  ;;  %v3527_v3 = vunpack.i.l.bf16 %v5101_v51 }
 0x1ed   : > { %v1707_v34 = vsel %vm1601_vm2, %v6140_v14, %v3517_v58  ;;  %v3567_v19 = vunpack.i.l.bf16 %v3566_v12  ;;  %v3428_v14 = vunpack.i.h.bf16 %v4969_v41 }
 0x1ee   : > { %v5224_v63 = vpop.permute.xlu1 %3590  ;;  %3860 = vrot.lane.b32.xlu0 %v3859_v40, %s4048_s30 }
 0x1f0   : > { %3870 = vrot.lane.b32.xlu1 %v5158_v60, %s4047_s21  ;;  %2085 = vmatmul.mubr.bf16.gmra.mrb[24].mxu1 %v1802_v39  ;;  %v3576_v2 = vpop.permute.xlu0 %3575 }
 0x1f1   : > { %v3577_v10 = vunpack.i.l.bf16 %v3576_v2  ;;  %v3578_v62 = vunpack.i.h.bf16 %v3576_v2 }
 0x1f2   : > { %v3596_v0 = vpop.permute.xlu1 %3595  ;;  %3865 = vrot.lane.b32.xlu0 %v3864_v28, %s4046_s29 }
 0x1f3   : > { %v3597_v20 = vunpack.i.l.bf16 %v3596_v0  ;;  %v3598_v53 = vunpack.i.h.bf16 %v3596_v0  ;;  %v3563_v0 = vunpack.i.h.bf16 %v5204_v18 }
 0x1f4   : > { %3875 = vrot.lane.b32.xlu1 %v6139_v31, %s4046_s29  ;;  %v5239_v29 = vpop.permute.xlu0 %3580 }
 0x1f5   : > { %v1609_v60 = vsel %vm1601_vm2, %v4706_v27, %v3597_v20  ;;  %v3552_v27 = vunpack.i.l.bf16 %v5145_v47  ;;  %v1708_v47 = vsel %vm1601_vm2, %v4447_v49, %v3598_v53  ;;  %v3562_v20 = vunpack.i.l.bf16 %v5204_v18 }
 0x1f6   : > { %v5246_v32 = vpop.permute.xlu1 %3610  ;;  %3880 = vrot.lane.b32.xlu0 %v3879_v52, %s4047_s21  ;;  %v1642_v26 = vsel %vm1634_vm3, %v1609_v60, %v3553_v6  ;;  %v1740_v39 = vsel %vm1634_vm3, %v1708_v47, %v3577_v10  ;;  %v6142_v52 = vld [vmem:[#allocation30_spill] sm:$0xff] }
 0x1f7   : > { %v1641_v24 = vsel %vm1634_vm3, %v1608_v8, %v3552_v27  ;;  %v1675_v42 = vsel %vm1667_vm4, %v1642_v26, %v3523_v55  ;;  %v1611_v58 = vsel %vm1601_vm2, %v6142_v52, %v3572_v37  ;;  %v3613_v60 = vunpack.i.h.bf16 %v5246_v32 }
 0x1f8   : > { %1280 = vrot.lane.b32.xlu1 %v5119_v5, %s4047_s21  ;;  %v3601_v21 = vpop.permute.xlu0 %3600  ;;  %v3568_v5 = vunpack.i.h.bf16 %v3566_v12  ;;  %v1674_v49 = vsel %vm1667_vm4, %v1641_v24, %v3522_v54  ;;  %v3612_v18 = vunpack.i.l.bf16 %v5246_v32  ;;  %v3463_v27 = vunpack.i.h.bf16 %v5024_v16  ;;  %v6143_v32 = vld [vmem:[#allocation15_spill] sm:$0xff] }
 0x1f9   : > { %v3603_v56 = vunpack.i.h.bf16 %v3601_v21  ;;  %v3602_v57 = vunpack.i.l.bf16 %v3601_v21  ;;  %v1805_v28 = vpack.c.bf16 %v1675_v42, %v1674_v49  ;;  %v3528_v21 = vunpack.i.h.bf16 %v5101_v51 }
 0x1fa   : > { %v5262_v45 = vpop.permute.xlu1 %3615  ;;  %v3468_v52 = vunpack.i.h.bf16 %v5042_v7 }
 0x1fb   : > { %v1739_v9 = vsel %vm1634_vm3, %v1707_v34, %v3603_v56  ;;  %v1738_v4 = vsel %vm1634_vm3, %v1706_v11, %v3602_v57  ;;  %v3462_v34 = vunpack.i.l.bf16 %v5024_v16  ;;  %v1644_v51 = vsel %vm1634_vm3, %v1611_v58, %v3528_v21  ;;  %v6147_v21 = vld [vmem:[#allocation29_spill] sm:$0xff] }
 0x1fc   : > { %v3606_v1 = vpop.permute.xlu0 %3605  ;;  %v1770_v61 = vsel %vm1667_vm4, %v1738_v4, %v3567_v19  ;;  %v1771_v15 = vsel %vm1667_vm4, %v1739_v9, %v3568_v5  ;;  %v3427_v5 = vunpack.i.l.bf16 %v4969_v41  ;;  %v6144_v19 = vld [vmem:[#allocation12_spill] sm:$0xff]  ;;  %v1677_v16 = vsel %vm1667_vm4, %v1644_v51, %v3613_v60 }
 0x1fd   : > { %v3608_v38 = vunpack.i.h.bf16 %v3606_v1  ;;  %v3607_v12 = vunpack.i.l.bf16 %v3606_v1  ;;  %v1806_v40 = vpack.c.bf16 %v1771_v15, %v1770_v61  ;;  %v3487_v61 = vunpack.i.l.bf16 %v5084_v36 }
 0x1fe   : > { %v5273_v25 = vpop.permute.xlu1 %3630  ;;  %v3488_v58 = vunpack.i.h.bf16 %v5084_v36 }
 0x1ff   : > { %v1610_v31 = vsel %vm1601_vm2, %v6141_v22, %v3608_v38  ;;  %v1709_v23 = vsel %vm1601_vm2, %v4457_v59, %v3607_v12  ;;  %2092 = vmatprep.mubr.bf16.mxu1 %v1806_v40  ;;  %v1772_v59 = vsel %vm1667_vm4, %v1740_v39, %v3562_v20  ;;  %v3432_v38 = vunpack.i.l.bf16 %v4986_v46 }
 0x200   : > { %2093 = vmatmul.mubr.bf16.gmra.mrb[28].mxu1 %v1805_v28  ;;  %v5287_v2 = vpop.permute.xlu0 %3620  ;;  %v1741_v6 = vsel %vm1634_vm3, %v1709_v23, %v3578_v62  ;;  %v1643_v8 = vsel %vm1634_vm3, %v1610_v31, %v3527_v3  ;;  %v3583_v20 = vunpack.i.h.bf16 %v5239_v29  ;;  %v3582_v22 = vunpack.i.l.bf16 %v5239_v29 }
 0x201   : > { %v3622_v11 = vunpack.i.l.bf16 %v5287_v2  ;;  %v1773_v55 = vsel %vm1667_vm4, %v1741_v6, %v3563_v0  ;;  %v1676_v57 = vsel %vm1667_vm4, %v1643_v8, %v3612_v18  ;;  %v3573_v0 = vunpack.i.h.bf16 %v5186_v30  ;;  %v6145_v30 = vld [vmem:[#allocation19_spill] sm:$0xff] }
 0x202   : > { %v5292_v53 = vpop.permute.xlu1 %3640  ;;  %v1809_v54 = vpack.c.bf16 %v1773_v55, %v1772_v59  ;;  %v1808_v37 = vpack.c.bf16 %v1677_v16, %v1676_v57  ;;  %v3433_v23 = vunpack.i.h.bf16 %v4986_v46  ;;  %v3557_v8 = vunpack.i.l.bf16 %v5167_v13  ;;  %v6146_v55 = vld [vmem:[#allocation42_spill] sm:$0xff] }
 0x203   : > { %v3643_v26 = vunpack.i.h.bf16 %v5292_v53  ;;  %v1717_v56 = vsel %vm1601_vm2, %v6143_v32, %v3622_v11  ;;  %v1710_v18 = vsel %vm1601_vm2, %v6145_v30, %v3573_v0  ;;  %v3588_v29 = vunpack.i.h.bf16 %v5212_v50 }
 0x204   : > { %2100 = vmatprep.mubr.bf16.mxu1 %v1809_v54  ;;  %v5308_v24 = vpop.permute.xlu0 %3625  ;;  %v1749_v47 = vsel %vm1634_vm3, %v1717_v56, %v3463_v27  ;;  %v3587_v59 = vunpack.i.l.bf16 %v5212_v50  ;;  %v1612_v46 = vsel %vm1601_vm2, %v6146_v55, %v3583_v20  ;;  %v3618_v27 = vunpack.i.h.bf16 %v5262_v45 }
 0x205   : > { %v1716_v10 = vsel %vm1601_vm2, %v6144_v19, %v3643_v26  ;;  %v5317_v42 = vsel %vm1667_vm4, %v1749_v47, %v3428_v14  ;;  %v6148_v26 = vld [vmem:[#allocation22_spill] sm:$0xff] }
 0x206   : > { %v5312_v9 = vpop.permute.xlu1 %3645  ;;  %v1748_v4 = vsel %vm1634_vm3, %v1716_v10, %v3462_v34  ;;  %v1711_v54 = vsel %vm1601_vm2, %v6148_v26, %v3582_v22  ;;  %v6149_v34 = vld [vmem:[#allocation41_spill] sm:$0xff] }
 0x207   : > { %v3648_v41 = vunpack.i.h.bf16 %v5312_v9  ;;  %v5321_v1 = vsel %vm1667_vm4, %v1748_v4, %v3427_v5 }
 0x208   : > { %v1821_v15 = vpack.c.bf16 %v5317_v42, %v5321_v1  ;;  %2101 = vmatmul.mubr.bf16.gmra.mrb[32].mxu1 %v1808_v37  ;;  %v3636_v40 = vpop.permute.xlu0 %3635 }
 0x209   : > { %v1714_v12 = vsel %vm1601_vm2, %v4581_v35, %v3648_v41  ;;  %v3617_v35 = vunpack.i.l.bf16 %v5262_v45  ;;  %v3638_v50 = vunpack.i.h.bf16 %v3636_v40  ;;  %v3637_v47 = vunpack.i.l.bf16 %v3636_v40 }
 0x20a   : > { %v5329_v49 = vpop.permute.xlu1 %3660  ;;  %v1746_v3 = vsel %vm1634_vm3, %v1714_v12, %v3487_v61 }
 0x20b   : > { %v5333_v62 = vsel %vm1667_vm4, %v1746_v3, %v3432_v38  ;;  %v1645_v14 = vsel %vm1634_vm3, %v1612_v46, %v3617_v35 }
 0x20c   : > { %v5335_v39 = vpop.permute.xlu0 %3650 }
 0x20e   : > { %v5337_v28 = vpop.permute.xlu1 %3665 }
 0x210   : > { %v5343_v31 = vpop.permute.xlu0 %3655 }
 0x211   : > { %v3657_v6 = vunpack.i.l.bf16 %v5343_v31 }
 0x212   : > { %v3671_v60 = vpop.permute.xlu1 %3670 }
 0x213   : > { %v3672_v11 = vunpack.i.l.bf16 %v3671_v60  ;;  %v1715_v36 = vsel %vm1601_vm2, %v6147_v21, %v3657_v6  ;;  %v3673_v16 = vunpack.i.h.bf16 %v3671_v60  ;;  %v6152_v21 = vld [vmem:[#allocation24_spill] sm:$0xff] }
 0x214   : > { %v3676_v56 = vpop.permute.xlu0 %3675  ;;  %v1747_v57 = vsel %vm1634_vm3, %v1715_v36, %v3488_v58  ;;  %v6150_v58 = vld [vmem:[#allocation28_spill] sm:$0xff] }
 0x215   : > { %v1613_v32 = vsel %vm1601_vm2, %v6149_v34, %v3672_v11  ;;  %v3678_v19 = vunpack.i.h.bf16 %v3676_v56  ;;  %v3677_v10 = vunpack.i.l.bf16 %v3676_v56  ;;  %v5374_v3 = vsel %vm1667_vm4, %v1747_v57, %v3433_v23 }
 0x216   : > { %v3686_v5 = vpop.permute.xlu1 %3685  ;;  %v1646_v45 = vsel %vm1634_vm3, %v1613_v32, %v3618_v27  ;;  %v1620_v60 = vsel %vm1601_vm2, %v6150_v58, %v3468_v52  ;;  %v1818_v23 = vpack.c.bf16 %v5374_v3, %v5333_v62  ;;  %v1712_v36 = vsel %vm1601_vm2, %v6152_v21, %v3673_v16  ;;  %v6154_v16 = vld [vmem:[#allocation26_spill] sm:$0xff] }
 0x217   : > { %v3688_v4 = vunpack.i.h.bf16 %v3686_v5  ;;  %v3687_v41 = vunpack.i.l.bf16 %v3686_v5  ;;  %v1743_v61 = vsel %vm1634_vm3, %v1711_v54, %v3678_v19  ;;  %v1742_v38 = vsel %vm1634_vm3, %v1710_v18, %v3677_v10 }
 0x218   : > { %v1679_v12 = vsel %vm1667_vm4, %v1646_v45, %v3588_v29  ;;  %v5378_v20 = vpop.permute.xlu0 %3680  ;;  %v1774_v40 = vsel %vm1667_vm4, %v1742_v38, %v3637_v47  ;;  %v1775_v22 = vsel %vm1667_vm4, %v1743_v61, %v3638_v50  ;;  %v1678_v18 = vsel %vm1667_vm4, %v1645_v14, %v3587_v59  ;;  %v6151_v29 = vld [vmem:[#allocation27_spill] sm:$0xff]  ;;  %v6153_v45 = vld [vmem:[#allocation40_spill] sm:$0xff] }
 0x219   : > { %v5366_v51 = vpop.f32.mrb[16].mxu0  ;;  %v1812_v30 = vpack.c.bf16 %v1775_v22, %v1774_v40  ;;  %v1621_v11 = vsel %vm1601_vm2, %v6151_v29, %v3557_v8  ;;  %v1811_v27 = vpack.c.bf16 %v1679_v12, %v1678_v18  ;;  %v1653_v52 = vsel %vm1634_vm3, %v1620_v60, %v3687_v41  ;;  %v6155_v41 = vld [vmem:[#allocation39_spill] sm:$0xff] }
 0x21a   : > { %v5368_v37 = vpop.f32.mrb[17].mxu0  ;;  %v3701_v6 = vpop.permute.xlu1 %3700  ;;  %v1654_v26 = vsel %vm1634_vm3, %v1621_v11, %v3688_v4  ;;  %v3647_v54 = vunpack.i.l.bf16 %v5312_v9  ;;  %v3652_v59 = vunpack.i.l.bf16 %v5335_v39  ;;  %v3592_v50 = vunpack.i.l.bf16 %v5224_v63 }
 0x21b   : > { %v5376_v0 = vpop.f32.mrb[18].mxu0  ;;  %v3703_v55 = vunpack.i.h.bf16 %v3701_v6  ;;  %v3702_v46 = vunpack.i.l.bf16 %v3701_v6  ;;  %2108 = vmatprep.mubr.bf16.mxu1 %v1812_v30  ;;  %v3653_v9 = vunpack.i.h.bf16 %v5335_v39  ;;  %v3628_v19 = vunpack.i.h.bf16 %v5308_v24 }
 0x21c   : > { %v5382_v35 = vpop.f32.mrb[19].mxu0  ;;  %v3691_v14 = vpop.permute.xlu0 %3690  ;;  %2109 = vmatmul.mubr.bf16.gmra.mrb[36].mxu1 %v1811_v27  ;;  %v1744_v5 = vsel %vm1634_vm3, %v1712_v36, %v3652_v59  ;;  %v3627_v10 = vunpack.i.l.bf16 %v5308_v24  ;;  %v1615_v61 = vsel %vm1601_vm2, %v6155_v41, %v3647_v54  ;;  %v3593_v3 = vunpack.i.h.bf16 %v5224_v63 }
 0x21d   : > { %v5398_v62 = vsel %vm1667_vm4, %v1653_v52, %v3702_v46  ;;  %v5401_v8 = vsel %vm1667_vm4, %v1654_v26, %v3703_v55  ;;  %v3693_v32 = vunpack.i.h.bf16 %v3691_v14  ;;  %v3692_v56 = vunpack.i.l.bf16 %v3691_v14  ;;  %v6156_v14 = vld [vmem:[#allocation45_spill] sm:$0xff] }
 0x21e   : > { %v5403_v34 = vpop.permute.xlu1 %3710  ;;  %v1823_v57 = vpack.c.bf16 %v5401_v8, %v5398_v62  ;;  %v1776_v24 = vsel %vm1667_vm4, %v1744_v5, %v3627_v10  ;;  %v3642_v11 = vunpack.i.l.bf16 %v5292_v53  ;;  %v3658_v55 = vunpack.i.h.bf16 %v5343_v31 }
 0x21f   : > { %v1614_v47 = vsel %vm1601_vm2, %v6153_v45, %v3693_v32  ;;  %v1713_v4 = vsel %vm1601_vm2, %v6154_v16, %v3692_v56  ;;  %v1648_v63 = vsel %vm1634_vm3, %v1615_v61, %v3593_v3  ;;  %v6157_v32 = vld [vmem:[#allocation46_spill] sm:$0xff]  ;;  %v3663_v56 = vunpack.i.h.bf16 %v5329_v49 }
 0x220   : > { %v5418_v38 = vpop.permute.xlu0 %3695  ;;  %v1745_v12 = vsel %vm1634_vm3, %v1713_v4, %v3653_v9  ;;  %v1647_v58 = vsel %vm1634_vm3, %v1614_v47, %v3592_v50  ;;  %v1617_v53 = vsel %vm1601_vm2, %v6156_v14, %v3642_v11  ;;  %v1616_v31 = vsel %vm1601_vm2, %v6157_v32, %v3658_v55 }
 0x221   : > { %v5421_v39 = vpop.f32.mrb[20].mxu0  ;;  %v1777_v22 = vsel %vm1667_vm4, %v1745_v12, %v3628_v19  ;;  %v3662_v50 = vunpack.i.l.bf16 %v5329_v49  ;;  %v3632_v16 = vunpack.i.l.bf16 %v5273_v25  ;;  %v3623_v4 = vunpack.i.h.bf16 %v5287_v2 }
 0x222   : > { %v3721_v40 = vpop.permute.xlu1 %3720  ;;  %v5427_v60 = vpop.f32.mrb[21].mxu0  ;;  %v1815_v18 = vpack.c.bf16 %v1777_v22, %v1776_v24  ;;  %v3667_v12 = vunpack.i.l.bf16 %v5337_v28  ;;  %v3467_v24 = vunpack.i.l.bf16 %v5042_v7  ;;  %v3633_v22 = vunpack.i.h.bf16 %v5273_v25 }
 0x223   : > { %v3723_v6 = vunpack.i.h.bf16 %v3721_v40  ;;  %v3722_v30 = vunpack.i.l.bf16 %v3721_v40  ;;  %v5429_v29 = vpop.f32.mrb[22].mxu0  ;;  %v3683_v55 = vunpack.i.h.bf16 %v5378_v20  ;;  %v3698_v7 = vunpack.i.h.bf16 %v5418_v38 }
 0x224   : > { %v5434_v46 = vpop.f32.mrb[23].mxu0  ;;  %v5436_v27 = vpop.permute.xlu0 %3705  ;;  %2116 = vmatprep.mubr.bf16.mxu1 %v1815_v18  ;;  %v6159_v18 = vld [vmem:[#allocation44_spill] sm:$0xff]  ;;  %v3697_v25 = vunpack.i.l.bf16 %v5418_v38 }
 0x225   : > { %v1680_v21 = vsel %vm1667_vm4, %v1647_v58, %v3722_v30  ;;  %v1681_v36 = vsel %vm1667_vm4, %v1648_v63, %v3723_v6  ;;  %v6158_v6 = vld [vmem:[#allocation43_spill] sm:$0xff]  ;;  %v1618_v11 = vsel %vm1601_vm2, %v6159_v18, %v3623_v4 }
 0x226   : > { %v3726_v26 = vpop.permute.xlu1 %3725  ;;  %v1814_v52 = vpack.c.bf16 %v1681_v36, %v1680_v21  ;;  %v1619_v30 = vsel %vm1601_vm2, %v6158_v6, %v3632_v16  ;;  %v1651_v21 = vsel %vm1634_vm3, %v1618_v11, %v3667_v12  ;;  %v6160_v36 = vld [vmem:[#allocation53_spill] sm:$0xff] }
 0x227   : > { %v3728_v54 = vunpack.i.h.bf16 %v3726_v26  ;;  %v3727_v59 = vunpack.i.l.bf16 %v3726_v26  ;;  %v3493_v26 = vunpack.i.h.bf16 %v6160_v36 }
 0x228   : > { %2117 = vmatmul.mubr.bf16.gmra.mrb[40].mxu1 %v1814_v52  ;;  %v5448_v19 = vpop.permute.xlu0 %3715  ;;  %v3492_v52 = vunpack.i.l.bf16 %v6160_v36  ;;  %v3712_v36 = vunpack.i.l.bf16 %v5403_v34 }
 0x229   : > { %v1649_v9 = vsel %vm1634_vm3, %v1616_v31, %v3727_v59  ;;  %v1650_v5 = vsel %vm1634_vm3, %v1617_v53, %v3728_v54  ;;  %2124 = vmatprep.mubr.bf16.mxu1 %v1818_v23  ;;  %v5450_v10 = vpop.f32.mrb[24].mxu0  ;;  %v3668_v23 = vunpack.i.h.bf16 %v5337_v28  ;;  %v3682_v28 = vunpack.i.l.bf16 %v5378_v20  ;;  %v6161_v59 = vld [vmem:[#allocation13_spill] sm:$0xff]  ;;  %v6162_v53 = vld [vmem:[#allocation10_spill] sm:$0xff] }
 0x22a   : > { %v5452_v45 = vpop.permute.xlu1 %3730  ;;  %v5454_v47 = vpop.f32.mrb[25].mxu0  ;;  %v1682_v41 = vsel %vm1667_vm4, %v1649_v9, %v3662_v50  ;;  %v1683_v49 = vsel %vm1667_vm4, %v1650_v5, %v3663_v56  ;;  %v1719_v14 = vsel %vm1601_vm2, %v6161_v59, %v3467_v24  ;;  %v1718_v32 = vsel %vm1601_vm2, %v6162_v53, %v3633_v22 }
 0x22b   : > { %v5460_v61 = vpop.f32.mrb[26].mxu0  ;;  %v1817_v2 = vpack.c.bf16 %v1683_v49, %v1682_v41  ;;  %v1652_v63 = vsel %vm1634_vm3, %v1619_v30, %v3668_v23  ;;  %v1751_v56 = vsel %vm1634_vm3, %v1719_v14, %v3683_v55  ;;  %v1750_v50 = vsel %vm1634_vm3, %v1718_v32, %v3682_v28  ;;  %v6163_v55 = vld [vmem:[#allocation32_spill] sm:$0xff]  ;;  %v6164_v28 = vld [vmem:[#allocation33_spill] sm:$0xff] }
 0x22c   : > { %v5464_v3 = vpop.f32.mrb[27].mxu0  ;;  %v3736_v40 = vpop.permute.xlu0 %3735  ;;  %v1684_v1 = vsel %vm1667_vm4, %v1651_v21, %v3492_v52  ;;  %v1782_v5 = vsel %vm1667_vm4, %v1750_v50, %v3697_v25  ;;  %v1783_v16 = vsel %vm1667_vm4, %v1751_v56, %v3698_v7  ;;  %v3558_v41 = vunpack.i.h.bf16 %v5167_v13 }
 0x22d   : > { %v3707_v49 = vunpack.i.l.bf16 %v5436_v27  ;;  %v3718_v24 = vunpack.i.h.bf16 %v5448_v19  ;;  %v3717_v22 = vunpack.i.l.bf16 %v5448_v19  ;;  %v3738_v6 = vunpack.i.h.bf16 %v3736_v40 }
 0x22e   : > { %v5468_v58 = vpop.permute.xlu1 %3740  ;;  %v3737_v30 = vunpack.i.l.bf16 %v3736_v40  ;;  %v1720_v13 = vsel %vm1601_vm2, %v6163_v55, %v3558_v41  ;;  %v3733_v53 = vunpack.i.h.bf16 %v5452_v45  ;;  %v3732_v32 = vunpack.i.l.bf16 %v5452_v45 }
 0x22f   : > { %v1752_v19 = vsel %vm1634_vm3, %v1720_v13, %v3717_v22  ;;  %v3713_v50 = vunpack.i.h.bf16 %v5403_v34  ;;  %v6166_v22 = vld [vmem:[#allocation25_spill] sm:$0xff]  ;;  %v6168_v13 = vld [vmem:[#allocation35_spill] sm:$0xff] }
 0x230   : > { %2125 = vmatmul.mubr.bf16.gmra.mrb[44].mxu1 %v1817_v2  ;;  %v5485_v54 = vpop.permute.xlu0 %3745  ;;  %v1824_v2 = vpack.c.bf16 %v1783_v16, %v1782_v5  ;;  %v1784_v52 = vsel %vm1667_vm4, %v1752_v19, %v3737_v30 }
 0x231   : > { %2132 = vmatprep.mubr.bf16.mxu1 %v1821_v15  ;;  %v5487_v20 = vpop.f32.mrb[28].mxu0  ;;  %v1685_v15 = vsel %vm1667_vm4, %v1652_v63, %v3493_v26  ;;  %v1721_v63 = vsel %vm1601_vm2, %v6164_v28, %v3707_v49  ;;  %v3708_v26 = vunpack.i.h.bf16 %v5436_v27  ;;  %v3747_v27 = vunpack.i.l.bf16 %v5485_v54 }
 0x232   : > { %v5493_v38 = vpop.permute.xlu1 %3750  ;;  %v5495_v31 = vpop.f32.mrb[29].mxu0  ;;  %v1820_v12 = vpack.c.bf16 %v1685_v15, %v1684_v1  ;;  %v1753_v25 = vsel %vm1634_vm3, %v1721_v63, %v3718_v24  ;;  %v3743_v1 = vunpack.i.h.bf16 %v5468_v58  ;;  %v3742_v15 = vunpack.i.l.bf16 %v5468_v58 }
 0x233   : > { %v5499_v42 = vpop.f32.mrb[30].mxu0  ;;  %v1785_v59 = vsel %vm1667_vm4, %v1753_v25, %v3738_v6  ;;  %v1622_v45 = vsel %vm1601_vm2, %v6166_v22, %v3708_v26  ;;  %v1723_v28 = vsel %vm1601_vm2, %v6168_v13, %v3747_v27  ;;  %v3752_v26 = vunpack.i.l.bf16 %v5493_v38 }
 0x234   : > { %v5503_v9 = vpop.f32.mrb[31].mxu0  ;;  %v3756_v4 = vpop.permute.xlu0 %3755  ;;  %v1827_v49 = vpack.c.bf16 %v1785_v59, %v1784_v52  ;;  %v1655_v58 = vsel %vm1634_vm3, %v1622_v45, %v3732_v32  ;;  %v3748_v52 = vunpack.i.h.bf16 %v5485_v54  ;;  %v6169_v54 = vld [vmem:[#allocation47_spill] sm:$0xff]  ;;  %v6170_v45 = vld [vmem:[#allocation48_spill] sm:$0xff] }
 0x235   : > { %v3758_v16 = vunpack.i.h.bf16 %v3756_v4  ;;  %v3757_v41 = vunpack.i.l.bf16 %v3756_v4  ;;  %v6167_v4 = vld [vmem:[#allocation34_spill] sm:$0xff]  ;;  %v1625_v22 = vsel %vm1601_vm2, %v6169_v54, %v3752_v26  ;;  %v6173_v54 = vld [vmem:[#allocation49_spill] sm:$0xff] }
 0x236   : > { %v5509_v23 = vpop.permute.xlu1 %3760  ;;  %v1722_v55 = vsel %vm1601_vm2, %v6167_v4, %v3713_v50  ;;  %v6172_v4 = vld [vmem:[#allocation37_spill] sm:$0xff] }
 0x237   : > { %v1754_v62 = vsel %vm1634_vm3, %v1722_v55, %v3757_v41  ;;  %v1755_v8 = vsel %vm1634_vm3, %v1723_v28, %v3758_v16  ;;  %v3763_v32 = vunpack.i.h.bf16 %v5509_v23  ;;  %v3762_v50 = vunpack.i.l.bf16 %v5509_v23 }
 0x238   : > { %2133 = vmatmul.mubr.bf16.gmra.mrb[48].mxu1 %v1820_v12  ;;  %v3766_v18 = vpop.permute.xlu0 %3765  ;;  %v6165_v12 = vld [vmem:[#allocation23_spill] sm:$0xff] }
 0x239   : > { %2140 = vmatprep.mubr.bf16.mxu1 %v1824_v2  ;;  %v5513_v11 = vpop.f32.mrb[32].mxu0  ;;  %v1623_v24 = vsel %vm1601_vm2, %v6165_v12, %v3712_v36  ;;  %v3768_v2 = vunpack.i.h.bf16 %v3766_v18  ;;  %v3767_v6 = vunpack.i.l.bf16 %v3766_v18  ;;  %v1688_v18 = vsel %vm1667_vm4, %v1655_v58, %v3742_v15 }
 0x23a   : > { %v5519_v21 = vpop.permute.xlu1 %3770  ;;  %v5521_v7 = vpop.f32.mrb[33].mxu0  ;;  %v1656_v34 = vsel %vm1634_vm3, %v1623_v24, %v3733_v53  ;;  %v3753_v36 = vunpack.i.h.bf16 %v5493_v38 }
 0x23b   : > { %v5525_v40 = vpop.f32.mrb[34].mxu0  ;;  %v1689_v19 = vsel %vm1667_vm4, %v1656_v34, %v3743_v1  ;;  %v1787_v25 = vsel %vm1667_vm4, %v1755_v8, %v3768_v2  ;;  %v3773_v1 = vunpack.i.h.bf16 %v5519_v21  ;;  %v3772_v16 = vunpack.i.l.bf16 %v5519_v21  ;;  %v6171_v34 = vld [vmem:[#allocation36_spill] sm:$0xff] }
 0x23c   : > { %v5531_v14 = vpop.f32.mrb[35].mxu0  ;;  %v5535_v56 = vpop.permute.xlu0 %3775  ;;  %v1826_v53 = vpack.c.bf16 %v1689_v19, %v1688_v18  ;;  %v1624_v2 = vsel %vm1601_vm2, %v6170_v45, %v3748_v52  ;;  %v1724_v58 = vsel %vm1601_vm2, %v6171_v34, %v3753_v36  ;;  %v3910_v18 = vld [vmem:[%s6009_s7] sm:$0xff]  }
 0x23d   : > { %v3777_v15 = vunpack.i.l.bf16 %v5535_v56  ;;  %v1657_v21 = vsel %vm1634_vm3, %v1624_v2, %v3762_v50  ;;  %v3778_v26 = vunpack.i.h.bf16 %v5535_v56  ;;  %3308 = vmatprep.subr.bf16.mxu0 %v3910_v18 }
 0x23e   : > { %v5541_v5 = vpop.permute.xlu1 %3780  ;;  %v1690_v8 = vsel %vm1667_vm4, %v1657_v21, %v3772_v16  ;;  %3309 = vmatpush3.bf16.msra.mxu0 %v3910_v18 }
 0x23f   : > { %v1725_v55 = vsel %vm1601_vm2, %v6172_v4, %v3777_v15  ;;  %v3782_v36 = vunpack.i.l.bf16 %v5541_v5 }
 0x240   : > { %2141 = vmatmul.mubr.bf16.gmra.mrb[52].mxu1 %v1823_v57  ;;  %v3786_v30 = vpop.permute.xlu0 %3785  ;;  %v1786_v57 = vsel %vm1667_vm4, %v1754_v62, %v3767_v6 }
 0x241   : > { %2148 = vmatprep.mubr.bf16.mxu1 %v1827_v49  ;;  %v3788_v41 = vunpack.i.h.bf16 %v3786_v30  ;;  %v3787_v49 = vunpack.i.l.bf16 %v3786_v30  ;;  %v1830_v12 = vpack.c.bf16 %v1787_v25, %v1786_v57  ;;  %v1658_v30 = vsel %vm1634_vm3, %v1625_v22, %v3763_v32  ;;  %v3911_v22 = vld [vmem:[%s6009_s7 + $0x8] sm:$0xff]  }
 0x242   : > { %v5556_v63 = vpop.permute.xlu1 %3790  ;;  %v1691_v57 = vsel %vm1667_vm4, %v1658_v30, %v3773_v1  ;;  %v1627_v56 = vsel %vm1601_vm2, %v6173_v54, %v3782_v36  ;;  %3310 = vmatprep.subr.bf16.mxu0 %v3911_v22 }
 0x243   : > { %v1756_v19 = vsel %vm1634_vm3, %v1724_v58, %v3787_v49  ;;  %v1757_v62 = vsel %vm1634_vm3, %v1725_v55, %v3788_v41  ;;  %v3793_v32 = vunpack.i.h.bf16 %v5556_v63  ;;  %v3792_v50 = vunpack.i.l.bf16 %v5556_v63  ;;  %3311 = vmatpush3.bf16.msra.mxu0 %v3911_v22  ;;  %v6177_v22 = vld [vmem:[#allocation51_spill] sm:$0xff] }
 0x244   : > { %v3796_v59 = vpop.permute.xlu0 %3795  ;;  %v1829_v49 = vpack.c.bf16 %v1691_v57, %v1690_v8  ;;  %v3783_v63 = vunpack.i.h.bf16 %v5541_v5 }
 0x245   : > { %v3798_v24 = vunpack.i.h.bf16 %v3796_v59  ;;  %v3797_v38 = vunpack.i.l.bf16 %v3796_v59  ;;  %v5576_v6 = vpop.f32.mrb[36].mxu0 }
 0x246   : > { %v3801_v27 = vpop.permute.xlu1 %3800  ;;  %v5586_v28 = vpop.f32.mrb[37].mxu0 }
 0x247   : > { %v5595_v25 = vpop.f32.mrb[38].mxu0  ;;  %v1788_v52 = vsel %vm1667_vm4, %v1756_v19, %v3797_v38  ;;  %v1789_v59 = vsel %vm1667_vm4, %v1757_v62, %v3798_v24  ;;  %v3803_v1 = vunpack.i.h.bf16 %v3801_v27  ;;  %v3802_v16 = vunpack.i.l.bf16 %v3801_v27  ;;  %v6174_v38 = vld [vmem:[#allocation50_spill] sm:$0xff] }
 0x248   : > { %2149 = vmatmul.mubr.bf16.gmra.mrb[56].mxu1 %v1826_v53  ;;  %v3806_v23 = vpop.permute.xlu0 %3805  ;;  %v5601_v53 = vpop.f32.mrb[39].mxu0  ;;  %v1626_v24 = vsel %vm1601_vm2, %v6174_v38, %v3778_v26  ;;  %v1660_v27 = vsel %vm1634_vm3, %v1627_v56, %v3793_v32  ;;  %v1726_v19 = vsel %vm1601_vm2, %v4764_v33, %v3783_v63 }
 0x249   : > { %2156 = vmatprep.mubr.bf16.mxu1 %v1830_v12  ;;  %v1833_v12 = vpack.c.bf16 %v1789_v59, %v1788_v52  ;;  %v1659_v45 = vsel %vm1634_vm3, %v1626_v24, %v3792_v50  ;;  %v3808_v34 = vunpack.i.h.bf16 %v3806_v23  ;;  %v1693_v30 = vsel %vm1667_vm4, %v1660_v27, %v3803_v1  ;;  %v6175_v52 = vld [vmem:[#allocation52_spill] sm:$0xff]  ;;  %v6176_v1 = vld [vmem:[#allocation38_spill] sm:$0xff] }
 0x24a   : > { %v5584_v13 = vpop.permute.xlu1 %3810  ;;  %v1692_v21 = vsel %vm1667_vm4, %v1659_v45, %v3802_v16  ;;  %v3807_v55 = vunpack.i.l.bf16 %v3806_v23 }
 0x24b   : > { %v3813_v62 = vunpack.i.h.bf16 %v5584_v13  ;;  %v1832_v57 = vpack.c.bf16 %v1693_v30, %v1692_v21  ;;  %v3812_v26 = vunpack.i.l.bf16 %v5584_v13  ;;  %v1628_v59 = vsel %vm1601_vm2, %v6175_v52, %v3808_v34 }
 0x24c   : > { %v3816_v15 = vpop.permute.xlu0 %3815  ;;  %v1727_v16 = vsel %vm1601_vm2, %v6176_v1, %v3807_v55 }
 0x24e   : > { %v3821_v41 = vpop.permute.xlu1 %3820  ;;  %v5619_v4 = vpop.f32.mrb[40].mxu0 }
 0x24f   : > { %v5621_v18 = vpop.f32.mrb[41].mxu0  ;;  %v3823_v54 = vunpack.i.h.bf16 %v3821_v41  ;;  %v3822_v56 = vunpack.i.l.bf16 %v3821_v41 }
 0x250   : > { %2157 = vmatmul.mubr.bf16.gmra.mrb[60].mxu1 %v1829_v49  ;;  %v3831_v2 = vpop.permute.xlu0 %3830  ;;  %v5623_v5 = vpop.f32.mrb[42].mxu0  ;;  %v3818_v49 = vunpack.i.h.bf16 %v3816_v15 }
 0x251   : > { %2164 = vmatprep.mubr.bf16.mxu1 %v1833_v12  ;;  %v5628_v36 = vpop.f32.mrb[43].mxu0  ;;  %v3817_v12 = vunpack.i.l.bf16 %v3816_v15  ;;  %v1661_v15 = vsel %vm1634_vm3, %v1628_v59, %v3812_v26  ;;  %v3832_v26 = vunpack.i.l.bf16 %v3831_v2 }
 0x252   : > { %v5615_v58 = vpop.permute.xlu1 %3825 }
 0x254   : > { %v3846_v8 = vpop.permute.xlu0 %3845 }
 0x255   : > { %v3848_v32 = vunpack.i.h.bf16 %v3846_v8  ;;  %v3847_v50 = vunpack.i.l.bf16 %v3846_v8 }
 0x256   : > { %v3836_v23 = vpop.permute.xlu1 %3835 }
 0x257   : > { %v3837_v33 = vunpack.i.l.bf16 %v3836_v23  ;;  %v1758_v38 = vsel %vm1634_vm3, %v1726_v19, %v3847_v50  ;;  %v1759_v24 = vsel %vm1634_vm3, %v1727_v16, %v3848_v32  ;;  %v3838_v13 = vunpack.i.h.bf16 %v3836_v23 }
 0x258   : > { %2165 = vmatmul.mubr.bf16.gmra.mrb[64].mxu1 %v1832_v57  ;;  %v3851_v45 = vpop.permute.xlu0 %3850  ;;  %v1790_v27 = vsel %vm1667_vm4, %v1758_v38, %v3817_v12  ;;  %v1791_v34 = vsel %vm1667_vm4, %v1759_v24, %v3818_v49  ;;  %v1694_v57 = vsel %vm1667_vm4, %v1661_v15, %v3822_v56  ;;  %v3827_v16 = vunpack.i.l.bf16 %v5615_v58 }
 0x259   : > { %v1629_v63 = vsel %vm1601_vm2, %v6177_v22, %v3837_v33  ;;  %v1836_v30 = vpack.c.bf16 %v1791_v34, %v1790_v27  ;;  %v1728_v19 = vsel %vm1601_vm2, %v4802_v43, %v3838_v13  ;;  %v3852_v52 = vunpack.i.l.bf16 %v3851_v45  ;;  %v6178_v33 = vld [vmem:[#allocation55_spill] sm:$0xff] }
 0x25a   : > { %v3841_v21 = vpop.permute.xlu1 %3840  ;;  %v1662_v41 = vsel %vm1634_vm3, %v1629_v63, %v3813_v62  ;;  %v3833_v49 = vunpack.i.h.bf16 %v3831_v2  ;;  %v3853_v59 = vunpack.i.h.bf16 %v3851_v45  ;;  %v1760_v38 = vsel %vm1634_vm3, %v1728_v19, %v3832_v26  ;;  %v6179_v45 = vld [vmem:[#allocation54_spill] sm:$0xff] }
 0x25b   : > { %v1695_v55 = vsel %vm1667_vm4, %v1662_v41, %v3823_v54  ;;  %2172 = vmatprep.mubr.bf16.mxu1 %v1836_v30  ;;  %v3843_v62 = vunpack.i.h.bf16 %v3841_v21  ;;  %v3842_v12 = vunpack.i.l.bf16 %v3841_v21  ;;  %v1792_v22 = vsel %vm1667_vm4, %v1760_v38, %v3852_v52  ;;  %v6180_v26 = vld [vmem:[#allocation14_spill] sm:$0xff] }
 0x25c   : > { %v3856_v8 = vpop.permute.xlu0 %3855  ;;  %v1835_v1 = vpack.c.bf16 %v1695_v55, %v1694_v57  ;;  %v1631_v27 = vsel %vm1601_vm2, %v6179_v45, %v3827_v16  ;;  %v3828_v15 = vunpack.i.h.bf16 %v5615_v58 }
 0x25d   : > { %v3858_v32 = vunpack.i.h.bf16 %v3856_v8  ;;  %v3857_v50 = vunpack.i.l.bf16 %v3856_v8 }
 0x25e   : > { %v1058_v23 = vpop.permute.xlu1 %1057  ;;  %v1730_v58 = vsel %vm1601_vm2, %v4798_v44, %v3828_v15  ;;  %v5682_v15 = vld [vmem:[%s6007_s5] ss:$0 sm:$0xff] }
 0x25f   : > { %v1630_v54 = vsel %vm1601_vm2, %v6178_v33, %v3858_v32  ;;  %v1729_v43 = vsel %vm1601_vm2, %v4804_v17, %v3857_v50  ;;  %v1664_v17 = vsel %vm1634_vm3, %v1631_v27, %v3843_v62  ;;  %v6181_v33 = vld [vmem:[#allocation11_spill] sm:$0xff] }
 0x260   : > { %2173 = vmatmul.mubr.bf16.gmra.mrb[68].mxu1 %v1835_v1  ;;  %v3861_v56 = vpop.permute.xlu0 %3860  ;;  %v1761_v24 = vsel %vm1634_vm3, %v1729_v43, %v3833_v49  ;;  %v1663_v63 = vsel %vm1634_vm3, %v1630_v54, %v3842_v12 }
 0x261   : > { %v1793_v2 = vsel %vm1667_vm4, %v1761_v24, %v3853_v59  ;;  %v3863_v8 = vunpack.i.h.bf16 %v3861_v56  ;;  %v3862_v57 = vunpack.i.l.bf16 %v3861_v56  ;;  %v1633_v59 = vsel %vm1601_vm2, %v6180_v26, %v1058_v23 }
 0x262   : > { %v3871_v13 = vpop.permute.xlu1 %3870  ;;  %v1839_v30 = vpack.c.bf16 %v1793_v2, %v1792_v22 }
 0x263   : > { %v3873_v34 = vunpack.i.h.bf16 %v3871_v13  ;;  %v3872_v21 = vunpack.i.l.bf16 %v3871_v13  ;;  %v1632_v54 = vsel %vm1601_vm2, %v6181_v33, %v3863_v8  ;;  %v1731_v43 = vsel %vm1601_vm2, %v4814_v48, %v3862_v57  ;;  %v5688_v8 = vld [vmem:[%s6008_s6] ss:$0 sm:$0xff]  ;;  %v5696_v33 = vpop.f32.mrb[44].mxu0 }
 0x264   : > { %v3866_v41 = vpop.permute.xlu0 %3865  ;;  %2180 = vmatprep.mubr.bf16.mxu1 %v1839_v30 }
 0x265   : > { %v1696_v55 = vsel %vm1667_vm4, %v1663_v63, %v3872_v21  ;;  %v1697_v19 = vsel %vm1667_vm4, %v1664_v17, %v3873_v34  ;;  %v3868_v16 = vunpack.i.h.bf16 %v3866_v41  ;;  %v3867_v49 = vunpack.i.l.bf16 %v3866_v41 }
 0x266   : > { %v3876_v52 = vpop.permute.xlu1 %3875  ;;  %v1838_v32 = vpack.c.bf16 %v1697_v19, %v1696_v55 }
 0x267   : > { %v3878_v50 = vunpack.i.h.bf16 %v3876_v52  ;;  %v3877_v1 = vunpack.i.l.bf16 %v3876_v52  ;;  %v1762_v23 = vsel %vm1634_vm3, %v1730_v58, %v3867_v49  ;;  %v1763_v22 = vsel %vm1634_vm3, %v1731_v43, %v3868_v16  ;;  %v5699_v43 = vpop.f32.mrb[45].mxu0 }
 0x268   : > { %2181 = vmatmul.mubr.bf16.gmra.mrb[72].mxu1 %v1838_v32  ;;  %v3881_v12 = vpop.permute.xlu0 %3880 }
 0x269   : > { %v1666_v62 = vsel %vm1634_vm3, %v1633_v59, %v3878_v50  ;;  %v3883_v38 = vunpack.i.h.bf16 %v3881_v12  ;;  %v3882_v24 = vunpack.i.l.bf16 %v3881_v12  ;;  %v1665_v13 = vsel %vm1634_vm3, %v1632_v54, %v3877_v1 }
 0x26a   : > { %v1281_v56 = vpop.permute.xlu1 %1280 }
 0x26b   : > { %v1699_v44 = vsel %vm1667_vm4, %v1666_v62, %v1281_v56  ;;  %v1794_v2 = vsel %vm1667_vm4, %v1762_v23, %v3882_v24  ;;  %v1795_v63 = vsel %vm1667_vm4, %v1763_v22, %v3882_v24  ;;  %v1698_v45 = vsel %vm1667_vm4, %v1665_v13, %v3883_v38 }
 0x26c   : > { %v1842_v27 = vpack.c.bf16 %v1795_v63, %v1794_v2  ;;  %v1841_v34 = vpack.c.bf16 %v1699_v44, %v1698_v45  ;;  %v5705_v44 = vpop.f32.mrb[46].mxu0 }
 0x26e   : > { %2188 = vmatprep.mubr.bf16.mxu1 %v1842_v27 }
 0x270   : > { %2189 = vmatmul.mubr.bf16.gmra.mrb[76].mxu1 %v1841_v34 }
 0x2a4   : > { %v3092_v48 = vpop.f32.mrb[16].mxu1 }
 0x2a5   : > { %v3093_v21 = vpop.f32.mrb[17].mxu1 }
 0x2a6   : > { %v3094_v30 = vadd.f32 %v3093_v21, %v3092_v48  ;;  %v3095_v17 = vpop.f32.mrb[18].mxu1 }
 0x2a7   : > { %v3096_v41 = vpop.f32.mrb[19].mxu1 }
 0x2a8   : > { %v2232_v55 = vadd.f32 %v3094_v30, %v5368_v37  ;;  %v3097_v19 = vadd.f32 %v3096_v41, %v3095_v17 }
 0x2aa   : > { %v2365_v57 = vmul.f32 %v5682_v15, %v2232_v55  ;;  %v2235_v52 = vadd.f32 %v3097_v19, %v5382_v35 }
 0x2ac   : > { %v2404_v32 = vadd.f32 %v5688_v8, %v2365_v57  ;;  %v2366_v50 = vmul.f32 %v5682_v15, %v2235_v52 }
 0x2ae   : > { %v2405_v1 = vadd.f32 %v5688_v8, %v2366_v50  ;;  %v2436_v16 = vmax.f32 %v2404_v32, 0.0 }
 0x2b0   : > { %v2437_v49 = vmax.f32 %v2405_v1, 0.0 }
 0x2b2   : > { %v2468_v26 = vpack.c.bf16 %v2437_v49, %v2436_v16 }
 0x2b4   : > { %3312 = vmatprep.mubr.msk.bf16.mxu0 %vm1601_vm2, %v2468_v26 }
 0x2bb   : > { %v3098_v37 = vpop.f32.mrb[20].mxu1 }
 0x2bc   : > { %v3099_v59 = vpop.f32.mrb[21].mxu1 }
 0x2bd   : > { %v3100_v58 = vadd.f32 %v3099_v59, %v3098_v37  ;;  %v3101_v62 = vpop.f32.mrb[22].mxu1 }
 0x2be   : > { %v3102_v12 = vpop.f32.mrb[23].mxu1 }
 0x2bf   : > { %v2240_v35 = vadd.f32 %v5366_v51, %v3100_v58  ;;  %v3103_v54 = vadd.f32 %v3102_v12, %v3101_v62  ;;  %v5708_v51 = vpop.f32.mrb[47].mxu0 }
 0x2c1   : > { %v2367_v56 = vmul.f32 %v5682_v15, %v2240_v35  ;;  %v2243_v38 = vadd.f32 %v5376_v0, %v3103_v54 }
 0x2c3   : > { %v2406_v24 = vadd.f32 %v5688_v8, %v2367_v56  ;;  %v2368_v13 = vmul.f32 %v5682_v15, %v2243_v38  ;;  %v3104_v23 = vpop.f32.mrb[24].mxu1 }
 0x2c4   : > { %v3105_v22 = vpop.f32.mrb[25].mxu1 }
 0x2c5   : > { %v2407_v2 = vadd.f32 %v5688_v8, %v2368_v13  ;;  %v3106_v63 = vadd.f32 %v3105_v22, %v3104_v23  ;;  %v3107_v45 = vpop.f32.mrb[26].mxu1  ;;  %v2438_v34 = vmax.f32 %v2406_v24, 0.0 }
 0x2c6   : > { %v3108_v27 = vpop.f32.mrb[27].mxu1 }
 0x2c7   : > { %v2439_v48 = vmax.f32 %v2407_v2, 0.0  ;;  %v2248_v21 = vadd.f32 %v3106_v63, %v5427_v60  ;;  %v3109_v0 = vadd.f32 %v3108_v27, %v3107_v45 }
 0x2c9   : > { %v2469_v30 = vpack.c.bf16 %v2439_v48, %v2438_v34  ;;  %v2369_v17 = vmul.f32 %v5682_v15, %v2248_v21  ;;  %v2251_v41 = vadd.f32 %v3109_v0, %v5434_v46 }
 0x2cb   : > { %v2408_v55 = vadd.f32 %v5688_v8, %v2369_v17  ;;  %v2370_v19 = vmul.f32 %v5682_v15, %v2251_v41  ;;  %3313 = vmatmul.mubr.msk.bf16.vlgmr.msra.gmra.mrb[48].mxu0 %vm1601_vm2, %v2469_v30 }
 0x2cd   : > { %v2409_v57 = vadd.f32 %v5688_v8, %v2370_v19  ;;  %v2440_v52 = vmax.f32 %v2408_v55, 0.0 }
 0x2cf   : > { %v2441_v32 = vmax.f32 %v2409_v57, 0.0 }
 0x2d1   : > { %v2470_v50 = vpack.c.bf16 %v2441_v32, %v2440_v52 }
 0x2d3   : > { %v3110_v1 = vpop.f32.mrb[28].mxu1  ;;  %3316 = vmatprep.mubr.msk.bf16.mxu0 %vm1601_vm2, %v2470_v50 }
 0x2d4   : > { %v3111_v60 = vpop.f32.mrb[29].mxu1 }
 0x2d5   : > { %v3112_v16 = vadd.f32 %v3111_v60, %v3110_v1  ;;  %v3113_v49 = vpop.f32.mrb[30].mxu1 }
 0x2d6   : > { %v3114_v26 = vpop.f32.mrb[31].mxu1 }
 0x2d7   : > { %v2256_v46 = vadd.f32 %v5421_v39, %v3112_v16  ;;  %v3115_v37 = vadd.f32 %v3114_v26, %v3113_v49 }
 0x2d9   : > { %v2371_v59 = vmul.f32 %v5682_v15, %v2256_v46  ;;  %v2259_v58 = vadd.f32 %v5429_v29, %v3115_v37 }
 0x2db   : > { %v2410_v62 = vadd.f32 %v5688_v8, %v2371_v59  ;;  %v2372_v12 = vmul.f32 %v5682_v15, %v2259_v58  ;;  %v3116_v35 = vpop.f32.mrb[32].mxu1 }
 0x2dc   : > { %v3117_v54 = vpop.f32.mrb[33].mxu1 }
 0x2dd   : > { %v2411_v56 = vadd.f32 %v5688_v8, %v2372_v12  ;;  %v3118_v38 = vadd.f32 %v3117_v54, %v3116_v35  ;;  %v3119_v24 = vpop.f32.mrb[34].mxu1  ;;  %v2442_v23 = vmax.f32 %v2410_v62, 0.0 }
 0x2de   : > { %v3120_v13 = vpop.f32.mrb[35].mxu1 }
 0x2df   : > { %v2443_v22 = vmax.f32 %v2411_v56, 0.0  ;;  %v2264_v39 = vadd.f32 %v3118_v38, %v5454_v47  ;;  %v3121_v2 = vadd.f32 %v3120_v13, %v3119_v24 }
 0x2e1   : > { %v2373_v63 = vmul.f32 %v5682_v15, %v2264_v39  ;;  %v2267_v29 = vadd.f32 %v3121_v2, %v5464_v3  ;;  %v2471_v45 = vpack.c.bf16 %v2443_v22, %v2442_v23 }
 0x2e3   : > { %v2412_v27 = vadd.f32 %v5688_v8, %v2373_v63  ;;  %v2374_v34 = vmul.f32 %v5682_v15, %v2267_v29  ;;  %3317 = vmatmul.mubr.msk.bf16.gmra.mrb[52].mxu0 %vm1601_vm2, %v2471_v45 }
 0x2e5   : > { %v2413_v48 = vadd.f32 %v5688_v8, %v2374_v34  ;;  %v2444_v21 = vmax.f32 %v2412_v27, 0.0 }
 0x2e7   : > { %v2445_v0 = vmax.f32 %v2413_v48, 0.0 }
 0x2e9   : > { %v2472_v30 = vpack.c.bf16 %v2445_v0, %v2444_v21 }
 0x2eb   : > { %3320 = vmatprep.mubr.msk.bf16.mxu0 %vm1601_vm2, %v2472_v30 }
 0x2ef   : > { %v3122_v47 = vpop.f32.mrb[36].mxu1 }
 0x2f0   : > { %v3123_v17 = vpop.f32.mrb[37].mxu1 }
 0x2f1   : > { %v3124_v41 = vadd.f32 %v3123_v17, %v3122_v47  ;;  %v3125_v55 = vpop.f32.mrb[38].mxu1 }
 0x2f2   : > { %v3126_v19 = vpop.f32.mrb[39].mxu1 }
 0x2f3   : > { %v2272_v3 = vadd.f32 %v5450_v10, %v3124_v41  ;;  %v3127_v57 = vadd.f32 %v3126_v19, %v3125_v55 }
 0x2f5   : > { %v2375_v52 = vmul.f32 %v5682_v15, %v2272_v3  ;;  %v2275_v32 = vadd.f32 %v5460_v61, %v3127_v57 }
 0x2f7   : > { %v2414_v50 = vadd.f32 %v5688_v8, %v2375_v52  ;;  %v2376_v1 = vmul.f32 %v5682_v15, %v2275_v32 }
 0x2f9   : > { %v2415_v60 = vadd.f32 %v5688_v8, %v2376_v1  ;;  %v2446_v49 = vmax.f32 %v2414_v50, 0.0 }
 0x2fb   : > { %v3128_v16 = vpop.f32.mrb[40].mxu1  ;;  %v2447_v26 = vmax.f32 %v2415_v60, 0.0 }
 0x2fc   : > { %v3129_v46 = vpop.f32.mrb[41].mxu1 }
 0x2fd   : > { %v3130_v37 = vadd.f32 %v3129_v46, %v3128_v16  ;;  %v3131_v59 = vpop.f32.mrb[42].mxu1  ;;  %v2473_v62 = vpack.c.bf16 %v2447_v26, %v2446_v49 }
 0x2fe   : > { %v3132_v58 = vpop.f32.mrb[43].mxu1 }
 0x2ff   : > { %v2280_v10 = vadd.f32 %v3130_v37, %v5495_v31  ;;  %v3133_v12 = vadd.f32 %v3132_v58, %v3131_v59  ;;  %3321 = vmatmul.mubr.msk.bf16.gmra.mrb[56].mxu0 %vm1601_vm2, %v2473_v62 }
 0x301   : > { %v2377_v61 = vmul.f32 %v5682_v15, %v2280_v10  ;;  %v2283_v35 = vadd.f32 %v3133_v12, %v5503_v9 }
 0x303   : > { %v2416_v54 = vadd.f32 %v5688_v8, %v2377_v61  ;;  %v2378_v56 = vmul.f32 %v5682_v15, %v2283_v35  ;;  %v3134_v38 = vpop.f32.mrb[44].mxu1 }
 0x304   : > { %v3135_v24 = vpop.f32.mrb[45].mxu1 }
 0x305   : > { %v2417_v13 = vadd.f32 %v5688_v8, %v2378_v56  ;;  %v3136_v23 = vadd.f32 %v3135_v24, %v3134_v38  ;;  %v3137_v22 = vpop.f32.mrb[46].mxu1  ;;  %v2448_v2 = vmax.f32 %v2416_v54, 0.0 }
 0x306   : > { %v3138_v39 = vpop.f32.mrb[47].mxu1 }
 0x307   : > { %v2449_v31 = vmax.f32 %v2417_v13, 0.0  ;;  %v2288_v63 = vadd.f32 %v5487_v20, %v3136_v23  ;;  %v3139_v29 = vadd.f32 %v3138_v39, %v3137_v22 }
 0x309   : > { %v2379_v45 = vmul.f32 %v5682_v15, %v2288_v63  ;;  %v2291_v9 = vadd.f32 %v5499_v42, %v3139_v29  ;;  %v2474_v27 = vpack.c.bf16 %v2449_v31, %v2448_v2 }
 0x30b   : > { %v2418_v34 = vadd.f32 %v5688_v8, %v2379_v45  ;;  %v2380_v48 = vmul.f32 %v5682_v15, %v2291_v9  ;;  %v3140_v21 = vpop.f32.mrb[48].mxu1  ;;  %3324 = vmatprep.mubr.msk.bf16.mxu0 %vm1601_vm2, %v2474_v27 }
 0x30c   : > { %v3141_v0 = vpop.f32.mrb[49].mxu1 }
 0x30d   : > { %v2419_v30 = vadd.f32 %v5688_v8, %v2380_v48  ;;  %v3142_v47 = vadd.f32 %v3141_v0, %v3140_v21  ;;  %v3143_v17 = vpop.f32.mrb[50].mxu1  ;;  %v2450_v20 = vmax.f32 %v2418_v34, 0.0 }
 0x30e   : > { %v3144_v41 = vpop.f32.mrb[51].mxu1 }
 0x30f   : > { %v2451_v55 = vmax.f32 %v2419_v30, 0.0  ;;  %v2296_v19 = vadd.f32 %v3142_v47, %v5521_v7  ;;  %v3145_v3 = vadd.f32 %v3144_v41, %v3143_v17 }
 0x311   : > { %v2381_v42 = vmul.f32 %v5682_v15, %v2296_v19  ;;  %v2299_v57 = vadd.f32 %v3145_v3, %v5531_v14  ;;  %v2475_v52 = vpack.c.bf16 %v2451_v55, %v2450_v20 }
 0x313   : > { %v2420_v32 = vadd.f32 %v5688_v8, %v2381_v42  ;;  %v2382_v50 = vmul.f32 %v5682_v15, %v2299_v57  ;;  %v3146_v1 = vpop.f32.mrb[52].mxu1  ;;  %3325 = vmatmul.mubr.msk.bf16.gmra.mrb[60].mxu0 %vm1601_vm2, %v2475_v52 }
 0x314   : > { %v3147_v60 = vpop.f32.mrb[53].mxu1 }
 0x315   : > { %v2421_v16 = vadd.f32 %v5688_v8, %v2382_v50  ;;  %v3148_v49 = vadd.f32 %v3147_v60, %v3146_v1  ;;  %v3149_v26 = vpop.f32.mrb[54].mxu1  ;;  %v2452_v7 = vmax.f32 %v2420_v32, 0.0 }
 0x316   : > { %v3150_v46 = vpop.f32.mrb[55].mxu1 }
 0x317   : > { %v2453_v37 = vmax.f32 %v2421_v16, 0.0  ;;  %v2304_v59 = vadd.f32 %v5513_v11, %v3148_v49  ;;  %v3151_v58 = vadd.f32 %v3150_v46, %v3149_v26 }
 0x319   : > { %v2383_v14 = vmul.f32 %v5682_v15, %v2304_v59  ;;  %v2307_v62 = vadd.f32 %v5525_v40, %v3151_v58  ;;  %v2476_v10 = vpack.c.bf16 %v2453_v37, %v2452_v7 }
 0x31b   : > { %v2422_v12 = vadd.f32 %v5688_v8, %v2383_v14  ;;  %v2384_v61 = vmul.f32 %v5682_v15, %v2307_v62  ;;  %v3152_v35 = vpop.f32.mrb[56].mxu1  ;;  %3328 = vmatprep.mubr.msk.bf16.mxu0 %vm1601_vm2, %v2476_v10 }
 0x31c   : > { %v3153_v54 = vpop.f32.mrb[57].mxu1 }
 0x31d   : > { %v2423_v56 = vadd.f32 %v5688_v8, %v2384_v61  ;;  %v3154_v38 = vadd.f32 %v3153_v54, %v3152_v35  ;;  %v3155_v24 = vpop.f32.mrb[58].mxu1  ;;  %v2454_v11 = vmax.f32 %v2422_v12, 0.0 }
 0x31e   : > { %v3156_v13 = vpop.f32.mrb[59].mxu1 }
 0x31f   : > { %v2455_v23 = vmax.f32 %v2423_v56, 0.0  ;;  %v2312_v22 = vadd.f32 %v3154_v38, %v5586_v28  ;;  %v3157_v39 = vadd.f32 %v3156_v13, %v3155_v24 }
 0x321   : > { %v2385_v40 = vmul.f32 %v5682_v15, %v2312_v22  ;;  %v2315_v2 = vadd.f32 %v3157_v39, %v5601_v53  ;;  %v2477_v31 = vpack.c.bf16 %v2455_v23, %v2454_v11 }
 0x323   : > { %v2424_v63 = vadd.f32 %v5688_v8, %v2385_v40  ;;  %v2386_v29 = vmul.f32 %v5682_v15, %v2315_v2  ;;  %v3158_v45 = vpop.f32.mrb[60].mxu1  ;;  %3329 = vmatmul.mubr.msk.bf16.gmra.mrb[64].mxu0 %vm1601_vm2, %v2477_v31 }
 0x324   : > { %v3159_v9 = vpop.f32.mrb[61].mxu1 }
 0x325   : > { %v2425_v27 = vadd.f32 %v5688_v8, %v2386_v29  ;;  %v3160_v34 = vadd.f32 %v3159_v9, %v3158_v45  ;;  %v3161_v48 = vpop.f32.mrb[62].mxu1  ;;  %v2456_v28 = vmax.f32 %v2424_v63, 0.0 }
 0x326   : > { %v3162_v21 = vpop.f32.mrb[63].mxu1 }
 0x327   : > { %v2457_v0 = vmax.f32 %v2425_v27, 0.0  ;;  %v2320_v30 = vadd.f32 %v5576_v6, %v3160_v34  ;;  %v3163_v47 = vadd.f32 %v3162_v21, %v3161_v48 }
 0x329   : > { %v2387_v53 = vmul.f32 %v5682_v15, %v2320_v30  ;;  %v2323_v17 = vadd.f32 %v5595_v25, %v3163_v47  ;;  %v2478_v41 = vpack.c.bf16 %v2457_v0, %v2456_v28 }
 0x32b   : > { %v2426_v20 = vadd.f32 %v5688_v8, %v2387_v53  ;;  %v2388_v55 = vmul.f32 %v5682_v15, %v2323_v17  ;;  %v3164_v19 = vpop.f32.mrb[64].mxu1  ;;  %3332 = vmatprep.mubr.msk.bf16.mxu0 %vm1601_vm2, %v2478_v41 }
 0x32c   : > { %v3165_v3 = vpop.f32.mrb[65].mxu1 }
 0x32d   : > { %v2427_v42 = vadd.f32 %v5688_v8, %v2388_v55  ;;  %v3166_v57 = vadd.f32 %v3165_v3, %v3164_v19  ;;  %v3167_v52 = vpop.f32.mrb[66].mxu1  ;;  %v2458_v6 = vmax.f32 %v2426_v20, 0.0 }
 0x32e   : > { %v3168_v32 = vpop.f32.mrb[67].mxu1 }
 0x32f   : > { %v2459_v50 = vmax.f32 %v2427_v42, 0.0  ;;  %v2328_v1 = vadd.f32 %v3166_v57, %v5621_v18  ;;  %v3169_v60 = vadd.f32 %v3168_v32, %v3167_v52 }
 0x331   : > { %v2389_v25 = vmul.f32 %v5682_v15, %v2328_v1  ;;  %v2331_v16 = vadd.f32 %v3169_v60, %v5628_v36  ;;  %v2479_v49 = vpack.c.bf16 %v2459_v50, %v2458_v6 }
 0x333   : > { %v2428_v26 = vadd.f32 %v5688_v8, %v2389_v25  ;;  %v2390_v46 = vmul.f32 %v5682_v15, %v2331_v16  ;;  %v3170_v7 = vpop.f32.mrb[68].mxu1  ;;  %3333 = vmatmul.mubr.msk.bf16.gmra.mrb[68].mxu0 %vm1601_vm2, %v2479_v49  ;;  %v3912_v49 = vld [vmem:[%s4217_s23 + $0x10] sm:$0xff] }
 0x334   : > { %v3171_v37 = vpop.f32.mrb[69].mxu1 }
 0x335   : > { %v2429_v59 = vadd.f32 %v5688_v8, %v2390_v46  ;;  %v3172_v58 = vadd.f32 %v3171_v37, %v3170_v7  ;;  %v3173_v14 = vpop.f32.mrb[70].mxu1  ;;  %v2460_v18 = vmax.f32 %v2428_v26, 0.0  ;;  %v3913_v7 = vld [vmem:[%s4217_s23] sm:$0xff] }
 0x336   : > { %v3174_v62 = vpop.f32.mrb[71].mxu1 }
 0x337   : > { %v2461_v10 = vmax.f32 %v2429_v59, 0.0  ;;  %v2336_v12 = vadd.f32 %v5619_v4, %v3172_v58  ;;  %v3175_v61 = vadd.f32 %v3174_v62, %v3173_v14  ;;  %v3914_v14 = vld [vmem:[%s4217_s23 + $0x18] sm:$0xff] }
 0x339   : > { %v2391_v36 = vmul.f32 %v5682_v15, %v2336_v12  ;;  %v2339_v35 = vadd.f32 %v5623_v5, %v3175_v61  ;;  %v2480_v54 = vpack.c.bf16 %v2461_v10, %v2460_v18  ;;  %v3915_v10 = vld [vmem:[%s4217_s23 + $0x8] sm:$0xff] }
 0x33b   : > { %v2430_v56 = vadd.f32 %v5688_v8, %v2391_v36  ;;  %v2392_v38 = vmul.f32 %v5682_v15, %v2339_v35  ;;  %v3176_v24 = vpop.f32.mrb[72].mxu1  ;;  %3336 = vmatprep.mubr.msk.bf16.mxu0 %vm1601_vm2, %v2480_v54 }
 0x33c   : > { %v3177_v13 = vpop.f32.mrb[73].mxu1 }
 0x33d   : > { %v2431_v11 = vadd.f32 %v5688_v8, %v2392_v38  ;;  %v3178_v23 = vadd.f32 %v3177_v13, %v3176_v24  ;;  %v3179_v22 = vpop.f32.mrb[74].mxu1  ;;  %v2462_v4 = vmax.f32 %v2430_v56, 0.0 }
 0x33e   : > { %v3180_v39 = vpop.f32.mrb[75].mxu1 }
 0x33f   : > { %v2463_v40 = vmax.f32 %v2431_v11, 0.0  ;;  %v3181_v2 = vadd.f32 %v3180_v39, %v3179_v22  ;;  %v2344_v31 = vadd.f32 %v3178_v23, %v5699_v43 }
 0x341   : > { %v2393_v5 = vmul.f32 %v5682_v15, %v2344_v31  ;;  %v2347_v63 = vadd.f32 %v3181_v2, %v5708_v51  ;;  %v2481_v29 = vpack.c.bf16 %v2463_v40, %v2462_v4  ;;  %v3916_v4 = vld [vmem:[%s4217_s23 + $0x30] sm:$0xff]  ;;  %v3917_v31 = vld [vmem:[%s4217_s23 + $0x20] sm:$0xff] }
 0x343   : > { %v2432_v45 = vadd.f32 %v5688_v8, %v2393_v5  ;;  %v2394_v9 = vmul.f32 %v5682_v15, %v2347_v63  ;;  %3337 = vmatmul.mubr.msk.bf16.gmra.mrb[72].mxu0 %vm1601_vm2, %v2481_v29  ;;  %v3182_v27 = vpop.f32.mrb[76].mxu1 }
 0x344   : > { %v3183_v34 = vpop.f32.mrb[77].mxu1 }
 0x345   : > { %v2433_v48 = vadd.f32 %v5688_v8, %v2394_v9  ;;  %v3184_v21 = vadd.f32 %v3183_v34, %v3182_v27  ;;  %v3185_v28 = vpop.f32.mrb[78].mxu1  ;;  %v2464_v30 = vmax.f32 %v2432_v45, 0.0  ;;  %v3918_v45 = vld [vmem:[%s4217_s23 + $0x38] sm:$0xff]  ;;  %v3919_v34 = vld [vmem:[%s4217_s23 + $0x28] sm:$0xff] }
 0x346   : > { %v3186_v0 = vpop.f32.mrb[79].mxu1 }
 0x347   : > { %v2465_v43 = vmax.f32 %v2433_v48, 0.0  ;;  %v2352_v47 = vadd.f32 %v5696_v33, %v3184_v21  ;;  %v3187_v53 = vadd.f32 %v3186_v0, %v3185_v28  ;;  %v5812_v33 = vld [vmem:[%s6010_s8] ss:$0 sm:$0xff] }
 0x349   : > { %v2482_v51 = vpack.c.bf16 %v2465_v43, %v2464_v30  ;;  %v2395_v17 = vmul.f32 %v5682_v15, %v2352_v47  ;;  %v2355_v41 = vadd.f32 %v5705_v44, %v3187_v53 }
 0x34b   : > { %v2434_v20 = vadd.f32 %v5688_v8, %v2395_v17  ;;  %v2396_v55 = vmul.f32 %v5682_v15, %v2355_v41  ;;  %3340 = vmatprep.mubr.msk.bf16.mxu0 %vm1601_vm2, %v2482_v51  ;;  %v5817_v15 = vld [vmem:[%s6011_s9] ss:$0 sm:$0xff] }
 0x34d   : > { %v2435_v19 = vadd.f32 %v5688_v8, %v2396_v55  ;;  %v2466_v3 = vmax.f32 %v2434_v20, 0.0 }
 0x34f   : > { %v2467_v42 = vmax.f32 %v2435_v19, 0.0  ;;  %v3920_v19 = vld [vmem:[%s4217_s23 + $0x50] sm:$0xff] }
 0x351   : > { %v2483_v57 = vpack.c.bf16 %v2467_v42, %v2466_v3 }
 0x353   : > { %3341 = vmatmul.mubr.msk.bf16.gmra.mrb[76].mxu0 %vm1601_vm2, %v2483_v57  ;;  %v3921_v57 = vld [vmem:[%s4217_s23 + $0x40] sm:$0xff] }
 0x39e   : > { %v3314_v44 = vpop.f32.mrb[48].mxu0 }
 0x39f   : > { %v2718_v8 = vmul.f32 %v3314_v44, %v5812_v33  ;;  %v2582_v52 = vpop.f32.mrb[49].mxu0 }
 0x3a0   : > { %v2716_v32 = vmul.f32 %v5812_v33, %v2582_v52  ;;  %v3315_v6 = vpop.f32.mrb[50].mxu0 }
 0x3a1   : > { %v2757_v50 = vadd.f32 %v5817_v15, %v2718_v8  ;;  %v2719_v1 = vmul.f32 %v3315_v6, %v5812_v33  ;;  %v2585_v60 = vpop.f32.mrb[51].mxu0 }
 0x3a2   : > { %v2755_v25 = vadd.f32 %v5817_v15, %v2716_v32  ;;  %v2717_v16 = vmul.f32 %v5812_v33, %v2585_v60  ;;  %v3922_v32 = vld [vmem:[%s4217_s23 + $0x58] sm:$0xff] }
 0x3a3   : > { %v2789_v26 = vadd.f32 %v3912_v49, %v2757_v50  ;;  %v2758_v46 = vadd.f32 %v5817_v15, %v2719_v1  ;;  %v3923_v1 = vld [vmem:[%s4217_s23 + $0x48] sm:$0xff] }
 0x3a4   : > { %v2787_v37 = vadd.f32 %v3913_v7, %v2755_v25  ;;  %v2756_v59 = vadd.f32 %v5817_v15, %v2717_v16 }
 0x3a5   : > { %v2821_v58 = vmax.f32 %v2789_v26, 0.0  ;;  %v2790_v62 = vadd.f32 %v3914_v14, %v2758_v46 }
 0x3a6   : > { %v2819_v18 = vmax.f32 %v2787_v37, 0.0  ;;  %v2788_v12 = vadd.f32 %v3915_v10, %v2756_v59  ;;  %v3924_v10 = vld [vmem:[%s4217_s23 + $0x70] sm:$0xff] }
 0x3a7   : > { %2853 = vst [vmem:[%s5833_s28 + $0x10] sm:$0xff] %v2821_v58  ;;  %v2822_v61 = vmax.f32 %v2790_v62, 0.0 }
 0x3a8   : > { %2851 = vst [vmem:[%s5833_s28] sm:$0xff] %v2819_v18  ;;  %v2820_v36 = vmax.f32 %v2788_v12, 0.0 }
 0x3a9   : > { %2854 = vst [vmem:[%s5833_s28 + $0x18] sm:$0xff] %v2822_v61 }
 0x3aa   : > { %2852 = vst [vmem:[%s5833_s28 + $0x8] sm:$0xff] %v2820_v36  ;;  %v3925_v36 = vld [vmem:[%s4217_s23 + $0x60] sm:$0xff] }
 0x3b6   : > { %v3318_v35 = vpop.f32.mrb[52].mxu0 }
 0x3b7   : > { %v2722_v54 = vmul.f32 %v3318_v35, %v5812_v33  ;;  %v2598_v56 = vpop.f32.mrb[53].mxu0 }
 0x3b8   : > { %v2720_v38 = vmul.f32 %v5812_v33, %v2598_v56  ;;  %v3319_v24 = vpop.f32.mrb[54].mxu0 }
 0x3b9   : > { %v2761_v13 = vadd.f32 %v5817_v15, %v2722_v54  ;;  %v2723_v11 = vmul.f32 %v3319_v24, %v5812_v33  ;;  %v2601_v23 = vpop.f32.mrb[55].mxu0 }
 0x3ba   : > { %v2759_v22 = vadd.f32 %v5817_v15, %v2720_v38  ;;  %v2721_v39 = vmul.f32 %v5812_v33, %v2601_v23  ;;  %v3926_v38 = vld [vmem:[%s4217_s23 + $0x78] sm:$0xff] }
 0x3bb   : > { %v2793_v40 = vadd.f32 %v3916_v4, %v2761_v13  ;;  %v2762_v2 = vadd.f32 %v5817_v15, %v2723_v11  ;;  %v3927_v11 = vld [vmem:[%s4217_s23 + $0x68] sm:$0xff] }
 0x3bc   : > { %v2791_v5 = vadd.f32 %v3917_v31, %v2759_v22  ;;  %v2760_v63 = vadd.f32 %v5817_v15, %v2721_v39 }
 0x3bd   : > { %v2825_v29 = vmax.f32 %v2793_v40, 0.0  ;;  %v2794_v9 = vadd.f32 %v3918_v45, %v2762_v2 }
 0x3be   : > { %v2823_v27 = vmax.f32 %v2791_v5, 0.0  ;;  %v2792_v48 = vadd.f32 %v3919_v34, %v2760_v63  ;;  %v3928_v34 = vld [vmem:[%s4217_s23 + $0x90] sm:$0xff] }
 0x3bf   : > { %2857 = vst [vmem:[%s5833_s28 + $0x30] sm:$0xff] %v2825_v29  ;;  %v2826_v21 = vmax.f32 %v2794_v9, 0.0 }
 0x3c0   : > { %2855 = vst [vmem:[%s5833_s28 + $0x20] sm:$0xff] %v2823_v27  ;;  %v2824_v28 = vmax.f32 %v2792_v48, 0.0 }
 0x3c1   : > { %2858 = vst [vmem:[%s5833_s28 + $0x38] sm:$0xff] %v2826_v21 }
 0x3c2   : > { %2856 = vst [vmem:[%s5833_s28 + $0x28] sm:$0xff] %v2824_v28  ;;  %v3929_v28 = vld [vmem:[%s4217_s23 + $0x80] sm:$0xff] }
 0x3d2   : > { %v3322_v0 = vpop.f32.mrb[56].mxu0 }
 0x3d3   : > { %v2726_v30 = vmul.f32 %v3322_v0, %v5812_v33  ;;  %v2614_v43 = vpop.f32.mrb[57].mxu0 }
 0x3d4   : > { %v2724_v47 = vmul.f32 %v5812_v33, %v2614_v43  ;;  %v3323_v53 = vpop.f32.mrb[58].mxu0 }
 0x3d5   : > { %v2765_v51 = vadd.f32 %v5817_v15, %v2726_v30  ;;  %v2727_v17 = vmul.f32 %v3323_v53, %v5812_v33  ;;  %v2617_v41 = vpop.f32.mrb[59].mxu0 }
 0x3d6   : > { %v2763_v20 = vadd.f32 %v5817_v15, %v2724_v47  ;;  %v2725_v55 = vmul.f32 %v5812_v33, %v2617_v41  ;;  %v3930_v47 = vld [vmem:[%s4217_s23 + $0x98] sm:$0xff] }
 0x3d7   : > { %v2797_v3 = vadd.f32 %v3920_v19, %v2765_v51  ;;  %v2766_v42 = vadd.f32 %v5817_v15, %v2727_v17  ;;  %v3931_v17 = vld [vmem:[%s4217_s23 + $0x88] sm:$0xff] }
 0x3d8   : > { %v2795_v44 = vadd.f32 %v3921_v57, %v2763_v20  ;;  %v2764_v8 = vadd.f32 %v5817_v15, %v2725_v55 }
 0x3d9   : > { %v2829_v52 = vmax.f32 %v2797_v3, 0.0  ;;  %v2798_v6 = vadd.f32 %v3922_v32, %v2766_v42 }
 0x3da   : > { %v2827_v50 = vmax.f32 %v2795_v44, 0.0  ;;  %v2796_v60 = vadd.f32 %v3923_v1, %v2764_v8  ;;  %v3932_v1 = vld [vmem:[%s4217_s23 + $0xb0] sm:$0xff] }
 0x3db   : > { %2861 = vst [vmem:[%s5833_s28 + $0x50] sm:$0xff] %v2829_v52  ;;  %v2830_v25 = vmax.f32 %v2798_v6, 0.0 }
 0x3dc   : > { %2859 = vst [vmem:[%s5833_s28 + $0x40] sm:$0xff] %v2827_v50  ;;  %v2828_v16 = vmax.f32 %v2796_v60, 0.0 }
 0x3dd   : > { %2862 = vst [vmem:[%s5833_s28 + $0x58] sm:$0xff] %v2830_v25 }
 0x3de   : > { %2860 = vst [vmem:[%s5833_s28 + $0x48] sm:$0xff] %v2828_v16  ;;  %v3933_v16 = vld [vmem:[%s4217_s23 + $0xa0] sm:$0xff] }
 0x3e6   : > { %v3326_v49 = vpop.f32.mrb[60].mxu0 }
 0x3e7   : > { %v2730_v26 = vmul.f32 %v3326_v49, %v5812_v33  ;;  %v2630_v46 = vpop.f32.mrb[61].mxu0 }
 0x3e8   : > { %v2728_v7 = vmul.f32 %v5812_v33, %v2630_v46  ;;  %v3327_v37 = vpop.f32.mrb[62].mxu0 }
 0x3e9   : > { %v2769_v59 = vadd.f32 %v5817_v15, %v2730_v26  ;;  %v2731_v58 = vmul.f32 %v3327_v37, %v5812_v33  ;;  %v2633_v14 = vpop.f32.mrb[63].mxu0 }
 0x3ea   : > { %v2767_v62 = vadd.f32 %v5817_v15, %v2728_v7  ;;  %v2729_v18 = vmul.f32 %v5812_v33, %v2633_v14  ;;  %v3934_v7 = vld [vmem:[%s4217_s23 + $0xb8] sm:$0xff] }
 0x3eb   : > { %v2801_v12 = vadd.f32 %v3924_v10, %v2769_v59  ;;  %v2770_v61 = vadd.f32 %v5817_v15, %v2731_v58  ;;  %v3935_v58 = vld [vmem:[%s4217_s23 + $0xa8] sm:$0xff] }
 0x3ec   : > { %v2799_v35 = vadd.f32 %v3925_v36, %v2767_v62  ;;  %v2768_v54 = vadd.f32 %v5817_v15, %v2729_v18 }
 0x3ed   : > { %v2833_v56 = vmax.f32 %v2801_v12, 0.0  ;;  %v2802_v24 = vadd.f32 %v3926_v38, %v2770_v61 }
 0x3ee   : > { %v2831_v13 = vmax.f32 %v2799_v35, 0.0  ;;  %v2800_v23 = vadd.f32 %v3927_v11, %v2768_v54  ;;  %v3936_v11 = vld [vmem:[%s4217_s23 + $0xd0] sm:$0xff] }
 0x3ef   : > { %2865 = vst [vmem:[%s5833_s28 + $0x70] sm:$0xff] %v2833_v56  ;;  %v2834_v22 = vmax.f32 %v2802_v24, 0.0 }
 0x3f0   : > { %2863 = vst [vmem:[%s5833_s28 + $0x60] sm:$0xff] %v2831_v13  ;;  %v2832_v39 = vmax.f32 %v2800_v23, 0.0 }
 0x3f1   : > { %2866 = vst [vmem:[%s5833_s28 + $0x78] sm:$0xff] %v2834_v22 }
 0x3f2   : > { %2864 = vst [vmem:[%s5833_s28 + $0x68] sm:$0xff] %v2832_v39  ;;  %v3937_v39 = vld [vmem:[%s4217_s23 + $0xc0] sm:$0xff] }
 0x3f6   : > { %v3330_v4 = vpop.f32.mrb[64].mxu0 }
 0x3f7   : > { %v2734_v40 = vmul.f32 %v3330_v4, %v5812_v33  ;;  %v2646_v2 = vpop.f32.mrb[65].mxu0 }
 0x3f8   : > { %v2732_v31 = vmul.f32 %v5812_v33, %v2646_v2  ;;  %v3331_v5 = vpop.f32.mrb[66].mxu0 }
 0x3f9   : > { %v2773_v63 = vadd.f32 %v5817_v15, %v2734_v40  ;;  %v2735_v29 = vmul.f32 %v3331_v5, %v5812_v33  ;;  %v2649_v45 = vpop.f32.mrb[67].mxu0 }
 0x3fa   : > { %v2771_v9 = vadd.f32 %v5817_v15, %v2732_v31  ;;  %v2733_v27 = vmul.f32 %v5812_v33, %v2649_v45  ;;  %v3938_v31 = vld [vmem:[%s4217_s23 + $0xd8] sm:$0xff] }
 0x3fb   : > { %v2805_v48 = vadd.f32 %v3928_v34, %v2773_v63  ;;  %v2774_v21 = vadd.f32 %v5817_v15, %v2735_v29  ;;  %v3939_v29 = vld [vmem:[%s4217_s23 + $0xc8] sm:$0xff] }
 0x3fc   : > { %v2803_v0 = vadd.f32 %v3929_v28, %v2771_v9  ;;  %v2772_v30 = vadd.f32 %v5817_v15, %v2733_v27 }
 0x3fd   : > { %v2837_v43 = vmax.f32 %v2805_v48, 0.0  ;;  %v2806_v53 = vadd.f32 %v3930_v47, %v2774_v21 }
 0x3fe   : > { %v2835_v51 = vmax.f32 %v2803_v0, 0.0  ;;  %v2804_v41 = vadd.f32 %v3931_v17, %v2772_v30  ;;  %v3940_v17 = vld [vmem:[%s4217_s23 + $0xf0] sm:$0xff] }
 0x3ff   : > { %2869 = vst [vmem:[%s5833_s28 + $0x90] sm:$0xff] %v2837_v43  ;;  %v2838_v20 = vmax.f32 %v2806_v53, 0.0 }
 0x400   : > { %2867 = vst [vmem:[%s5833_s28 + $0x80] sm:$0xff] %v2835_v51  ;;  %v2836_v55 = vmax.f32 %v2804_v41, 0.0 }
 0x401   : > { %2870 = vst [vmem:[%s5833_s28 + $0x98] sm:$0xff] %v2838_v20 }
 0x402   : > { %2868 = vst [vmem:[%s5833_s28 + $0x88] sm:$0xff] %v2836_v55  ;;  %v3941_v55 = vld [vmem:[%s4217_s23 + $0xe0] sm:$0xff] }
 0x406   : > { %v3334_v19 = vpop.f32.mrb[68].mxu0 }
 0x407   : > { %v2738_v3 = vmul.f32 %v3334_v19, %v5812_v33  ;;  %v2662_v42 = vpop.f32.mrb[69].mxu0 }
 0x408   : > { %v2736_v57 = vmul.f32 %v5812_v33, %v2662_v42  ;;  %v3335_v44 = vpop.f32.mrb[70].mxu0 }
 0x409   : > { %v2777_v8 = vadd.f32 %v5817_v15, %v2738_v3  ;;  %v2739_v52 = vmul.f32 %v3335_v44, %v5812_v33  ;;  %v2665_v32 = vpop.f32.mrb[71].mxu0 }
 0x40a   : > { %v2775_v6 = vadd.f32 %v5817_v15, %v2736_v57  ;;  %v2737_v50 = vmul.f32 %v5812_v33, %v2665_v32  ;;  %v3942_v57 = vld [vmem:[%s4217_s23 + $0xf8] sm:$0xff] }
 0x40b   : > { %v2809_v60 = vadd.f32 %v3932_v1, %v2777_v8  ;;  %v2778_v25 = vadd.f32 %v5817_v15, %v2739_v52 }
 0x40c   : > { %v2807_v49 = vadd.f32 %v3933_v16, %v2775_v6  ;;  %v2776_v26 = vadd.f32 %v5817_v15, %v2737_v50 }
 0x40d   : > { %v2841_v46 = vmax.f32 %v2809_v60, 0.0  ;;  %v2810_v37 = vadd.f32 %v3934_v7, %v2778_v25 }
 0x40e   : > { %v2839_v59 = vmax.f32 %v2807_v49, 0.0  ;;  %v2808_v14 = vadd.f32 %v3935_v58, %v2776_v26 }
 0x40f   : > { %2873 = vst [vmem:[%s5833_s28 + $0xb0] sm:$0xff] %v2841_v46  ;;  %v2842_v62 = vmax.f32 %v2810_v37, 0.0 }
 0x410   : > { %2871 = vst [vmem:[%s5833_s28 + $0xa0] sm:$0xff] %v2839_v59  ;;  %v2840_v18 = vmax.f32 %v2808_v14, 0.0 }
 0x411   : > { %2874 = vst [vmem:[%s5833_s28 + $0xb8] sm:$0xff] %v2842_v62 }
 0x412   : > { %2872 = vst [vmem:[%s5833_s28 + $0xa8] sm:$0xff] %v2840_v18 }
 0x416   : > { %v3338_v10 = vpop.f32.mrb[72].mxu0 }
 0x417   : > { %v2742_v12 = vmul.f32 %v3338_v10, %v5812_v33  ;;  %v2678_v61 = vpop.f32.mrb[73].mxu0 }
 0x418   : > { %v2740_v36 = vmul.f32 %v5812_v33, %v2678_v61  ;;  %v3339_v35 = vpop.f32.mrb[74].mxu0 }
 0x419   : > { %v2781_v54 = vadd.f32 %v5817_v15, %v2742_v12  ;;  %v2743_v56 = vmul.f32 %v3339_v35, %v5812_v33  ;;  %v2681_v38 = vpop.f32.mrb[75].mxu0 }
 0x41a   : > { %v2779_v24 = vadd.f32 %v5817_v15, %v2740_v36  ;;  %v2741_v13 = vmul.f32 %v5812_v33, %v2681_v38 }
 0x41b   : > { %v2813_v23 = vadd.f32 %v3936_v11, %v2781_v54  ;;  %v2782_v22 = vadd.f32 %v5817_v15, %v2743_v56 }
 0x41c   : > { %v2811_v4 = vadd.f32 %v3937_v39, %v2779_v24  ;;  %v2780_v40 = vadd.f32 %v5817_v15, %v2741_v13 }
 0x41d   : > { %v2845_v2 = vmax.f32 %v2813_v23, 0.0  ;;  %v2814_v5 = vadd.f32 %v3938_v31, %v2782_v22 }
 0x41e   : > { %v2843_v63 = vmax.f32 %v2811_v4, 0.0  ;;  %v2812_v45 = vadd.f32 %v3939_v29, %v2780_v40 }
 0x41f   : > { %2877 = vst [vmem:[%s5833_s28 + $0xd0] sm:$0xff] %v2845_v2  ;;  %v2846_v9 = vmax.f32 %v2814_v5, 0.0 }
 0x420   : > { %2875 = vst [vmem:[%s5833_s28 + $0xc0] sm:$0xff] %v2843_v63  ;;  %v2844_v27 = vmax.f32 %v2812_v45, 0.0 }
 0x421   : > { %2878 = vst [vmem:[%s5833_s28 + $0xd8] sm:$0xff] %v2846_v9 }
 0x422   : > { %2876 = vst [vmem:[%s5833_s28 + $0xc8] sm:$0xff] %v2844_v27 }
 0x426   : > { %v3342_v34 = vpop.f32.mrb[76].mxu0 }
 0x427   : > { %v2746_v48 = vmul.f32 %v3342_v34, %v5812_v33  ;;  %v2694_v21 = vpop.f32.mrb[77].mxu0 }
 0x428   : > { %v2744_v28 = vmul.f32 %v5812_v33, %v2694_v21  ;;  %v3343_v0 = vpop.f32.mrb[78].mxu0 }
 0x429   : > { %v2785_v30 = vadd.f32 %v5817_v15, %v2746_v48  ;;  %v2747_v43 = vmul.f32 %v3343_v0, %v5812_v33  ;;  %v2697_v47 = vpop.f32.mrb[79].mxu0 }
 0x42a   : > { %v2783_v53 = vadd.f32 %v5817_v15, %v2744_v28  ;;  %v2745_v51 = vmul.f32 %v5812_v33, %v2697_v47  ;;  %v3943_v33 = vld [vmem:[%s4217_s23 + $0xe8] sm:$0xff]  ;;  %s4049_s23 = smov [#allocation5]  }
 0x42b   : > { %v2817_v41 = vadd.f32 %v3940_v17, %v2785_v30  ;;  %v2786_v20 = vadd.f32 %v5817_v15, %v2747_v43  ;;  %s3978_s29 = sshll.u32 %s4049_s23, 4  ;;  %s3979_s29 = int_to_ptr.vmem [resolvable:$false] %s3978_s29 }
 0x42c   : > { %v2815_v19 = vadd.f32 %v3941_v55, %v2783_v53  ;;  %v2784_v3 = vadd.f32 %v5817_v15, %v2745_v51  ;;  %s3980_s21 = scalar_lea.vmem %s3979_s29, 8192  ;;  %p3981_p8 = scmp.lt.s32.totalorder %s5955_s22, %s3979_s29 }
 0x42d   : > { %v2849_v42 = vmax.f32 %v2817_v41, 0.0  ;;  %v2818_v44 = vadd.f32 %v3942_v57, %v2786_v20  ;;  %p3982_p10 = scmp.lt.s32.totalorder %s3980_s21, %s3974_s11 }
 0x42e   : > { %v2847_v8 = vmax.f32 %v2815_v19, 0.0  ;;  %v2816_v52 = vadd.f32 %v3943_v33, %v2784_v3 }
 0x42f   : > { %2881 = vst [vmem:[%s5833_s28 + $0xf0] sm:$0xff] %v2849_v42  ;;  %v2850_v32 = vmax.f32 %v2818_v44, 0.0  ;;  %p3983_p0 = por %p3982_p10, %p3981_p8 }
 0x430   : > { %2879 = vst [vmem:[%s5833_s28 + $0xe0] sm:$0xff] %v2847_v8  ;;  %v2848_v15 = vmax.f32 %v2816_v52, 0.0 }
 0x431   : > { %2882 = vst [vmem:[%s5833_s28 + $0xf8] sm:$0xff] %v2850_v32  ;;  %p3984_p2 = pnand %p3983_p0, %p3977_p13 }
 0x432   : > { %2880 = vst [vmem:[%s5833_s28 + $0xe8] sm:$0xff] %v2848_v15 }
 0x433   : > { %3987 = shalt.err (!%p3984_p2)
}
 0x434   : > { %s3988_s30 = scalar_lea.hbm %s5953_s24, 4096  ;;  %s3992_s12 = scalar_lea.hbm %s6012_s10, 8192 }
 0x435   : > { %p3989_p4 = scmp.ne.s32.totalorder %s5953_s24, %s3988_s30  ;;  %p3993_p9 = scmp.lt.u32.totalorder %s5953_s24, %s6012_s10 }
 0x436   : > { %p3994_p1 = scmp.lt.u32.totalorder %s3992_s12, %s3988_s30  ;;  %p3996_p6 = scmp.lt.u32.totalorder %s3988_s30, %s5953_s24 }
 0x437   : > { %p3990_p5 = pnand %p3989_p4, %p6182_p11 }
 0x438   : > { %p3995_p3 = por %p3994_p1, %p3993_p9 }
 0x439   : > { %p3991_p7 = pneg %p3990_p5 }
 0x43a   : > { %p3997_p12 = por %p3996_p6, %p3995_p3 }
 0x43c   : > { %p3998_p13 = pnand %p3997_p12, %p3991_p7 }
 0x43e   : > { %4001 = shalt.err (!%p3998_p13)
}
 0x43f   : > { %s4050_s11 = smov 128   ;;  %s4051_s29 = smov 8  }
 0x440   : > { %3362 = dma.vmem_to_hbm [thread:$0]  (%p6182_p11), %s5955_s22, 4096, %s5953_s24, %s2884_s17, %s4050_s11, %s4050_s11, %s4051_s29  }
 0x441 PF: > { %s2912_s21 = sand.u32 1, %s4028_s13   ;;  %p6183_p8 = scmp.ne.s32.totalorder %s6070_s26, 0 }
 0x442   : > { %p6184_p10 = scmp.ge.s32.totalorder %s4040_s16, 2  ;;  %s2913_s30 = scalar_lea.sflag [#allocation4], %s2912_s21 }
 0x444   : > { %p3369_p0 = pnand %p6184_p10, %p6183_p8 }
 0x446   : > { %4023 = dma.done.wait (!%p3369_p0), %s2913_s30, 4096  }
 0x447   : > { %4025 = vsyncadd (!%p3369_p0), %s2913_s30, 4294963200  ;;  %s6185_s28 = sld [smem:[#allocation8_spill]]  ;;  %p23_p2 = scmp.ge.s32.totalorder %s4132_s19, 4  }
 0x448   : > { %s6186_s13 = smov %s4032_s14  ;;  %s6187_s14 = smov %s4036_s15 }
 0x449   : > { %s6189_s16 = smov %s4132_s19  ;;  %25 = sbr.rel (!%p23_p2) target bundleno = 5 (0x5), region = 105 }
 0x44d   : > { %s6188_s15 = smov %s6185_s28 }
 0x450   :  { %2918 = vsyncpa [#allocation3], 1 }
 0x451   :  { %2920 = vsyncpa [#allocation3 + $0x1], 1 }
 0x452   :  { %2921 = vsyncpa [#allocation4], 1 }
 0x453   :  { %2923 = vsyncpa [#allocation4 + $0x1], 1 }

</bundles_post_ra>
